<compile_context>
chip_gen: v7x
topology: tpu7x:2x2x1
jax: 0.10.0
libtpu: 0.0.40
codegen_flags: <defaults>
</compile_context>

<pallas_src>
import functools

import jax
import jax.numpy as jnp
from jax.experimental import pallas as pl
from jax.experimental.pallas import tpu as pltpu

LANES = 128  # lane-padded channel width (real channels = in_channels + growth = 48)


def _fused_kernel(xflat_ref, w5_ref, b5_ref, wres_ref, bres_ref, o_ref,
                  slab_ref, p5_ref, p3_ref, *, H, W, K5, n_res):
    """Whole MakeDense1 forward for one batch element, fully VMEM-resident.

    Conv outputs for pixel (y, x) land at slab row y*Wp + x (window-top-left
    convention); rows with x >= W are don't-care seam rows that never feed a
    valid output.

    xflat_ref: (1, (H+5)*Wp, 128) f32   zero/channel-padded input, flattened
    w5_ref:    (K5*K5*128, 128)  bf16   5x5 conv as one im2col matmul operand
    b5_ref:    (1, 128)          f32
    wres_ref:  (2*n_res, 9*128, 128) bf16  one matmul operand per 3x3 conv
    bres_ref:  (2*n_res, 1, 128)     f32
    o_ref:     (1, H*Wp, 128)    f32   lane-dense out-slab
    slab_ref:  ((H+2)*Wp + 8, 128) f32  reflection-padded activation slab
    p5_ref:    (H*Wp, K5*K5*128) bf16   5x5 im2col patch matrix
    p3_ref:    (H*Wp, 9*128)     bf16   3x3 im2col patch matrix
    """
    Wp = W + 4                     # shared slab width (3x3 slabs use cols 0..W+1)
    M = H * Wp                     # out-slab rows (valid rows: y*Wp + x, x < W)
    C = LANES

    # Keep the few rows past the 3x3 slab finite; they are only read by the
    # don't-care seam rows of the im2col.
    slab_ref[(H + 2) * Wp:, :] = jnp.zeros((8, C), jnp.float32)

    # ---- stage 1: out = cat(x, relu(conv5x5(x)))  ==  one K = K5*K5*128 matmul.
    # The concat is folded in: the packed 5x5 weights only write channels
    # [Cin, 48); channels [0, Cin) come from adding the original pixels below.
    for t in range(K5 * K5):                      # static: 25 aligned tap copies
        ky, kx = divmod(t, K5)
        d = ky * Wp + kx
        p5_ref[:, t * C:(t + 1) * C] = xflat_ref[0, d:d + M, :].astype(jnp.bfloat16)
    conv5 = jnp.dot(p5_ref[...], w5_ref[...], preferred_element_type=jnp.float32)
    x_center = xflat_ref[0, 2 * Wp + 2:2 * Wp + 2 + M, :]   # pixel (y, x) rows, f32
    cur = x_center + jnp.maximum(conv5 + b5_ref[...], 0.0)  # (M, 128) f32

    # Column index of every out-slab row (loop-invariant masks).
    col = jax.lax.broadcasted_iota(jnp.int32, (M, C), 0) % Wp
    is_left = col == 0
    is_right = col == W + 1

    def reflect_embed(v):
        """Store ReflectionPad2d(1)(v) into slab_ref rows [0, (H+2)*Wp).

        v is an out-slab (valid at y*Wp + x).  Interior / left / right columns
        of padded rows 1..H are sublane-shifted copies of v (shift 1 / -1 / 3);
        top/bottom padded rows are copies of padded rows 2 / H-1.  Seam columns
        W+2..W+3 carry garbage that never reaches a valid output row.
        """
        core = jnp.where(is_left, jnp.roll(v, -1, axis=0),
                         jnp.where(is_right, jnp.roll(v, 3, axis=0),
                                   jnp.roll(v, 1, axis=0)))
        slab_ref[Wp:Wp + M, :] = core                                   # rows 1..H
        slab_ref[0:Wp, :] = core[Wp:2 * Wp, :]                          # top row
        slab_ref[(H + 1) * Wp:(H + 2) * Wp, :] = core[(H - 2) * Wp:(H - 1) * Wp, :]

    def conv3x3(idx):
        """One K = 9*128 matmul over the current reflection-padded slab."""
        for t in range(9):                         # static: 9 aligned tap copies
            ky, kx = divmod(t, 3)
            d = ky * Wp + kx
            p3_ref[:, t * C:(t + 1) * C] = slab_ref[d:d + M, :].astype(jnp.bfloat16)
        return jnp.dot(p3_ref[...], wres_ref[idx],
                       preferred_element_type=jnp.float32) + bres_ref[idx]

    def res_block(b, carry):                       # serially dependent blocks
        reflect_embed(carry)
        h = jnp.maximum(conv3x3(2 * b), 0.0)
        reflect_embed(h)
        return conv3x3(2 * b + 1) * 0.1 + carry    # f32 residual chain

    cur = jax.lax.fori_loop(0, n_res, res_block, cur)
    o_ref[0] = cur


def make_dense1(x_nchw, params):
    """Forward of MakeDense1. Input/output NCHW (PyTorch convention)."""
    N, Cin, H, W = x_nchw.shape
    K5 = params["conv_w"].shape[0]
    G = params["conv_w"].shape[3]
    C = Cin + G                           # ResidualBlock channel count (48)
    n_res = len(params["res"])
    Wp = W + 4
    R_in = (H + 5) * Wp                   # extra bottom row: im2col never reads OOB
    M = H * Wp

    # NCHW -> NHWC, zero-pad spatially for the 5x5 (pad 2 + one spare bottom
    # row), lane-pad channels to 128 and flatten rows -> lane-dense flat slab.
    x = jnp.transpose(x_nchw, (0, 2, 3, 1))
    xflat = jnp.pad(x, ((0, 0), (2, 3), (2, 2), (0, LANES - Cin))).reshape(N, R_in, LANES)

    # 5x5 conv packed as one (25*128, 128) matmul operand with the
    # torch.cat((x, relu(conv(x))), 1) folded in: the conv writes channels
    # [Cin, C); channels [0, Cin) stay zero and are supplied by adding the
    # original pixels in-kernel; channels [C, 128) stay exactly zero.
    w5p = jnp.zeros((K5 * K5, LANES, LANES), jnp.float32)
    w5p = w5p.at[:, :Cin, Cin:C].set(params["conv_w"].reshape(K5 * K5, Cin, G))
    w5p = w5p.reshape(K5 * K5 * LANES, LANES).astype(jnp.bfloat16)
    b5p = jnp.zeros((1, LANES), jnp.float32).at[0, Cin:C].set(params["conv_b"])

    # Residual-block 3x3 convs: one (9*128, 128) bf16 matmul operand per conv.
    ws, bs = [], []
    for (w1, b1, w2, b2) in params["res"]:
        for w, b in ((w1, b1), (w2, b2)):
            wp = jnp.zeros((9, LANES, LANES), jnp.float32)
            wp = wp.at[:, :C, :C].set(w.reshape(9, C, C))
            ws.append(wp.reshape(9 * LANES, LANES))
            bs.append(jnp.zeros((1, LANES), jnp.float32).at[0, :C].set(b))
    wres = jnp.stack(ws).astype(jnp.bfloat16)          # (2*n_res, 9*128, 128)
    bres = jnp.stack(bs)                               # (2*n_res, 1, 128)

    kernel = functools.partial(_fused_kernel, H=H, W=W, K5=K5, n_res=n_res)
    out = pl.pallas_call(
        kernel,
        out_shape=jax.ShapeDtypeStruct((N, M, LANES), jnp.float32),
        grid_spec=pltpu.PrefetchScalarGridSpec(
            num_scalar_prefetch=0,
            grid=(N,),
            in_specs=[
                pl.BlockSpec((1, R_in, LANES), lambda n: (n, 0, 0)),
                pl.BlockSpec((K5 * K5 * LANES, LANES), lambda n: (0, 0)),
                pl.BlockSpec((1, LANES), lambda n: (0, 0)),
                pl.BlockSpec((2 * n_res, 9 * LANES, LANES), lambda n: (0, 0, 0)),
                pl.BlockSpec((2 * n_res, 1, LANES), lambda n: (0, 0, 0)),
            ],
            out_specs=pl.BlockSpec((1, M, LANES), lambda n: (n, 0, 0)),
            scratch_shapes=[
                pltpu.VMEM(((H + 2) * Wp + 8, LANES), jnp.float32),   # padded slab
                pltpu.VMEM((M, K5 * K5 * LANES), jnp.bfloat16),       # 5x5 im2col
                pltpu.VMEM((M, 9 * LANES), jnp.bfloat16),             # 3x3 im2col
            ],
        ),
        compiler_params=pltpu.CompilerParams(
            dimension_semantics=("parallel",),
            vmem_limit_bytes=32 * 1024 * 1024),
    )(xflat, w5p, b5p, wres, bres)

    # Valid pixels of the out-slab are rows y*Wp + x (x < W), channels [0, C).
    out = out.reshape(N, H, Wp, LANES)[:, :, :W, :C]
    return jnp.transpose(out, (0, 3, 1, 2))            # -> NCHW


def init_params(key, in_channels, growth_rate, kernel_size=5, res_blocks=6):
    """Deterministic synthetic weights. Conv weights stored as [KH,KW,Cin,Cout]."""
    params = {}
    key, k_w, k_b = jax.random.split(key, 3)
    params["conv_w"] = 0.05 * jax.random.normal(
        k_w, (kernel_size, kernel_size, in_channels, growth_rate), jnp.float32)
    params["conv_b"] = 0.01 * jax.random.normal(k_b, (growth_rate,), jnp.float32)

    ch = 48  # ResidualBlock(48) is hard-coded in the PyTorch module
    res = []
    for _ in range(res_blocks - 1):
        key, k1, k2, k3, k4 = jax.random.split(key, 5)
        w1 = 0.05 * jax.random.normal(k1, (3, 3, ch, ch), jnp.float32)
        b1 = 0.01 * jax.random.normal(k2, (ch,), jnp.float32)
        w2 = 0.05 * jax.random.normal(k3, (3, 3, ch, ch), jnp.float32)
        b2 = 0.01 * jax.random.normal(k4, (ch,), jnp.float32)
        res.append((w1, b1, w2, b2))
    params["res"] = res
    return params


def _make_dense1_reference(x_nchw, params):
    """Pure-XLA float32 reference used only to validate the fused kernel."""
    dn = ("NHWC", "HWIO", "NHWC")

    def conv(v, w, b, mode):
        p = w.shape[0] // 2
        vp = jnp.pad(v, ((0, 0), (p, p), (p, p), (0, 0)), mode=mode)
        o = jax.lax.conv_general_dilated(vp, w, (1, 1), "VALID",
                                         dimension_numbers=dn,
                                         precision=jax.lax.Precision.HIGHEST)
        return o + b[None, None, None, :]

    x = jnp.transpose(x_nchw, (0, 2, 3, 1))
    g = jax.nn.relu(conv(x, params["conv_w"], params["conv_b"], "constant"))
    out = jnp.concatenate([x, g], axis=-1)
    for (w1, b1, w2, b2) in params["res"]:
        res = out
        h = jax.nn.relu(conv(out, w1, b1, "reflect"))
        out = conv(h, w2, b2, "reflect") * 0.1 + res
    return jnp.transpose(out, (0, 3, 1, 2))


if __name__ == "__main__":
    # ResidualBlock(48) forces in_channels + growth_rate == 48.
    in_channels, growth_rate = 16, 32
    N, H, W = 2, 8, 8

    key = jax.random.PRNGKey(0)
    key, kx = jax.random.split(key)
    x = jax.random.normal(kx, (N, in_channels, H, W), jnp.float32)

    params = init_params(key, in_channels, growth_rate,
                         kernel_size=5, res_blocks=6)

    out = jax.jit(make_dense1)(x, params)
    out = jax.block_until_ready(out)
    assert out.shape == (N, in_channels + growth_rate, H, W), out.shape
    assert bool(jnp.all(jnp.isfinite(out)))

    ref = _make_dense1_reference(x, params)
    max_err = float(jnp.max(jnp.abs(out - ref)))
    tol = 2.5e-2 * max(1.0, float(jnp.max(jnp.abs(ref))))   # relative-style check
    assert max_err < tol, f"max abs error {max_err} exceeds tolerance {tol}"

    print("KERNEL_OK")
</pallas_src>

<mosaic_0001>
module attributes {stable_mosaic.version = 11 : i64} {
  func.func @_fused_kernel(%arg0: i32, %arg1: memref<1x156x128xf32, #tpu.memory_space<vmem>>, %arg2: memref<3200x128xbf16, #tpu.memory_space<vmem>>, %arg3: memref<1x128xf32, #tpu.memory_space<vmem>>, %arg4: memref<10x1152x128xbf16, #tpu.memory_space<vmem>>, %arg5: memref<10x1x128xf32, #tpu.memory_space<vmem>>, %arg6: memref<1x96x128xf32, #tpu.memory_space<vmem>>, %arg7: memref<128x128xf32, #tpu.memory_space<vmem>>, %arg8: memref<96x3200xbf16, #tpu.memory_space<vmem>>, %arg9: memref<96x1152xbf16, #tpu.memory_space<vmem>>) attributes {dimension_semantics = [#tpu.dimension_semantics<parallel>], iteration_bounds = array<i64: 2>, scalar_prefetch = 0 : i64, scratch_operands = 3 : i64, tpu.core_type = #tpu.core_type<tc>, window_params = [{transform_indices = @transform_0, window_bounds = array<i64: 1, 156, 128>}, {pipeline_mode = #tpu.pipeline_mode<synchronous>, transform_indices = @transform_1, window_bounds = array<i64: 3200, 128>}, {pipeline_mode = #tpu.pipeline_mode<synchronous>, transform_indices = @transform_2, window_bounds = array<i64: 1, 128>}, {pipeline_mode = #tpu.pipeline_mode<synchronous>, transform_indices = @transform_3, window_bounds = array<i64: 10, 1152, 128>}, {pipeline_mode = #tpu.pipeline_mode<synchronous>, transform_indices = @transform_4, window_bounds = array<i64: 10, 1, 128>}, {transform_indices = @transform_5, window_bounds = array<i64: 1, 96, 128>}]} {
    %cst = arith.constant 0.000000e+00 : f32
    %0 = vector.broadcast %cst : f32 to vector<8x128xf32>
    %c120 = arith.constant 120 : index
    %c0 = arith.constant 0 : index
    %1 = vector.load %arg7[%c120, %c0] : memref<128x128xf32, #tpu.memory_space<vmem>>, vector<8x128xf32>
    tpu.vector_store %arg7[%c120, %c0], %0 {strides = array<i32>} : memref<128x128xf32, #tpu.memory_space<vmem>>, vector<8x128xf32>,
    %c0_0 = arith.constant 0 : index
    %c0_1 = arith.constant 0 : index
    %c0_2 = arith.constant 0 : index
    %2 = vector.load %arg1[%c0_0, %c0_1, %c0_2] : memref<1x156x128xf32, #tpu.memory_space<vmem>>, vector<1x96x128xf32>
    %3 = vector.shape_cast %2 : vector<1x96x128xf32> to vector<96x128xf32>
    %4 = arith.truncf %3 : vector<96x128xf32> to vector<96x128xbf16>
    %c0_3 = arith.constant 0 : index
    %c0_4 = arith.constant 0 : index
    %5 = vector.load %arg8[%c0_3, %c0_4] : memref<96x3200xbf16, #tpu.memory_space<vmem>>, vector<96x128xbf16>
    tpu.vector_store %arg8[%c0_3, %c0_4], %4 {strides = array<i32>} : memref<96x3200xbf16, #tpu.memory_space<vmem>>, vector<96x128xbf16>,
    %c0_5 = arith.constant 0 : index
    %c1 = arith.constant 1 : index
    %c0_6 = arith.constant 0 : index
    %6 = vector.load %arg1[%c0_5, %c1, %c0_6] : memref<1x156x128xf32, #tpu.memory_space<vmem>>, vector<1x96x128xf32>
    %7 = vector.shape_cast %6 : vector<1x96x128xf32> to vector<96x128xf32>
    %8 = arith.truncf %7 : vector<96x128xf32> to vector<96x128xbf16>
    %c0_7 = arith.constant 0 : index
    %c128 = arith.constant 128 : index
    %9 = vector.load %arg8[%c0_7, %c128] : memref<96x3200xbf16, #tpu.memory_space<vmem>>, vector<96x128xbf16>
    tpu.vector_store %arg8[%c0_7, %c128], %8 {strides = array<i32>} : memref<96x3200xbf16, #tpu.memory_space<vmem>>, vector<96x128xbf16>,
    %c0_8 = arith.constant 0 : index
    %c2 = arith.constant 2 : index
    %c0_9 = arith.constant 0 : index
    %10 = vector.load %arg1[%c0_8, %c2, %c0_9] : memref<1x156x128xf32, #tpu.memory_space<vmem>>, vector<1x96x128xf32>
    %11 = vector.shape_cast %10 : vector<1x96x128xf32> to vector<96x128xf32>
    %12 = arith.truncf %11 : vector<96x128xf32> to vector<96x128xbf16>
    %c0_10 = arith.constant 0 : index
    %c256 = arith.constant 256 : index
    %13 = vector.load %arg8[%c0_10, %c256] : memref<96x3200xbf16, #tpu.memory_space<vmem>>, vector<96x128xbf16>
    tpu.vector_store %arg8[%c0_10, %c256], %12 {strides = array<i32>} : memref<96x3200xbf16, #tpu.memory_space<vmem>>, vector<96x128xbf16>,
    %c0_11 = arith.constant 0 : index
    %c3 = arith.constant 3 : index
    %c0_12 = arith.constant 0 : index
    %14 = vector.load %arg1[%c0_11, %c3, %c0_12] : memref<1x156x128xf32, #tpu.memory_space<vmem>>, vector<1x96x128xf32>
    %15 = vector.shape_cast %14 : vector<1x96x128xf32> to vector<96x128xf32>
    %16 = arith.truncf %15 : vector<96x128xf32> to vector<96x128xbf16>
    %c0_13 = arith.constant 0 : index
    %c384 = arith.constant 384 : index
    %17 = vector.load %arg8[%c0_13, %c384] : memref<96x3200xbf16, #tpu.memory_space<vmem>>, vector<96x128xbf16>
    tpu.vector_store %arg8[%c0_13, %c384], %16 {strides = array<i32>} : memref<96x3200xbf16, #tpu.memory_space<vmem>>, vector<96x128xbf16>,
    %c0_14 = arith.constant 0 : index
    %c4 = arith.constant 4 : index
    %c0_15 = arith.constant 0 : index
    %18 = vector.load %arg1[%c0_14, %c4, %c0_15] : memref<1x156x128xf32, #tpu.memory_space<vmem>>, vector<1x96x128xf32>
    %19 = vector.shape_cast %18 : vector<1x96x128xf32> to vector<96x128xf32>
    %20 = arith.truncf %19 : vector<96x128xf32> to vector<96x128xbf16>
    %c0_16 = arith.constant 0 : index
    %c512 = arith.constant 512 : index
    %21 = vector.load %arg8[%c0_16, %c512] : memref<96x3200xbf16, #tpu.memory_space<vmem>>, vector<96x128xbf16>
    tpu.vector_store %arg8[%c0_16, %c512], %20 {strides = array<i32>} : memref<96x3200xbf16, #tpu.memory_space<vmem>>, vector<96x128xbf16>,
    %c0_17 = arith.constant 0 : index
    %c12 = arith.constant 12 : index
    %c0_18 = arith.constant 0 : index
    %22 = vector.load %arg1[%c0_17, %c12, %c0_18] : memref<1x156x128xf32, #tpu.memory_space<vmem>>, vector<1x96x128xf32>
    %23 = vector.shape_cast %22 : vector<1x96x128xf32> to vector<96x128xf32>
    %24 = arith.truncf %23 : vector<96x128xf32> to vector<96x128xbf16>
    %c0_19 = arith.constant 0 : index
    %c640 = arith.constant 640 : index
    %25 = vector.load %arg8[%c0_19, %c640] : memref<96x3200xbf16, #tpu.memory_space<vmem>>, vector<96x128xbf16>
    tpu.vector_store %arg8[%c0_19, %c640], %24 {strides = array<i32>} : memref<96x3200xbf16, #tpu.memory_space<vmem>>, vector<96x128xbf16>,
    %c0_20 = arith.constant 0 : index
    %c13 = arith.constant 13 : index
    %c0_21 = arith.constant 0 : index
    %26 = vector.load %arg1[%c0_20, %c13, %c0_21] : memref<1x156x128xf32, #tpu.memory_space<vmem>>, vector<1x96x128xf32>
    %27 = vector.shape_cast %26 : vector<1x96x128xf32> to vector<96x128xf32>
    %28 = arith.truncf %27 : vector<96x128xf32> to vector<96x128xbf16>
    %c0_22 = arith.constant 0 : index
    %c768 = arith.constant 768 : index
    %29 = vector.load %arg8[%c0_22, %c768] : memref<96x3200xbf16, #tpu.memory_space<vmem>>, vector<96x128xbf16>
    tpu.vector_store %arg8[%c0_22, %c768], %28 {strides = array<i32>} : memref<96x3200xbf16, #tpu.memory_space<vmem>>, vector<96x128xbf16>,
    %c0_23 = arith.constant 0 : index
    %c14 = arith.constant 14 : index
    %c0_24 = arith.constant 0 : index
    %30 = vector.load %arg1[%c0_23, %c14, %c0_24] : memref<1x156x128xf32, #tpu.memory_space<vmem>>, vector<1x96x128xf32>
    %31 = vector.shape_cast %30 : vector<1x96x128xf32> to vector<96x128xf32>
    %32 = arith.truncf %31 : vector<96x128xf32> to vector<96x128xbf16>
    %c0_25 = arith.constant 0 : index
    %c896 = arith.constant 896 : index
    %33 = vector.load %arg8[%c0_25, %c896] : memref<96x3200xbf16, #tpu.memory_space<vmem>>, vector<96x128xbf16>
    tpu.vector_store %arg8[%c0_25, %c896], %32 {strides = array<i32>} : memref<96x3200xbf16, #tpu.memory_space<vmem>>, vector<96x128xbf16>,
    %c0_26 = arith.constant 0 : index
    %c15 = arith.constant 15 : index
    %c0_27 = arith.constant 0 : index
    %34 = vector.load %arg1[%c0_26, %c15, %c0_27] : memref<1x156x128xf32, #tpu.memory_space<vmem>>, vector<1x96x128xf32>
    %35 = vector.shape_cast %34 : vector<1x96x128xf32> to vector<96x128xf32>
    %36 = arith.truncf %35 : vector<96x128xf32> to vector<96x128xbf16>
    %c0_28 = arith.constant 0 : index
    %c1024 = arith.constant 1024 : index
    %37 = vector.load %arg8[%c0_28, %c1024] : memref<96x3200xbf16, #tpu.memory_space<vmem>>, vector<96x128xbf16>
    tpu.vector_store %arg8[%c0_28, %c1024], %36 {strides = array<i32>} : memref<96x3200xbf16, #tpu.memory_space<vmem>>, vector<96x128xbf16>,
    %c0_29 = arith.constant 0 : index
    %c16 = arith.constant 16 : index
    %c0_30 = arith.constant 0 : index
    %38 = vector.load %arg1[%c0_29, %c16, %c0_30] : memref<1x156x128xf32, #tpu.memory_space<vmem>>, vector<1x96x128xf32>
    %39 = vector.shape_cast %38 : vector<1x96x128xf32> to vector<96x128xf32>
    %40 = arith.truncf %39 : vector<96x128xf32> to vector<96x128xbf16>
    %c0_31 = arith.constant 0 : index
    %c1152 = arith.constant 1152 : index
    %41 = vector.load %arg8[%c0_31, %c1152] : memref<96x3200xbf16, #tpu.memory_space<vmem>>, vector<96x128xbf16>
    tpu.vector_store %arg8[%c0_31, %c1152], %40 {strides = array<i32>} : memref<96x3200xbf16, #tpu.memory_space<vmem>>, vector<96x128xbf16>,
    %c0_32 = arith.constant 0 : index
    %c24 = arith.constant 24 : index
    %c0_33 = arith.constant 0 : index
    %42 = vector.load %arg1[%c0_32, %c24, %c0_33] : memref<1x156x128xf32, #tpu.memory_space<vmem>>, vector<1x96x128xf32>
    %43 = vector.shape_cast %42 : vector<1x96x128xf32> to vector<96x128xf32>
    %44 = arith.truncf %43 : vector<96x128xf32> to vector<96x128xbf16>
    %c0_34 = arith.constant 0 : index
    %c1280 = arith.constant 1280 : index
    %45 = vector.load %arg8[%c0_34, %c1280] : memref<96x3200xbf16, #tpu.memory_space<vmem>>, vector<96x128xbf16>
    tpu.vector_store %arg8[%c0_34, %c1280], %44 {strides = array<i32>} : memref<96x3200xbf16, #tpu.memory_space<vmem>>, vector<96x128xbf16>,
    %c0_35 = arith.constant 0 : index
    %c25 = arith.constant 25 : index
    %c0_36 = arith.constant 0 : index
    %46 = vector.load %arg1[%c0_35, %c25, %c0_36] : memref<1x156x128xf32, #tpu.memory_space<vmem>>, vector<1x96x128xf32>
    %47 = vector.shape_cast %46 : vector<1x96x128xf32> to vector<96x128xf32>
    %48 = arith.truncf %47 : vector<96x128xf32> to vector<96x128xbf16>
    %c0_37 = arith.constant 0 : index
    %c1408 = arith.constant 1408 : index
    %49 = vector.load %arg8[%c0_37, %c1408] : memref<96x3200xbf16, #tpu.memory_space<vmem>>, vector<96x128xbf16>
    tpu.vector_store %arg8[%c0_37, %c1408], %48 {strides = array<i32>} : memref<96x3200xbf16, #tpu.memory_space<vmem>>, vector<96x128xbf16>,
    %c0_38 = arith.constant 0 : index
    %c26 = arith.constant 26 : index
    %c0_39 = arith.constant 0 : index
    %50 = vector.load %arg1[%c0_38, %c26, %c0_39] : memref<1x156x128xf32, #tpu.memory_space<vmem>>, vector<1x96x128xf32>
    %51 = vector.shape_cast %50 : vector<1x96x128xf32> to vector<96x128xf32>
    %52 = arith.truncf %51 : vector<96x128xf32> to vector<96x128xbf16>
    %c0_40 = arith.constant 0 : index
    %c1536 = arith.constant 1536 : index
    %53 = vector.load %arg8[%c0_40, %c1536] : memref<96x3200xbf16, #tpu.memory_space<vmem>>, vector<96x128xbf16>
    tpu.vector_store %arg8[%c0_40, %c1536], %52 {strides = array<i32>} : memref<96x3200xbf16, #tpu.memory_space<vmem>>, vector<96x128xbf16>,
    %c0_41 = arith.constant 0 : index
    %c27 = arith.constant 27 : index
    %c0_42 = arith.constant 0 : index
    %54 = vector.load %arg1[%c0_41, %c27, %c0_42] : memref<1x156x128xf32, #tpu.memory_space<vmem>>, vector<1x96x128xf32>
    %55 = vector.shape_cast %54 : vector<1x96x128xf32> to vector<96x128xf32>
    %56 = arith.truncf %55 : vector<96x128xf32> to vector<96x128xbf16>
    %c0_43 = arith.constant 0 : index
    %c1664 = arith.constant 1664 : index
    %57 = vector.load %arg8[%c0_43, %c1664] : memref<96x3200xbf16, #tpu.memory_space<vmem>>, vector<96x128xbf16>
    tpu.vector_store %arg8[%c0_43, %c1664], %56 {strides = array<i32>} : memref<96x3200xbf16, #tpu.memory_space<vmem>>, vector<96x128xbf16>,
    %c0_44 = arith.constant 0 : index
    %c28 = arith.constant 28 : index
    %c0_45 = arith.constant 0 : index
    %58 = vector.load %arg1[%c0_44, %c28, %c0_45] : memref<1x156x128xf32, #tpu.memory_space<vmem>>, vector<1x96x128xf32>
    %59 = vector.shape_cast %58 : vector<1x96x128xf32> to vector<96x128xf32>
    %60 = arith.truncf %59 : vector<96x128xf32> to vector<96x128xbf16>
    %c0_46 = arith.constant 0 : index
    %c1792 = arith.constant 1792 : index
    %61 = vector.load %arg8[%c0_46, %c1792] : memref<96x3200xbf16, #tpu.memory_space<vmem>>, vector<96x128xbf16>
    tpu.vector_store %arg8[%c0_46, %c1792], %60 {strides = array<i32>} : memref<96x3200xbf16, #tpu.memory_space<vmem>>, vector<96x128xbf16>,
    %c0_47 = arith.constant 0 : index
    %c36 = arith.constant 36 : index
    %c0_48 = arith.constant 0 : index
    %62 = vector.load %arg1[%c0_47, %c36, %c0_48] : memref<1x156x128xf32, #tpu.memory_space<vmem>>, vector<1x96x128xf32>
    %63 = vector.shape_cast %62 : vector<1x96x128xf32> to vector<96x128xf32>
    %64 = arith.truncf %63 : vector<96x128xf32> to vector<96x128xbf16>
    %c0_49 = arith.constant 0 : index
    %c1920 = arith.constant 1920 : index
    %65 = vector.load %arg8[%c0_49, %c1920] : memref<96x3200xbf16, #tpu.memory_space<vmem>>, vector<96x128xbf16>
    tpu.vector_store %arg8[%c0_49, %c1920], %64 {strides = array<i32>} : memref<96x3200xbf16, #tpu.memory_space<vmem>>, vector<96x128xbf16>,
    %c0_50 = arith.constant 0 : index
    %c37 = arith.constant 37 : index
    %c0_51 = arith.constant 0 : index
    %66 = vector.load %arg1[%c0_50, %c37, %c0_51] : memref<1x156x128xf32, #tpu.memory_space<vmem>>, vector<1x96x128xf32>
    %67 = vector.shape_cast %66 : vector<1x96x128xf32> to vector<96x128xf32>
    %68 = arith.truncf %67 : vector<96x128xf32> to vector<96x128xbf16>
    %c0_52 = arith.constant 0 : index
    %c2048 = arith.constant 2048 : index
    %69 = vector.load %arg8[%c0_52, %c2048] : memref<96x3200xbf16, #tpu.memory_space<vmem>>, vector<96x128xbf16>
    tpu.vector_store %arg8[%c0_52, %c2048], %68 {strides = array<i32>} : memref<96x3200xbf16, #tpu.memory_space<vmem>>, vector<96x128xbf16>,
    %c0_53 = arith.constant 0 : index
    %c38 = arith.constant 38 : index
    %c0_54 = arith.constant 0 : index
    %70 = vector.load %arg1[%c0_53, %c38, %c0_54] : memref<1x156x128xf32, #tpu.memory_space<vmem>>, vector<1x96x128xf32>
    %71 = vector.shape_cast %70 : vector<1x96x128xf32> to vector<96x128xf32>
    %72 = arith.truncf %71 : vector<96x128xf32> to vector<96x128xbf16>
    %c0_55 = arith.constant 0 : index
    %c2176 = arith.constant 2176 : index
    %73 = vector.load %arg8[%c0_55, %c2176] : memref<96x3200xbf16, #tpu.memory_space<vmem>>, vector<96x128xbf16>
    tpu.vector_store %arg8[%c0_55, %c2176], %72 {strides = array<i32>} : memref<96x3200xbf16, #tpu.memory_space<vmem>>, vector<96x128xbf16>,
    %c0_56 = arith.constant 0 : index
    %c39 = arith.constant 39 : index
    %c0_57 = arith.constant 0 : index
    %74 = vector.load %arg1[%c0_56, %c39, %c0_57] : memref<1x156x128xf32, #tpu.memory_space<vmem>>, vector<1x96x128xf32>
    %75 = vector.shape_cast %74 : vector<1x96x128xf32> to vector<96x128xf32>
    %76 = arith.truncf %75 : vector<96x128xf32> to vector<96x128xbf16>
    %c0_58 = arith.constant 0 : index
    %c2304 = arith.constant 2304 : index
    %77 = vector.load %arg8[%c0_58, %c2304] : memref<96x3200xbf16, #tpu.memory_space<vmem>>, vector<96x128xbf16>
    tpu.vector_store %arg8[%c0_58, %c2304], %76 {strides = array<i32>} : memref<96x3200xbf16, #tpu.memory_space<vmem>>, vector<96x128xbf16>,
    %c0_59 = arith.constant 0 : index
    %c40 = arith.constant 40 : index
    %c0_60 = arith.constant 0 : index
    %78 = vector.load %arg1[%c0_59, %c40, %c0_60] : memref<1x156x128xf32, #tpu.memory_space<vmem>>, vector<1x96x128xf32>
    %79 = vector.shape_cast %78 : vector<1x96x128xf32> to vector<96x128xf32>
    %80 = arith.truncf %79 : vector<96x128xf32> to vector<96x128xbf16>
    %c0_61 = arith.constant 0 : index
    %c2432 = arith.constant 2432 : index
    %81 = vector.load %arg8[%c0_61, %c2432] : memref<96x3200xbf16, #tpu.memory_space<vmem>>, vector<96x128xbf16>
    tpu.vector_store %arg8[%c0_61, %c2432], %80 {strides = array<i32>} : memref<96x3200xbf16, #tpu.memory_space<vmem>>, vector<96x128xbf16>,
    %c0_62 = arith.constant 0 : index
    %c48 = arith.constant 48 : index
    %c0_63 = arith.constant 0 : index
    %82 = vector.load %arg1[%c0_62, %c48, %c0_63] : memref<1x156x128xf32, #tpu.memory_space<vmem>>, vector<1x96x128xf32>
    %83 = vector.shape_cast %82 : vector<1x96x128xf32> to vector<96x128xf32>
    %84 = arith.truncf %83 : vector<96x128xf32> to vector<96x128xbf16>
    %c0_64 = arith.constant 0 : index
    %c2560 = arith.constant 2560 : index
    %85 = vector.load %arg8[%c0_64, %c2560] : memref<96x3200xbf16, #tpu.memory_space<vmem>>, vector<96x128xbf16>
    tpu.vector_store %arg8[%c0_64, %c2560], %84 {strides = array<i32>} : memref<96x3200xbf16, #tpu.memory_space<vmem>>, vector<96x128xbf16>,
    %c0_65 = arith.constant 0 : index
    %c49 = arith.constant 49 : index
    %c0_66 = arith.constant 0 : index
    %86 = vector.load %arg1[%c0_65, %c49, %c0_66] : memref<1x156x128xf32, #tpu.memory_space<vmem>>, vector<1x96x128xf32>
    %87 = vector.shape_cast %86 : vector<1x96x128xf32> to vector<96x128xf32>
    %88 = arith.truncf %87 : vector<96x128xf32> to vector<96x128xbf16>
    %c0_67 = arith.constant 0 : index
    %c2688 = arith.constant 2688 : index
    %89 = vector.load %arg8[%c0_67, %c2688] : memref<96x3200xbf16, #tpu.memory_space<vmem>>, vector<96x128xbf16>
    tpu.vector_store %arg8[%c0_67, %c2688], %88 {strides = array<i32>} : memref<96x3200xbf16, #tpu.memory_space<vmem>>, vector<96x128xbf16>,
    %c0_68 = arith.constant 0 : index
    %c50 = arith.constant 50 : index
    %c0_69 = arith.constant 0 : index
    %90 = vector.load %arg1[%c0_68, %c50, %c0_69] : memref<1x156x128xf32, #tpu.memory_space<vmem>>, vector<1x96x128xf32>
    %91 = vector.shape_cast %90 : vector<1x96x128xf32> to vector<96x128xf32>
    %92 = arith.truncf %91 : vector<96x128xf32> to vector<96x128xbf16>
    %c0_70 = arith.constant 0 : index
    %c2816 = arith.constant 2816 : index
    %93 = vector.load %arg8[%c0_70, %c2816] : memref<96x3200xbf16, #tpu.memory_space<vmem>>, vector<96x128xbf16>
    tpu.vector_store %arg8[%c0_70, %c2816], %92 {strides = array<i32>} : memref<96x3200xbf16, #tpu.memory_space<vmem>>, vector<96x128xbf16>,
    %c0_71 = arith.constant 0 : index
    %c51 = arith.constant 51 : index
    %c0_72 = arith.constant 0 : index
    %94 = vector.load %arg1[%c0_71, %c51, %c0_72] : memref<1x156x128xf32, #tpu.memory_space<vmem>>, vector<1x96x128xf32>
    %95 = vector.shape_cast %94 : vector<1x96x128xf32> to vector<96x128xf32>
    %96 = arith.truncf %95 : vector<96x128xf32> to vector<96x128xbf16>
    %c0_73 = arith.constant 0 : index
    %c2944 = arith.constant 2944 : index
    %97 = vector.load %arg8[%c0_73, %c2944] : memref<96x3200xbf16, #tpu.memory_space<vmem>>, vector<96x128xbf16>
    tpu.vector_store %arg8[%c0_73, %c2944], %96 {strides = array<i32>} : memref<96x3200xbf16, #tpu.memory_space<vmem>>, vector<96x128xbf16>,
    %c0_74 = arith.constant 0 : index
    %c52 = arith.constant 52 : index
    %c0_75 = arith.constant 0 : index
    %98 = vector.load %arg1[%c0_74, %c52, %c0_75] : memref<1x156x128xf32, #tpu.memory_space<vmem>>, vector<1x96x128xf32>
    %99 = vector.shape_cast %98 : vector<1x96x128xf32> to vector<96x128xf32>
    %100 = arith.truncf %99 : vector<96x128xf32> to vector<96x128xbf16>
    %c0_76 = arith.constant 0 : index
    %c3072 = arith.constant 3072 : index
    %101 = vector.load %arg8[%c0_76, %c3072] : memref<96x3200xbf16, #tpu.memory_space<vmem>>, vector<96x128xbf16>
    tpu.vector_store %arg8[%c0_76, %c3072], %100 {strides = array<i32>} : memref<96x3200xbf16, #tpu.memory_space<vmem>>, vector<96x128xbf16>,
    %c0_77 = arith.constant 0 : index
    %c0_78 = arith.constant 0 : index
    %102 = vector.load %arg8[%c0_77, %c0_78] : memref<96x3200xbf16, #tpu.memory_space<vmem>>, vector<96x3200xbf16>
    %c0_79 = arith.constant 0 : index
    %c0_80 = arith.constant 0 : index
    %103 = vector.load %arg2[%c0_79, %c0_80] : memref<3200x128xbf16, #tpu.memory_space<vmem>>, vector<3200x128xbf16>
    %cst_81 = arith.constant dense<0.000000e+00> : vector<96x128xf32>
    %104 = tpu.matmul %102, %103, %cst_81 {dimension_numbers = #tpu.dot_dimension_numbers<[1], [0], [0], [1], [0, 0, 1, 1], [], []>} : vector<96x3200xbf16>, vector<3200x128xbf16>, vector<96x128xf32> -> vector<96x128xf32>
    %c0_82 = arith.constant 0 : index
    %c26_83 = arith.constant 26 : index
    %c0_84 = arith.constant 0 : index
    %105 = vector.load %arg1[%c0_82, %c26_83, %c0_84] : memref<1x156x128xf32, #tpu.memory_space<vmem>>, vector<1x96x128xf32>
    %106 = vector.shape_cast %105 : vector<1x96x128xf32> to vector<96x128xf32>
    %c0_85 = arith.constant 0 : index
    %c0_86 = arith.constant 0 : index
    %107 = vector.load %arg3[%c0_85, %c0_86] : memref<1x128xf32, #tpu.memory_space<vmem>>, vector<1x128xf32>
    %108 = vector.broadcast %107 : vector<1x128xf32> to vector<96x128xf32>
    %109 = arith.addf %104, %108 : vector<96x128xf32>
    %cst_87 = arith.constant 0.000000e+00 : f32
    %110 = vector.broadcast %cst_87 : f32 to vector<96x128xf32>
    %111 = arith.maximumf %109, %110 : vector<96x128xf32>
    %112 = arith.addf %106, %111 : vector<96x128xf32>
    %113 = tpu.iota {dimensions = array<i32: 0>} : vector<96x128xi32>
    %c12_i32 = arith.constant 12 : i32
    %c0_i32 = arith.constant 0 : i32
    %114 = arith.cmpi eq, %c12_i32, %c0_i32 : i32
    %c1_i32 = arith.constant 1 : i32
    %115 = arith.select %114, %c1_i32, %c12_i32 : i32
    %116 = vector.broadcast %115 : i32 to vector<96x128xi32>
    %117 = arith.remsi %113, %116 : vector<96x128xi32>
    %c0_i32_88 = arith.constant 0 : i32
    %118 = vector.broadcast %c0_i32_88 : i32 to vector<96x128xi32>
    %119 = arith.cmpi ne, %117, %118 : vector<96x128xi32>
    %c0_i32_89 = arith.constant 0 : i32
    %120 = vector.broadcast %c0_i32_89 : i32 to vector<96x128xi32>
    %121 = arith.cmpi slt, %117, %120 : vector<96x128xi32>
    %c0_i32_90 = arith.constant 0 : i32
    %122 = arith.cmpi slt, %115, %c0_i32_90 : i32
    %123 = vector.broadcast %122 : i1 to vector<96x128xi1>
    %124 = vector.broadcast %123 : vector<96x128xi1> to vector<96x128xi1>
    %125 = arith.xori %121, %124 : vector<96x128xi1>
    %126 = arith.andi %125, %119 : vector<96x128xi1>
    %127 = vector.broadcast %115 : i32 to vector<96x128xi32>
    %128 = arith.addi %117, %127 : vector<96x128xi32>
    %129 = arith.select %126, %128, %117 : vector<96x128xi1>, vector<96x128xi32>
    %c0_i32_91 = arith.constant 0 : i32
    %130 = vector.broadcast %c0_i32_91 : i32 to vector<96x128xi32>
    %131 = arith.cmpi eq, %129, %130 : vector<96x128xi32>
    %c9_i32 = arith.constant 9 : i32
    %132 = vector.broadcast %c9_i32 : i32 to vector<96x128xi32>
    %133 = arith.cmpi eq, %129, %132 : vector<96x128xi32>
    %c0_i32_92 = arith.constant 0 : i32
    %c5_i32 = arith.constant 5 : i32
    %134 = arith.addi %c0_i32_92, %c5_i32 : i32
    %c1_i32_93 = arith.constant 1 : i32
    %135 = scf.for %arg10 = %c0_i32_92 to %134 step %c1_i32_93 iter_args(%arg11 = %112) -> (vector<96x128xf32>)  : i32 {
      %139 = vector.extract_strided_slice %arg11 {offsets = [1, 0], sizes = [95, 128], strides = [1, 1]} : vector<96x128xf32> to vector<95x128xf32>
      %140 = vector.extract_strided_slice %arg11 {offsets = [0, 0], sizes = [1, 128], strides = [1, 1]} : vector<96x128xf32> to vector<1x128xf32>
      %141 = tpu.concatenate %139, %140 in 0 : vector<95x128xf32>, vector<1x128xf32> -> vector<96x128xf32>
      %142 = vector.extract_strided_slice %arg11 {offsets = [93, 0], sizes = [3, 128], strides = [1, 1]} : vector<96x128xf32> to vector<3x128xf32>
      %143 = vector.extract_strided_slice %arg11 {offsets = [0, 0], sizes = [93, 128], strides = [1, 1]} : vector<96x128xf32> to vector<93x128xf32>
      %144 = tpu.concatenate %142, %143 in 0 : vector<3x128xf32>, vector<93x128xf32> -> vector<96x128xf32>
      %145 = vector.extract_strided_slice %arg11 {offsets = [95, 0], sizes = [1, 128], strides = [1, 1]} : vector<96x128xf32> to vector<1x128xf32>
      %146 = vector.extract_strided_slice %arg11 {offsets = [0, 0], sizes = [95, 128], strides = [1, 1]} : vector<96x128xf32> to vector<95x128xf32>
      %147 = tpu.concatenate %145, %146 in 0 : vector<1x128xf32>, vector<95x128xf32> -> vector<96x128xf32>
      %148 = arith.select %133, %144, %147 : vector<96x128xi1>, vector<96x128xf32>
      %149 = arith.select %131, %141, %148 : vector<96x128xi1>, vector<96x128xf32>
      %c12_98 = arith.constant 12 : index
      %c0_99 = arith.constant 0 : index
      %150 = vector.load %arg7[%c12_98, %c0_99] : memref<128x128xf32, #tpu.memory_space<vmem>>, vector<96x128xf32>
      tpu.vector_store %arg7[%c12_98, %c0_99], %149 {strides = array<i32>} : memref<128x128xf32, #tpu.memory_space<vmem>>, vector<96x128xf32>,
      %151 = vector.extract_strided_slice %149 {offsets = [12, 0], sizes = [12, 128], strides = [1, 1]} : vector<96x128xf32> to vector<12x128xf32>
      %c0_100 = arith.constant 0 : index
      %c0_101 = arith.constant 0 : index
      %152 = vector.load %arg7[%c0_100, %c0_101] : memref<128x128xf32, #tpu.memory_space<vmem>>, vector<12x128xf32>
      tpu.vector_store %arg7[%c0_100, %c0_101], %151 {strides = array<i32>} : memref<128x128xf32, #tpu.memory_space<vmem>>, vector<12x128xf32>,
      %153 = vector.extract_strided_slice %149 {offsets = [72, 0], sizes = [12, 128], strides = [1, 1]} : vector<96x128xf32> to vector<12x128xf32>
      %c108 = arith.constant 108 : index
      %c0_102 = arith.constant 0 : index
      %154 = vector.load %arg7[%c108, %c0_102] : memref<128x128xf32, #tpu.memory_space<vmem>>, vector<12x128xf32>
      tpu.vector_store %arg7[%c108, %c0_102], %153 {strides = array<i32>} : memref<128x128xf32, #tpu.memory_space<vmem>>, vector<12x128xf32>,
      %c2_i32 = arith.constant 2 : i32
      %155 = arith.muli %c2_i32, %arg10 : i32
      %c0_103 = arith.constant 0 : index
      %c0_104 = arith.constant 0 : index
      %156 = vector.load %arg7[%c0_103, %c0_104] : memref<128x128xf32, #tpu.memory_space<vmem>>, vector<96x128xf32>
      %157 = arith.truncf %156 : vector<96x128xf32> to vector<96x128xbf16>
      %c0_105 = arith.constant 0 : index
      %c0_106 = arith.constant 0 : index
      %158 = vector.load %arg9[%c0_105, %c0_106] : memref<96x1152xbf16, #tpu.memory_space<vmem>>, vector<96x128xbf16>
      tpu.vector_store %arg9[%c0_105, %c0_106], %157 {strides = array<i32>} : memref<96x1152xbf16, #tpu.memory_space<vmem>>, vector<96x128xbf16>,
      %c1_107 = arith.constant 1 : index
      %c0_108 = arith.constant 0 : index
      %159 = vector.load %arg7[%c1_107, %c0_108] : memref<128x128xf32, #tpu.memory_space<vmem>>, vector<96x128xf32>
      %160 = arith.truncf %159 : vector<96x128xf32> to vector<96x128xbf16>
      %c0_109 = arith.constant 0 : index
      %c128_110 = arith.constant 128 : index
      %161 = vector.load %arg9[%c0_109, %c128_110] : memref<96x1152xbf16, #tpu.memory_space<vmem>>, vector<96x128xbf16>
      tpu.vector_store %arg9[%c0_109, %c128_110], %160 {strides = array<i32>} : memref<96x1152xbf16, #tpu.memory_space<vmem>>, vector<96x128xbf16>,
      %c2_111 = arith.constant 2 : index
      %c0_112 = arith.constant 0 : index
      %162 = vector.load %arg7[%c2_111, %c0_112] : memref<128x128xf32, #tpu.memory_space<vmem>>, vector<96x128xf32>
      %163 = arith.truncf %162 : vector<96x128xf32> to vector<96x128xbf16>
      %c0_113 = arith.constant 0 : index
      %c256_114 = arith.constant 256 : index
      %164 = vector.load %arg9[%c0_113, %c256_114] : memref<96x1152xbf16, #tpu.memory_space<vmem>>, vector<96x128xbf16>
      tpu.vector_store %arg9[%c0_113, %c256_114], %163 {strides = array<i32>} : memref<96x1152xbf16, #tpu.memory_space<vmem>>, vector<96x128xbf16>,
      %c12_115 = arith.constant 12 : index
      %c0_116 = arith.constant 0 : index
      %165 = vector.load %arg7[%c12_115, %c0_116] : memref<128x128xf32, #tpu.memory_space<vmem>>, vector<96x128xf32>
      %166 = arith.truncf %165 : vector<96x128xf32> to vector<96x128xbf16>
      %c0_117 = arith.constant 0 : index
      %c384_118 = arith.constant 384 : index
      %167 = vector.load %arg9[%c0_117, %c384_118] : memref<96x1152xbf16, #tpu.memory_space<vmem>>, vector<96x128xbf16>
      tpu.vector_store %arg9[%c0_117, %c384_118], %166 {strides = array<i32>} : memref<96x1152xbf16, #tpu.memory_space<vmem>>, vector<96x128xbf16>,
      %c13_119 = arith.constant 13 : index
      %c0_120 = arith.constant 0 : index
      %168 = vector.load %arg7[%c13_119, %c0_120] : memref<128x128xf32, #tpu.memory_space<vmem>>, vector<96x128xf32>
      %169 = arith.truncf %168 : vector<96x128xf32> to vector<96x128xbf16>
      %c0_121 = arith.constant 0 : index
      %c512_122 = arith.constant 512 : index
      %170 = vector.load %arg9[%c0_121, %c512_122] : memref<96x1152xbf16, #tpu.memory_space<vmem>>, vector<96x128xbf16>
      tpu.vector_store %arg9[%c0_121, %c512_122], %169 {strides = array<i32>} : memref<96x1152xbf16, #tpu.memory_space<vmem>>, vector<96x128xbf16>,
      %c14_123 = arith.constant 14 : index
      %c0_124 = arith.constant 0 : index
      %171 = vector.load %arg7[%c14_123, %c0_124] : memref<128x128xf32, #tpu.memory_space<vmem>>, vector<96x128xf32>
      %172 = arith.truncf %171 : vector<96x128xf32> to vector<96x128xbf16>
      %c0_125 = arith.constant 0 : index
      %c640_126 = arith.constant 640 : index
      %173 = vector.load %arg9[%c0_125, %c640_126] : memref<96x1152xbf16, #tpu.memory_space<vmem>>, vector<96x128xbf16>
      tpu.vector_store %arg9[%c0_125, %c640_126], %172 {strides = array<i32>} : memref<96x1152xbf16, #tpu.memory_space<vmem>>, vector<96x128xbf16>,
      %c24_127 = arith.constant 24 : index
      %c0_128 = arith.constant 0 : index
      %174 = vector.load %arg7[%c24_127, %c0_128] : memref<128x128xf32, #tpu.memory_space<vmem>>, vector<96x128xf32>
      %175 = arith.truncf %174 : vector<96x128xf32> to vector<96x128xbf16>
      %c0_129 = arith.constant 0 : index
      %c768_130 = arith.constant 768 : index
      %176 = vector.load %arg9[%c0_129, %c768_130] : memref<96x1152xbf16, #tpu.memory_space<vmem>>, vector<96x128xbf16>
      tpu.vector_store %arg9[%c0_129, %c768_130], %175 {strides = array<i32>} : memref<96x1152xbf16, #tpu.memory_space<vmem>>, vector<96x128xbf16>,
      %c25_131 = arith.constant 25 : index
      %c0_132 = arith.constant 0 : index
      %177 = vector.load %arg7[%c25_131, %c0_132] : memref<128x128xf32, #tpu.memory_space<vmem>>, vector<96x128xf32>
      %178 = arith.truncf %177 : vector<96x128xf32> to vector<96x128xbf16>
      %c0_133 = arith.constant 0 : index
      %c896_134 = arith.constant 896 : index
      %179 = vector.load %arg9[%c0_133, %c896_134] : memref<96x1152xbf16, #tpu.memory_space<vmem>>, vector<96x128xbf16>
      tpu.vector_store %arg9[%c0_133, %c896_134], %178 {strides = array<i32>} : memref<96x1152xbf16, #tpu.memory_space<vmem>>, vector<96x128xbf16>,
      %c26_135 = arith.constant 26 : index
      %c0_136 = arith.constant 0 : index
      %180 = vector.load %arg7[%c26_135, %c0_136] : memref<128x128xf32, #tpu.memory_space<vmem>>, vector<96x128xf32>
      %181 = arith.truncf %180 : vector<96x128xf32> to vector<96x128xbf16>
      %c0_137 = arith.constant 0 : index
      %c1024_138 = arith.constant 1024 : index
      %182 = vector.load %arg9[%c0_137, %c1024_138] : memref<96x1152xbf16, #tpu.memory_space<vmem>>, vector<96x128xbf16>
      tpu.vector_store %arg9[%c0_137, %c1024_138], %181 {strides = array<i32>} : memref<96x1152xbf16, #tpu.memory_space<vmem>>, vector<96x128xbf16>,
      %c0_139 = arith.constant 0 : index
      %c0_140 = arith.constant 0 : index
      %183 = vector.load %arg9[%c0_139, %c0_140] : memref<96x1152xbf16, #tpu.memory_space<vmem>>, vector<96x1152xbf16>
      %184 = arith.index_cast %155 : i32 to index
      %c0_141 = arith.constant 0 : index
      %c0_142 = arith.constant 0 : index
      %185 = vector.load %arg4[%184, %c0_141, %c0_142] : memref<10x1152x128xbf16, #tpu.memory_space<vmem>>, vector<1x1152x128xbf16>
      %186 = vector.shape_cast %185 : vector<1x1152x128xbf16> to vector<1152x128xbf16>
      %cst_143 = arith.constant dense<0.000000e+00> : vector<96x128xf32>
      %187 = tpu.matmul %183, %186, %cst_143 {dimension_numbers = #tpu.dot_dimension_numbers<[1], [0], [0], [1], [0, 0, 1, 1], [], []>} : vector<96x1152xbf16>, vector<1152x128xbf16>, vector<96x128xf32> -> vector<96x128xf32>
      %188 = arith.index_cast %155 : i32 to index
      %c0_144 = arith.constant 0 : index
      %c0_145 = arith.constant 0 : index
      %189 = vector.load %arg5[%188, %c0_144, %c0_145] : memref<10x1x128xf32, #tpu.memory_space<vmem>>, vector<1x1x128xf32>
      %190 = vector.shape_cast %189 : vector<1x1x128xf32> to vector<1x128xf32>
      %191 = vector.broadcast %190 : vector<1x128xf32> to vector<96x128xf32>
      %192 = arith.addf %187, %191 : vector<96x128xf32>
      %cst_146 = arith.constant 0.000000e+00 : f32
      %193 = vector.broadcast %cst_146 : f32 to vector<96x128xf32>
      %194 = arith.maximumf %192, %193 : vector<96x128xf32>
      %195 = vector.extract_strided_slice %194 {offsets = [1, 0], sizes = [95, 128], strides = [1, 1]} : vector<96x128xf32> to vector<95x128xf32>
      %196 = vector.extract_strided_slice %194 {offsets = [0, 0], sizes = [1, 128], strides = [1, 1]} : vector<96x128xf32> to vector<1x128xf32>
      %197 = tpu.concatenate %195, %196 in 0 : vector<95x128xf32>, vector<1x128xf32> -> vector<96x128xf32>
      %198 = vector.extract_strided_slice %194 {offsets = [93, 0], sizes = [3, 128], strides = [1, 1]} : vector<96x128xf32> to vector<3x128xf32>
      %199 = vector.extract_strided_slice %194 {offsets = [0, 0], sizes = [93, 128], strides = [1, 1]} : vector<96x128xf32> to vector<93x128xf32>
      %200 = tpu.concatenate %198, %199 in 0 : vector<3x128xf32>, vector<93x128xf32> -> vector<96x128xf32>
      %201 = vector.extract_strided_slice %194 {offsets = [95, 0], sizes = [1, 128], strides = [1, 1]} : vector<96x128xf32> to vector<1x128xf32>
      %202 = vector.extract_strided_slice %194 {offsets = [0, 0], sizes = [95, 128], strides = [1, 1]} : vector<96x128xf32> to vector<95x128xf32>
      %203 = tpu.concatenate %201, %202 in 0 : vector<1x128xf32>, vector<95x128xf32> -> vector<96x128xf32>
      %204 = arith.select %133, %200, %203 : vector<96x128xi1>, vector<96x128xf32>
      %205 = arith.select %131, %197, %204 : vector<96x128xi1>, vector<96x128xf32>
      %c12_147 = arith.constant 12 : index
      %c0_148 = arith.constant 0 : index
      %206 = vector.load %arg7[%c12_147, %c0_148] : memref<128x128xf32, #tpu.memory_space<vmem>>, vector<96x128xf32>
      tpu.vector_store %arg7[%c12_147, %c0_148], %205 {strides = array<i32>} : memref<128x128xf32, #tpu.memory_space<vmem>>, vector<96x128xf32>,
      %207 = vector.extract_strided_slice %205 {offsets = [12, 0], sizes = [12, 128], strides = [1, 1]} : vector<96x128xf32> to vector<12x128xf32>
      %c0_149 = arith.constant 0 : index
      %c0_150 = arith.constant 0 : index
      %208 = vector.load %arg7[%c0_149, %c0_150] : memref<128x128xf32, #tpu.memory_space<vmem>>, vector<12x128xf32>
      tpu.vector_store %arg7[%c0_149, %c0_150], %207 {strides = array<i32>} : memref<128x128xf32, #tpu.memory_space<vmem>>, vector<12x128xf32>,
      %209 = vector.extract_strided_slice %205 {offsets = [72, 0], sizes = [12, 128], strides = [1, 1]} : vector<96x128xf32> to vector<12x128xf32>
      %c108_151 = arith.constant 108 : index
      %c0_152 = arith.constant 0 : index
      %210 = vector.load %arg7[%c108_151, %c0_152] : memref<128x128xf32, #tpu.memory_space<vmem>>, vector<12x128xf32>
      tpu.vector_store %arg7[%c108_151, %c0_152], %209 {strides = array<i32>} : memref<128x128xf32, #tpu.memory_space<vmem>>, vector<12x128xf32>,
      %c2_i32_153 = arith.constant 2 : i32
      %211 = arith.muli %c2_i32_153, %arg10 : i32
      %c1_i32_154 = arith.constant 1 : i32
      %212 = arith.addi %211, %c1_i32_154 : i32
      %c0_155 = arith.constant 0 : index
      %c0_156 = arith.constant 0 : index
      %213 = vector.load %arg7[%c0_155, %c0_156] : memref<128x128xf32, #tpu.memory_space<vmem>>, vector<96x128xf32>
      %214 = arith.truncf %213 : vector<96x128xf32> to vector<96x128xbf16>
      %c0_157 = arith.constant 0 : index
      %c0_158 = arith.constant 0 : index
      %215 = vector.load %arg9[%c0_157, %c0_158] : memref<96x1152xbf16, #tpu.memory_space<vmem>>, vector<96x128xbf16>
      tpu.vector_store %arg9[%c0_157, %c0_158], %214 {strides = array<i32>} : memref<96x1152xbf16, #tpu.memory_space<vmem>>, vector<96x128xbf16>,
      %c1_159 = arith.constant 1 : index
      %c0_160 = arith.constant 0 : index
      %216 = vector.load %arg7[%c1_159, %c0_160] : memref<128x128xf32, #tpu.memory_space<vmem>>, vector<96x128xf32>
      %217 = arith.truncf %216 : vector<96x128xf32> to vector<96x128xbf16>
      %c0_161 = arith.constant 0 : index
      %c128_162 = arith.constant 128 : index
      %218 = vector.load %arg9[%c0_161, %c128_162] : memref<96x1152xbf16, #tpu.memory_space<vmem>>, vector<96x128xbf16>
      tpu.vector_store %arg9[%c0_161, %c128_162], %217 {strides = array<i32>} : memref<96x1152xbf16, #tpu.memory_space<vmem>>, vector<96x128xbf16>,
      %c2_163 = arith.constant 2 : index
      %c0_164 = arith.constant 0 : index
      %219 = vector.load %arg7[%c2_163, %c0_164] : memref<128x128xf32, #tpu.memory_space<vmem>>, vector<96x128xf32>
      %220 = arith.truncf %219 : vector<96x128xf32> to vector<96x128xbf16>
      %c0_165 = arith.constant 0 : index
      %c256_166 = arith.constant 256 : index
      %221 = vector.load %arg9[%c0_165, %c256_166] : memref<96x1152xbf16, #tpu.memory_space<vmem>>, vector<96x128xbf16>
      tpu.vector_store %arg9[%c0_165, %c256_166], %220 {strides = array<i32>} : memref<96x1152xbf16, #tpu.memory_space<vmem>>, vector<96x128xbf16>,
      %c12_167 = arith.constant 12 : index
      %c0_168 = arith.constant 0 : index
      %222 = vector.load %arg7[%c12_167, %c0_168] : memref<128x128xf32, #tpu.memory_space<vmem>>, vector<96x128xf32>
      %223 = arith.truncf %222 : vector<96x128xf32> to vector<96x128xbf16>
      %c0_169 = arith.constant 0 : index
      %c384_170 = arith.constant 384 : index
      %224 = vector.load %arg9[%c0_169, %c384_170] : memref<96x1152xbf16, #tpu.memory_space<vmem>>, vector<96x128xbf16>
      tpu.vector_store %arg9[%c0_169, %c384_170], %223 {strides = array<i32>} : memref<96x1152xbf16, #tpu.memory_space<vmem>>, vector<96x128xbf16>,
      %c13_171 = arith.constant 13 : index
      %c0_172 = arith.constant 0 : index
      %225 = vector.load %arg7[%c13_171, %c0_172] : memref<128x128xf32, #tpu.memory_space<vmem>>, vector<96x128xf32>
      %226 = arith.truncf %225 : vector<96x128xf32> to vector<96x128xbf16>
      %c0_173 = arith.constant 0 : index
      %c512_174 = arith.constant 512 : index
      %227 = vector.load %arg9[%c0_173, %c512_174] : memref<96x1152xbf16, #tpu.memory_space<vmem>>, vector<96x128xbf16>
      tpu.vector_store %arg9[%c0_173, %c512_174], %226 {strides = array<i32>} : memref<96x1152xbf16, #tpu.memory_space<vmem>>, vector<96x128xbf16>,
      %c14_175 = arith.constant 14 : index
      %c0_176 = arith.constant 0 : index
      %228 = vector.load %arg7[%c14_175, %c0_176] : memref<128x128xf32, #tpu.memory_space<vmem>>, vector<96x128xf32>
      %229 = arith.truncf %228 : vector<96x128xf32> to vector<96x128xbf16>
      %c0_177 = arith.constant 0 : index
      %c640_178 = arith.constant 640 : index
      %230 = vector.load %arg9[%c0_177, %c640_178] : memref<96x1152xbf16, #tpu.memory_space<vmem>>, vector<96x128xbf16>
      tpu.vector_store %arg9[%c0_177, %c640_178], %229 {strides = array<i32>} : memref<96x1152xbf16, #tpu.memory_space<vmem>>, vector<96x128xbf16>,
      %c24_179 = arith.constant 24 : index
      %c0_180 = arith.constant 0 : index
      %231 = vector.load %arg7[%c24_179, %c0_180] : memref<128x128xf32, #tpu.memory_space<vmem>>, vector<96x128xf32>
      %232 = arith.truncf %231 : vector<96x128xf32> to vector<96x128xbf16>
      %c0_181 = arith.constant 0 : index
      %c768_182 = arith.constant 768 : index
      %233 = vector.load %arg9[%c0_181, %c768_182] : memref<96x1152xbf16, #tpu.memory_space<vmem>>, vector<96x128xbf16>
      tpu.vector_store %arg9[%c0_181, %c768_182], %232 {strides = array<i32>} : memref<96x1152xbf16, #tpu.memory_space<vmem>>, vector<96x128xbf16>,
      %c25_183 = arith.constant 25 : index
      %c0_184 = arith.constant 0 : index
      %234 = vector.load %arg7[%c25_183, %c0_184] : memref<128x128xf32, #tpu.memory_space<vmem>>, vector<96x128xf32>
      %235 = arith.truncf %234 : vector<96x128xf32> to vector<96x128xbf16>
      %c0_185 = arith.constant 0 : index
      %c896_186 = arith.constant 896 : index
      %236 = vector.load %arg9[%c0_185, %c896_186] : memref<96x1152xbf16, #tpu.memory_space<vmem>>, vector<96x128xbf16>
      tpu.vector_store %arg9[%c0_185, %c896_186], %235 {strides = array<i32>} : memref<96x1152xbf16, #tpu.memory_space<vmem>>, vector<96x128xbf16>,
      %c26_187 = arith.constant 26 : index
      %c0_188 = arith.constant 0 : index
      %237 = vector.load %arg7[%c26_187, %c0_188] : memref<128x128xf32, #tpu.memory_space<vmem>>, vector<96x128xf32>
      %238 = arith.truncf %237 : vector<96x128xf32> to vector<96x128xbf16>
      %c0_189 = arith.constant 0 : index
      %c1024_190 = arith.constant 1024 : index
      %239 = vector.load %arg9[%c0_189, %c1024_190] : memref<96x1152xbf16, #tpu.memory_space<vmem>>, vector<96x128xbf16>
      tpu.vector_store %arg9[%c0_189, %c1024_190], %238 {strides = array<i32>} : memref<96x1152xbf16, #tpu.memory_space<vmem>>, vector<96x128xbf16>,
      %c0_191 = arith.constant 0 : index
      %c0_192 = arith.constant 0 : index
      %240 = vector.load %arg9[%c0_191, %c0_192] : memref<96x1152xbf16, #tpu.memory_space<vmem>>, vector<96x1152xbf16>
      %241 = arith.index_cast %212 : i32 to index
      %c0_193 = arith.constant 0 : index
      %c0_194 = arith.constant 0 : index
      %242 = vector.load %arg4[%241, %c0_193, %c0_194] : memref<10x1152x128xbf16, #tpu.memory_space<vmem>>, vector<1x1152x128xbf16>
      %243 = vector.shape_cast %242 : vector<1x1152x128xbf16> to vector<1152x128xbf16>
      %cst_195 = arith.constant dense<0.000000e+00> : vector<96x128xf32>
      %244 = tpu.matmul %240, %243, %cst_195 {dimension_numbers = #tpu.dot_dimension_numbers<[1], [0], [0], [1], [0, 0, 1, 1], [], []>} : vector<96x1152xbf16>, vector<1152x128xbf16>, vector<96x128xf32> -> vector<96x128xf32>
      %245 = arith.index_cast %212 : i32 to index
      %c0_196 = arith.constant 0 : index
      %c0_197 = arith.constant 0 : index
      %246 = vector.load %arg5[%245, %c0_196, %c0_197] : memref<10x1x128xf32, #tpu.memory_space<vmem>>, vector<1x1x128xf32>
      %247 = vector.shape_cast %246 : vector<1x1x128xf32> to vector<1x128xf32>
      %248 = vector.broadcast %247 : vector<1x128xf32> to vector<96x128xf32>
      %249 = arith.addf %244, %248 : vector<96x128xf32>
      %cst_198 = arith.constant 1.000000e-01 : f32
      %250 = vector.broadcast %cst_198 : f32 to vector<96x128xf32>
      %251 = arith.mulf %249, %250 : vector<96x128xf32>
      %252 = arith.addf %251, %arg11 : vector<96x128xf32>
      scf.yield %252 : vector<96x128xf32>
    }
    %c5_i32_94 = arith.constant 5 : i32
    %c0_95 = arith.constant 0 : index
    %c0_96 = arith.constant 0 : index
    %c0_97 = arith.constant 0 : index
    %136 = vector.load %arg6[%c0_95, %c0_96, %c0_97] : memref<1x96x128xf32, #tpu.memory_space<vmem>>, vector<1x96x128xf32>
    %137 = vector.shape_cast %136 : vector<1x96x128xf32> to vector<96x128xf32>
    %138 = vector.shape_cast %135 : vector<96x128xf32> to vector<1x96x128xf32>
    tpu.vector_store %arg6[%c0_95, %c0_96, %c0_97], %138 {strides = array<i32>} : memref<1x96x128xf32, #tpu.memory_space<vmem>>, vector<1x96x128xf32>,
    return
  }
  func.func @transform_0(%arg0: i32) -> (i32, i32, i32) {
    %c0_i32 = arith.constant 0 : i32
    %c0_i32_0 = arith.constant 0 : i32
    %c0_i32_1 = arith.constant 0 : i32
    return %arg0, %c0_i32, %c0_i32_0 : i32, i32, i32
  }
  func.func @transform_1(%arg0: i32) -> (i32, i32) {
    %c0_i32 = arith.constant 0 : i32
    %c0_i32_0 = arith.constant 0 : i32
    %c0_i32_1 = arith.constant 0 : i32
    return %c0_i32, %c0_i32_0 : i32, i32
  }
  func.func @transform_2(%arg0: i32) -> (i32, i32) {
    %c0_i32 = arith.constant 0 : i32
    %c0_i32_0 = arith.constant 0 : i32
    %c0_i32_1 = arith.constant 0 : i32
    return %c0_i32, %c0_i32_0 : i32, i32
  }
  func.func @transform_3(%arg0: i32) -> (i32, i32, i32) {
    %c0_i32 = arith.constant 0 : i32
    %c0_i32_0 = arith.constant 0 : i32
    %c0_i32_1 = arith.constant 0 : i32
    %c0_i32_2 = arith.constant 0 : i32
    return %c0_i32, %c0_i32_0, %c0_i32_1 : i32, i32, i32
  }
  func.func @transform_4(%arg0: i32) -> (i32, i32, i32) {
    %c0_i32 = arith.constant 0 : i32
    %c0_i32_0 = arith.constant 0 : i32
    %c0_i32_1 = arith.constant 0 : i32
    %c0_i32_2 = arith.constant 0 : i32
    return %c0_i32, %c0_i32_0, %c0_i32_1 : i32, i32, i32
  }
  func.func @transform_5(%arg0: i32) -> (i32, i32, i32) {
    %c0_i32 = arith.constant 0 : i32
    %c0_i32_0 = arith.constant 0 : i32
    %c0_i32_1 = arith.constant 0 : i32
    return %arg0, %c0_i32, %c0_i32_0 : i32, i32, i32
  }
}

</mosaic_0001>

<bundles_post_ra>
// kernel: make_dense1.1
= control target key start
LH: loop header
LB: loop body
LE: loop exit
PB: predicated region body
PF: predicated region fallthrough
CT: control target
= control target key end

     0   :  { %s9246_s18 = smov 0   ;;  %s11975_s0 = inlined_call_operand.vmem [shape: f32[2,156,128], index: 0, kind: input, shape index: {}]   ;;  %s11976_s1 = inlined_call_operand.vmem [shape: bf16[3200,128], index: 1, kind: input, shape index: {}]   ;;  %s11977_s2 = inlined_call_operand.vmem [shape: f32[1,128], index: 2, kind: input, shape index: {}]   ;;  %s11978_s3 = inlined_call_operand.vmem [shape: bf16[10,1152,128], index: 3, kind: input, shape index: {}]   ;;  %s11979_s4 = inlined_call_operand.vmem [shape: f32[10,1,128], index: 4, kind: input, shape index: {}]   ;;  %s11980_s5 = inlined_call_operand.vmem [shape: f32[2,96,128], index: 5, kind: output, shape index: {}]  }
   0x1 LB: > { %s6930_s19 = sadd.s32 4294967295, %s9161_s18   ;;  %p6934_p0 = scmp.ge.s32.totalorder %s9161_s18, 1  ;;  %s9161_s18 = sphi %s9246_s18, %s15_s18  }
   0x2   : > { %p187_p1 = scmp.lt.s32.totalorder %s9161_s18, 3 }
   0x4   : > { %p188_p2 = pnand %p6934_p0, %p187_p1 }
   0x5   : > { %v8759_v0 = vld [vmem:[%s11976_s1 + $0x40] sm:$0xff] (!%p188_p2)   ;;  %v9215_v1 = vmov (!%p188_p2), 0.0   ;;  %p215_p3 = scmp.lt.s32.totalorder (!%p188_p2), %s6930_s19, 1  ;;  %v8763_v5 = vld [vmem:[%s11976_s1 + $0x48] sm:$0xff] (!%p188_p2)   ;;  %v8767_v9 = vld [vmem:[%s11976_s1 + $0x50] sm:$0xff] (!%p188_p2)  }
   0x6   : > { %191 = sbr.rel (%p188_p2) target bundleno = 1279 (0x4ff), region = 40  ;;  %226 = vst [vmem:[#allocation2 + $0x78] sm:$0xff] (!%p188_p2), %v9215_v1  ;;  %v8760_v2 = vld [vmem:[%s11976_s1 + $0xc0] sm:$0xff] (!%p188_p2)   ;;  %7438 = vmatprep.subr.bf16.mxu0 (!%p188_p2), %v8759_v0  ;;  %v8764_v6 = vld [vmem:[%s11976_s1 + $0xc8] sm:$0xff] (!%p188_p2)   ;;  %v8768_v10 = vld [vmem:[%s11976_s1 + $0xd0] sm:$0xff] (!%p188_p2)  }
   0x7   : > { %v8761_v3 = vld [vmem:[%s11976_s1] sm:$0xff] (!%p188_p2)   ;;  %7490 = vmatprep.subr.bf16.mxu1 (!%p188_p2), %v8760_v2  ;;  %v8765_v7 = vld [vmem:[%s11976_s1 + $0x8] sm:$0xff] (!%p188_p2)   ;;  %v8769_v11 = vld [vmem:[%s11976_s1 + $0x10] sm:$0xff] (!%p188_p2)  }
   0x8   : > { %v8762_v4 = vld [vmem:[%s11976_s1 + $0x80] sm:$0xff] (!%p188_p2)   ;;  %7439 = vmatpush3.bf16.msra.mxu0 (!%p188_p2), %v8761_v3  ;;  %v8766_v8 = vld [vmem:[%s11976_s1 + $0x88] sm:$0xff] (!%p188_p2)   ;;  %v8770_v12 = vld [vmem:[%s11976_s1 + $0x90] sm:$0xff] (!%p188_p2)  }
   0x9   : > { %7491 = vmatpush3.bf16.msra.mxu1 (!%p188_p2), %v8762_v4  ;;  %7440 = vmatprep.subr.bf16.mxu0 (!%p188_p2), %v8763_v5  ;;  %v8771_v13 = vld [vmem:[%s11976_s1 + $0x58] sm:$0xff] (!%p188_p2)   ;;  %v8775_v17 = vld [vmem:[%s11976_s1 + $0x60] sm:$0xff] (!%p188_p2)   ;;  %v8779_v21 = vld [vmem:[%s11976_s1 + $0x68] sm:$0xff] (!%p188_p2)  }
   0xa   : > { %7492 = vmatprep.subr.bf16.mxu1 (!%p188_p2), %v8764_v6  ;;  %v8772_v14 = vld [vmem:[%s11976_s1 + $0xd8] sm:$0xff] (!%p188_p2)   ;;  %v8776_v18 = vld [vmem:[%s11976_s1 + $0xe0] sm:$0xff] (!%p188_p2)   ;;  %v8780_v22 = vld [vmem:[%s11976_s1 + $0xe8] sm:$0xff] (!%p188_p2)  }
   0xb   : > { %v8773_v15 = vld [vmem:[%s11976_s1 + $0x18] sm:$0xff] (!%p188_p2)   ;;  %v8777_v19 = vld [vmem:[%s11976_s1 + $0x20] sm:$0xff] (!%p188_p2)   ;;  %v8781_v23 = vld [vmem:[%s11976_s1 + $0x28] sm:$0xff] (!%p188_p2)  }
   0xc   : > { %7441 = vmatpush3.bf16.msra.mxu0 (!%p188_p2), %v8765_v7  ;;  %v8774_v16 = vld [vmem:[%s11976_s1 + $0x98] sm:$0xff] (!%p188_p2)   ;;  %v8778_v20 = vld [vmem:[%s11976_s1 + $0xa0] sm:$0xff] (!%p188_p2)   ;;  %v8782_v24 = vld [vmem:[%s11976_s1 + $0xa8] sm:$0xff] (!%p188_p2)  }
   0xd   : > { %s12063_s19 = smov (!%p215_p3, %s6930_s19), 1  ;;  %7493 = vmatpush3.bf16.msra.mxu1 %v8766_v8  ;;  %7442 = vmatprep.subr.bf16.mxu0 %v8767_v9  ;;  %v8783_v25 = vld [vmem:[%s11976_s1 + $0x70] sm:$0xff]   ;;  %v8787_v29 = vld [vmem:[%s11976_s1 + $0x78] sm:$0xff]   ;;  %v8791_v45 = vld [vmem:[%s11976_s1 + $0x1c0] sm:$0xff]  }
   0xe   : > { %s8621_s9 = smul.u32 96, %s12063_s19  ;;  %7494 = vmatprep.subr.bf16.mxu1 %v8768_v10  ;;  %v8784_v26 = vld [vmem:[%s11976_s1 + $0xf0] sm:$0xff]   ;;  %v8788_v30 = vld [vmem:[%s11976_s1 + $0xf8] sm:$0xff]   ;;  %v8792_v46 = vld [vmem:[%s11976_s1 + $0x180] sm:$0xff]  }
   0xf   : > { %s8620_s6 = smul.u32 160, %s12063_s19  ;;  %v8785_v27 = vld [vmem:[%s11976_s1 + $0x30] sm:$0xff]   ;;  %v8789_v31 = vld [vmem:[%s11976_s1 + $0x38] sm:$0xff]   ;;  %v8793_v47 = vld [vmem:[%s11976_s1 + $0x1c8] sm:$0xff]  }
  0x10   : > { %s9287_s16 = scalar_lea.vmem %s11980_s5, %s8621_s9  ;;  %7443 = vmatpush3.bf16.msra.mxu0 %v8769_v11  ;;  %v8786_v28 = vld [vmem:[%s11976_s1 + $0xb0] sm:$0xff]   ;;  %v8790_v32 = vld [vmem:[%s11976_s1 + $0xb8] sm:$0xff]   ;;  %v8794_v54 = vld [vmem:[%s11976_s1 + $0x188] sm:$0xff]  }
  0x11   : > { %7495 = vmatpush3.bf16.msra.mxu1 %v8770_v12  ;;  %7444 = vmatprep.subr.bf16.mxu0 %v8771_v13  ;;  %s9356_s17 = scalar_lea.vmem %s11975_s0, %s8620_s6  ;;  %v8795_v61 = vld [vmem:[%s11976_s1 + $0x140] sm:$0xff]   ;;  %v8797_v63 = vld [vmem:[%s11976_s1 + $0x1d0] sm:$0xff]   ;;  %v8799_v1 = vld [vmem:[%s11976_s1 + $0x148] sm:$0xff]  }
  0x12   : > { %7496 = vmatprep.subr.bf16.mxu1 %v8772_v14  ;;  %v251_v33 = vld [vmem:[%s9356_s17 + $0x1] sm:$0xff]  ;;  %v252_v34 = vld [vmem:[%s9356_s17 + $0x9] sm:$0xff]  ;;  %v253_v48 = vld [vmem:[%s9356_s17 + $0x11] sm:$0xff] }
  0x13   : > { %v299_v35 = vld [vmem:[%s9356_s17 + $0x3] sm:$0xff]  ;;  %v263_v36 = vpack.c.bf16 %v252_v34, %v251_v33  ;;  %v300_v37 = vld [vmem:[%s9356_s17 + $0xb] sm:$0xff]  ;;  %v9383_v49 = vld [vmem:[%s9356_s17 + $0x19] sm:$0xff] }
  0x14   : > { %7445 = vmatpush3.bf16.msra.mxu0 %v8773_v15  ;;  %v227_v38 = vld [vmem:[%s9356_s17] sm:$0xff]  ;;  %v228_v39 = vld [vmem:[%s9356_s17 + $0x8] sm:$0xff]  ;;  %v311_v40 = vpack.c.bf16 %v300_v37, %v299_v35  ;;  %v301_v50 = vld [vmem:[%s9356_s17 + $0x13] sm:$0xff]  ;;  %v264_v52 = vpack.c.bf16 %v9383_v49, %v253_v48 }
  0x15   : > { %7497 = vmatpush3.bf16.msra.mxu1 %v8774_v16  ;;  %7446 = vmatprep.subr.bf16.mxu0 %v8775_v17  ;;  %v239_v41 = vpack.c.bf16 %v228_v39, %v227_v38  ;;  %v275_v42 = vld [vmem:[%s9356_s17 + $0x2] sm:$0xff]  ;;  %v276_v43 = vld [vmem:[%s9356_s17 + $0xa] sm:$0xff]  ;;  %v9393_v56 = vld [vmem:[%s9356_s17 + $0x18] sm:$0xff] }
  0x16   : > { %7498 = vmatprep.subr.bf16.mxu1 %v8776_v18  ;;  %2628 = vmatprep.mubr.bf16.mxu0 %v263_v36  ;;  %v287_v44 = vpack.c.bf16 %v276_v43, %v275_v42  ;;  %v302_v51 = vld [vmem:[%s9356_s17 + $0x1b] sm:$0xff]  ;;  %v229_v55 = vld [vmem:[%s9356_s17 + $0x10] sm:$0xff]  ;;  %v303_v5 = vld [vmem:[%s9356_s17 + $0x23] sm:$0xff] }
  0x17   : > { %2709 = vmatprep.mubr.bf16.mxu1 %v311_v40  ;;  %v312_v53 = vpack.c.bf16 %v302_v51, %v301_v50  ;;  %v277_v57 = vld [vmem:[%s9356_s17 + $0x12] sm:$0xff]  ;;  %v9397_v58 = vpack.c.bf16 %v9393_v56, %v229_v55  ;;  %v278_v59 = vld [vmem:[%s9356_s17 + $0x1a] sm:$0xff]  ;;  %v9420_v3 = vld [vmem:[%s9356_s17 + $0x29] sm:$0xff] }
  0x18   : > { %7447 = vmatpush3.bf16.msra.mxu0 %v8777_v19  ;;  %v288_v60 = vpack.c.bf16 %v278_v59, %v277_v57  ;;  %v8796_v62 = vld [vmem:[%s11976_s1 + $0x100] sm:$0xff]   ;;  %v8798_v0 = vld [vmem:[%s11976_s1 + $0x190] sm:$0xff]   ;;  %v8800_v9 = vld [vmem:[%s11976_s1 + $0x108] sm:$0xff]  }
  0x19   : > { %7499 = vmatpush3.bf16.msra.mxu1 %v8778_v20  ;;  %7448 = vmatprep.subr.bf16.mxu0 %v8779_v21  ;;  %v9417_v2 = vld [vmem:[%s9356_s17 + $0x21] sm:$0xff]  ;;  %v304_v6 = vld [vmem:[%s9356_s17 + $0x2b] sm:$0xff]  ;;  %v8801_v17 = vld [vmem:[%s11976_s1 + $0x1d8] sm:$0xff]  }
  0x1a   : > { %7500 = vmatprep.subr.bf16.mxu1 %v8780_v22  ;;  %v265_v4 = vpack.c.bf16 %v9420_v3, %v9417_v2  ;;  %v503_v7 = vpack.c.bf16 %v9417_v2, %v9383_v49  ;;  %v313_v8 = vpack.c.bf16 %v304_v6, %v303_v5  ;;  %v9432_v10 = vld [vmem:[%s9356_s17 + $0x20] sm:$0xff]  ;;  %v9435_v11 = vld [vmem:[%s9356_s17 + $0x28] sm:$0xff]  ;;  %v8802_v18 = vld [vmem:[%s11976_s1 + $0x198] sm:$0xff]  }
  0x1b   : > { %v279_v12 = vld [vmem:[%s9356_s17 + $0x22] sm:$0xff]  ;;  %v280_v13 = vld [vmem:[%s9356_s17 + $0x2a] sm:$0xff]  ;;  %v479_v14 = vpack.c.bf16 %v9432_v10, %v9393_v56  ;;  %v9443_v15 = vpack.c.bf16 %v9435_v11, %v9432_v10  ;;  %v9462_v22 = vld [vmem:[%s9356_s17 + $0x39] sm:$0xff] }
  0x1c   : > { %7449 = vmatpush3.bf16.msra.mxu0 %v8781_v23  ;;  %v289_v16 = vpack.c.bf16 %v280_v13, %v279_v12  ;;  %v8803_v19 = vld [vmem:[%s11976_s1 + $0x150] sm:$0xff]   ;;  %v8805_v35 = vld [vmem:[%s11976_s1 + $0x1e0] sm:$0xff]   ;;  %v8807_v37 = vld [vmem:[%s11976_s1 + $0x158] sm:$0xff]  }
  0x1d   : > { %7501 = vmatpush3.bf16.msra.mxu1 %v8782_v24  ;;  %7450 = vmatprep.subr.bf16.mxu0 %v8783_v25  ;;  %v8804_v20 = vld [vmem:[%s11976_s1 + $0x110] sm:$0xff]   ;;  %v306_v25 = vld [vmem:[%s9356_s17 + $0x3b] sm:$0xff]  ;;  %v8809_v39 = vld [vmem:[%s11976_s1 + $0x1e8] sm:$0xff]  }
  0x1e   : > { %7502 = vmatprep.subr.bf16.mxu1 %v8784_v26  ;;  %v9459_v21 = vld [vmem:[%s9356_s17 + $0x31] sm:$0xff]  ;;  %v8806_v36 = vld [vmem:[%s11976_s1 + $0x1a0] sm:$0xff]   ;;  %v9519_v50 = vld [vmem:[%s9356_s17 + $0x48] sm:$0xff] }
  0x1f   : > { %v305_v23 = vld [vmem:[%s9356_s17 + $0x33] sm:$0xff]  ;;  %v266_v24 = vpack.c.bf16 %v9462_v22, %v9459_v21  ;;  %v9501_v40 = vld [vmem:[%s9356_s17 + $0x41] sm:$0xff]  ;;  %v308_v43 = vld [vmem:[%s9356_s17 + $0x4b] sm:$0xff] }
  0x20   : > { %7451 = vmatpush3.bf16.msra.mxu0 %v8785_v27  ;;  %v9469_v26 = vld [vmem:[%s9356_s17 + $0x30] sm:$0xff]  ;;  %v9472_v27 = vld [vmem:[%s9356_s17 + $0x38] sm:$0xff]  ;;  %v307_v42 = vld [vmem:[%s9356_s17 + $0x43] sm:$0xff] }
  0x21   : > { %7503 = vmatpush3.bf16.msra.mxu1 %v8786_v28  ;;  %7452 = vmatprep.subr.bf16.mxu0 %v8787_v29  ;;  %v504_v28 = vpack.c.bf16 %v9459_v21, %v9420_v3  ;;  %v314_v29 = vpack.c.bf16 %v306_v25, %v305_v23  ;;  %v480_v33 = vpack.c.bf16 %v9469_v26, %v9435_v11  ;;  %v8808_v38 = vld [vmem:[%s11976_s1 + $0x118] sm:$0xff]   ;;  %v9516_v48 = vld [vmem:[%s9356_s17 + $0x40] sm:$0xff]  ;;  %v8817_v23 = vld [vmem:[%s11976_s1 + $0x170] sm:$0xff]  }
  0x22   : > { %7504 = vmatprep.subr.bf16.mxu1 %v8788_v30  ;;  %v9478_v30 = vpack.c.bf16 %v9472_v27, %v9469_v26  ;;  %v283_v51 = vld [vmem:[%s9356_s17 + $0x42] sm:$0xff]  ;;  %v309_v5 = vld [vmem:[%s9356_s17 + $0x53] sm:$0xff] }
  0x23   : > { %v8811_v57 = vld [vmem:[%s11976_s1 + $0x160] sm:$0xff]   ;;  %v9564_v13 = vld [vmem:[%s9356_s17 + $0x58] sm:$0xff]  ;;  %v8858_v2 = vld [vmem:[%s11976_s1 + $0x388] sm:$0xff]  }
  0x24   : > { %7453 = vmatpush3.bf16.msra.mxu0 %v8789_v31  ;;  %v281_v31 = vld [vmem:[%s9356_s17 + $0x32] sm:$0xff]  ;;  %v8812_v59 = vld [vmem:[%s11976_s1 + $0x120] sm:$0xff]   ;;  %v8864_v56 = vld [vmem:[%s11976_s1 + $0x308] sm:$0xff]  }
  0x25   : > { %7505 = vmatpush3.bf16.msra.mxu1 %v8790_v32  ;;  %7542 = vmatprep.subr.bf16.mxu0 %v8795_v61  ;;  %v282_v32 = vld [vmem:[%s9356_s17 + $0x3a] sm:$0xff]  ;;  %v8814_v61 = vld [vmem:[%s11976_s1 + $0x1f0] sm:$0xff]  }
  0x26   : > { %7594 = vmatprep.subr.bf16.mxu1 %v8791_v45  ;;  %v290_v34 = vpack.c.bf16 %v282_v32, %v281_v31  ;;  %v310_v6 = vld [vmem:[%s9356_s17 + $0x5b] sm:$0xff]  ;;  %v9801_v10 = vld [vmem:[%s9356_s17 + $0x2f] sm:$0xff] }
  0x27   : > { %2629 = vmatmul.mubr.bf16.vlgmr.msra.gmra.mrb[0].mxu0 %v239_v41  ;;  %v9504_v41 = vld [vmem:[%s9356_s17 + $0x49] sm:$0xff]  ;;  %v316_v12 = vpack.c.bf16 %v310_v6, %v309_v5  ;;  %v8819_v25 = vld [vmem:[%s11976_s1 + $0x1f8] sm:$0xff]   ;;  %v8860_v49 = vld [vmem:[%s11976_s1 + $0x300] sm:$0xff]  }
  0x28   : > { %2710 = vmatmul.mubr.bf16.vlgmr.msra.gmra.mrb[0].mxu1 %v287_v44  ;;  %2636 = vmatprep.mubr.bf16.mxu0 %v264_v52  ;;  %v505_v44 = vpack.c.bf16 %v9501_v40, %v9462_v22  ;;  %v267_v45 = vpack.c.bf16 %v9504_v41, %v9501_v40  ;;  %v9524_v52 = vpack.c.bf16 %v9519_v50, %v9516_v48  ;;  %v8821_v31 = vld [vmem:[%s11976_s1 + $0x178] sm:$0xff]   ;;  %v8869_v11 = vld [vmem:[%s11976_s1 + $0x3e0] sm:$0xff]  }
  0x29   : > { %7595 = vmatpush3.bf16.msra.mxu1 %v8792_v46  ;;  %2717 = vmatprep.mubr.bf16.mxu1 %v312_v53  ;;  %v315_v46 = vpack.c.bf16 %v308_v43, %v307_v42  ;;  %v284_v53 = vld [vmem:[%s9356_s17 + $0x4a] sm:$0xff]  ;;  %v8822_v32 = vld [vmem:[%s11976_s1 + $0x138] sm:$0xff]   ;;  %v8870_v22 = vld [vmem:[%s11976_s1 + $0x3a0] sm:$0xff]  }
  0x2a   : > { %7596 = vmatprep.subr.bf16.mxu1 %v8793_v47  ;;  %7543 = vmatpush3.bf16.msra.mxu0 %v8796_v62  ;;  %v8810_v47 = vld [vmem:[%s11976_s1 + $0x1a8] sm:$0xff]   ;;  %v291_v55 = vpack.c.bf16 %v284_v53, %v283_v51  ;;  %v8823_v51 = vld [vmem:[%s11976_s1 + $0x2c0] sm:$0xff]   ;;  %v8865_v21 = vld [vmem:[%s11976_s1 + $0x3d8] sm:$0xff]  }
  0x2b   : > { %7544 = vmatprep.subr.bf16.mxu0 %v8799_v1  ;;  %v8815_v62 = vld [vmem:[%s11976_s1 + $0x128] sm:$0xff]   ;;  %v9552_v1 = vld [vmem:[%s9356_s17 + $0x59] sm:$0xff] }
  0x2c   : > { %v371_v42 = vld [vmem:[%s9356_s17 + $0xd] sm:$0xff]  ;;  %v8824_v53 = vld [vmem:[%s11976_s1 + $0x280] sm:$0xff]   ;;  %v8871_v26 = vld [vmem:[%s11976_s1 + $0x358] sm:$0xff]  }
  0x2d   : > { %7597 = vmatpush3.bf16.msra.mxu1 %v8794_v54  ;;  %v481_v54 = vpack.c.bf16 %v9516_v48, %v9472_v27  ;;  %v373_v5 = vld [vmem:[%s9356_s17 + $0x1d] sm:$0xff]  ;;  %v8877_v27 = vld [vmem:[%s11976_s1 + $0x368] sm:$0xff]  }
  0x2e   : > { %7598 = vmatprep.subr.bf16.mxu1 %v8797_v63  ;;  %7545 = vmatpush3.bf16.msra.mxu0 %v8800_v9  ;;  %v8816_v63 = vld [vmem:[%s11976_s1 + $0x1b0] sm:$0xff]   ;;  %v8872_v40 = vld [vmem:[%s11976_s1 + $0x318] sm:$0xff]  }
  0x2f   : > { %2637 = vmatmul.mubr.bf16.gmra.mrb[4].mxu0 %v9397_v58  ;;  %7546 = vmatprep.subr.bf16.mxu0 %v8803_v19 }
  0x30   : > { %2718 = vmatmul.mubr.bf16.gmra.mrb[4].mxu1 %v288_v60  ;;  %2644 = vmatprep.mubr.bf16.mxu0 %v265_v4  ;;  %v8813_v60 = vld [vmem:[%s11976_s1 + $0x168] sm:$0xff]  }
  0x31   : > { %7599 = vmatpush3.bf16.msra.mxu1 %v8798_v0  ;;  %2725 = vmatprep.mubr.bf16.mxu1 %v313_v8  ;;  %v9549_v0 = vld [vmem:[%s9356_s17 + $0x51] sm:$0xff] }
  0x32   : > { %7600 = vmatprep.subr.bf16.mxu1 %v8801_v17  ;;  %7547 = vmatpush3.bf16.msra.mxu0 %v8804_v20  ;;  %v268_v4 = vpack.c.bf16 %v9552_v1, %v9549_v0  ;;  %v9559_v8 = vld [vmem:[%s9356_s17 + $0x50] sm:$0xff]  ;;  %v506_v9 = vpack.c.bf16 %v9549_v0, %v9504_v41  ;;  %v286_v17 = vld [vmem:[%s9356_s17 + $0x5a] sm:$0xff] }
  0x33   : > { %7548 = vmatprep.subr.bf16.mxu0 %v8807_v37  ;;  %v9572_v19 = vpack.c.bf16 %v9564_v13, %v9559_v8  ;;  %v8878_v41 = vld [vmem:[%s11976_s1 + $0x3f0] sm:$0xff]  }
  0x34   : > { %v9891_v0 = vld [vmem:[%s9356_s17 + $0x57] sm:$0xff] }
  0x35   : > { %7601 = vmatpush3.bf16.msra.mxu1 %v8802_v18  ;;  %v482_v18 = vpack.c.bf16 %v9559_v8, %v9519_v50  ;;  %v8883_v50 = vld [vmem:[%s11976_s1 + $0x3f8] sm:$0xff]  }
  0x36   : > { %7602 = vmatprep.subr.bf16.mxu1 %v8805_v35  ;;  %7549 = vmatpush3.bf16.msra.mxu0 %v8808_v38  ;;  %v348_v35 = vld [vmem:[%s9356_s17 + $0x14] sm:$0xff] }
  0x37   : > { %2645 = vmatmul.mubr.bf16.gmra.mrb[8].mxu0 %v9443_v15  ;;  %7550 = vmatprep.subr.bf16.mxu0 %v8811_v57  ;;  %v396_v38 = vld [vmem:[%s9356_s17 + $0x16] sm:$0xff] }
  0x38   : > { %2726 = vmatmul.mubr.bf16.gmra.mrb[8].mxu1 %v289_v16  ;;  %2652 = vmatprep.mubr.bf16.mxu0 %v266_v24  ;;  %v285_v16 = vld [vmem:[%s9356_s17 + $0x52] sm:$0xff]  ;;  %v349_v57 = vld [vmem:[%s9356_s17 + $0x1c] sm:$0xff] }
  0x39   : > { %2733 = vmatprep.mubr.bf16.mxu1 %v314_v29  ;;  %7603 = vmatpush3.bf16.msra.mxu1 %v8806_v36  ;;  %v292_v20 = vpack.c.bf16 %v286_v17, %v285_v16  ;;  %v8818_v24 = vld [vmem:[%s11976_s1 + $0x130] sm:$0xff]   ;;  %v8820_v29 = vld [vmem:[%s11976_s1 + $0x1b8] sm:$0xff]   ;;  %v336_v6 = vpack.c.bf16 %v349_v57, %v348_v35  ;;  %v8827_v17 = vld [vmem:[%s11976_s1 + $0x240] sm:$0xff]  }
  0x3a   : > { %7604 = vmatprep.subr.bf16.mxu1 %v8809_v39  ;;  %7551 = vmatpush3.bf16.msra.mxu0 %v8812_v59  ;;  %v395_v36 = vld [vmem:[%s9356_s17 + $0xe] sm:$0xff]  ;;  %v323_v39 = vld [vmem:[%s9356_s17 + $0x4] sm:$0xff] }
  0x3b   : > { %7552 = vmatprep.subr.bf16.mxu0 %v8813_v60  ;;  %v407_v43 = vpack.c.bf16 %v396_v38, %v395_v36  ;;  %v350_v59 = vld [vmem:[%s9356_s17 + $0x24] sm:$0xff]  ;;  %v375_v38 = vld [vmem:[%s9356_s17 + $0x2d] sm:$0xff] }
  0x3c   : > { %v9611_v60 = vpack.c.bf16 %v350_v59, %v349_v57 }
  0x3d   : > { %7605 = vmatpush3.bf16.msra.mxu1 %v8810_v47 }
  0x3e   : > { %7606 = vmatprep.subr.bf16.mxu1 %v8814_v61  ;;  %7553 = vmatpush3.bf16.msra.mxu0 %v8815_v62  ;;  %v397_v61 = vld [vmem:[%s9356_s17 + $0x1e] sm:$0xff]  ;;  %v398_v62 = vld [vmem:[%s9356_s17 + $0x26] sm:$0xff] }
  0x3f   : > { %2653 = vmatmul.mubr.bf16.gmra.mrb[12].mxu0 %v9478_v30  ;;  %7554 = vmatprep.subr.bf16.mxu0 %v8817_v23  ;;  %v8829_v23 = vld [vmem:[%s11976_s1 + $0x2d0] sm:$0xff]  }
  0x40   : > { %2734 = vmatmul.mubr.bf16.gmra.mrb[12].mxu1 %v290_v34  ;;  %2660 = vmatprep.mubr.bf16.mxu0 %v267_v45  ;;  %v347_v34 = vld [vmem:[%s9356_s17 + $0xc] sm:$0xff] }
  0x41   : > { %2741 = vmatprep.mubr.bf16.mxu1 %v315_v46  ;;  %7607 = vmatpush3.bf16.msra.mxu1 %v8816_v63  ;;  %v359_v37 = vpack.c.bf16 %v348_v35, %v347_v34  ;;  %v335_v45 = vpack.c.bf16 %v347_v34, %v323_v39  ;;  %v372_v46 = vld [vmem:[%s9356_s17 + $0x15] sm:$0xff]  ;;  %v408_v63 = vpack.c.bf16 %v398_v62, %v397_v61  ;;  %v402_v61 = vld [vmem:[%s9356_s17 + $0x46] sm:$0xff]  ;;  %v377_v62 = vld [vmem:[%s9356_s17 + $0x3d] sm:$0xff] }
  0x42   : > { %7555 = vmatpush3.bf16.msra.mxu0 %v8818_v24  ;;  %7608 = vmatprep.subr.bf16.mxu1 %v8819_v25  ;;  %v383_v47 = vpack.c.bf16 %v372_v46, %v371_v42  ;;  %v8830_v24 = vld [vmem:[%s11976_s1 + $0x290] sm:$0xff]   ;;  %v8831_v25 = vld [vmem:[%s11976_s1 + $0x248] sm:$0xff]   ;;  %v8834_v46 = vld [vmem:[%s11976_s1 + $0x298] sm:$0xff]  }
  0x43   : > { %7556 = vmatprep.subr.bf16.mxu0 %v8821_v31  ;;  %v352_v31 = vld [vmem:[%s9356_s17 + $0x34] sm:$0xff] }
  0x44   : > { %v399_v34 = vld [vmem:[%s9356_s17 + $0x2e] sm:$0xff]  ;;  %v400_v35 = vld [vmem:[%s9356_s17 + $0x36] sm:$0xff] }
  0x45   : > { %7609 = vmatpush3.bf16.msra.mxu1 %v8820_v29  ;;  %v351_v29 = vld [vmem:[%s9356_s17 + $0x2c] sm:$0xff]  ;;  %v409_v36 = vpack.c.bf16 %v400_v35, %v399_v34  ;;  %v376_v42 = vld [vmem:[%s9356_s17 + $0x35] sm:$0xff] }
  0x46   : > { %7557 = vmatpush3.bf16.msra.mxu0 %v8822_v32  ;;  %7698 = vmatprep.subr.bf16.mxu1 %v8823_v51  ;;  %v9638_v32 = vpack.c.bf16 %v352_v31, %v351_v29  ;;  %v9647_v39 = vpack.c.bf16 %v351_v29, %v350_v59  ;;  %v8836_v51 = vld [vmem:[%s11976_s1 + $0x210] sm:$0xff]   ;;  %v401_v59 = vld [vmem:[%s9356_s17 + $0x3e] sm:$0xff] }
  0x47   : > { %2661 = vmatmul.mubr.bf16.gmra.mrb[16].mxu0 %v9524_v52  ;;  %7646 = vmatprep.subr.bf16.mxu0 %v8827_v17  ;;  %v8839_v17 = vld [vmem:[%s11976_s1 + $0x258] sm:$0xff]  }
  0x48   : > { %2742 = vmatmul.mubr.bf16.gmra.mrb[16].mxu1 %v291_v55  ;;  %2668 = vmatprep.mubr.bf16.mxu0 %v268_v4  ;;  %v8825_v55 = vld [vmem:[%s11976_s1 + $0x2c8] sm:$0xff]   ;;  %v404_v34 = vld [vmem:[%s9356_s17 + $0x56] sm:$0xff] }
  0x49   : > { %2749 = vmatprep.mubr.bf16.mxu1 %v316_v12  ;;  %v8826_v4 = vld [vmem:[%s11976_s1 + $0x288] sm:$0xff]  }
  0x4a   : > { %v374_v12 = vld [vmem:[%s9356_s17 + $0x25] sm:$0xff] }
  0x4b   : > { %v384_v16 = vpack.c.bf16 %v374_v12, %v373_v5  ;;  %v8837_v5 = vld [vmem:[%s11976_s1 + $0x2e0] sm:$0xff]  }
  0x4c   : > { %v8838_v12 = vld [vmem:[%s11976_s1 + $0x2a0] sm:$0xff]  }
  0x4f   : > { %2669 = vmatmul.mubr.bf16.gmra.mrb[20].mxu0 %v9572_v19 }
  0x50   : > { %2750 = vmatmul.mubr.bf16.gmra.mrb[20].mxu1 %v292_v20  ;;  %2790 = vmatprep.mubr.bf16.mxu0 %v359_v37  ;;  %v8828_v20 = vld [vmem:[%s11976_s1 + $0x200] sm:$0xff]   ;;  %v8832_v37 = vld [vmem:[%s11976_s1 + $0x208] sm:$0xff]  }
  0x51   : > { %2871 = vmatprep.mubr.bf16.mxu1 %v407_v43  ;;  %v385_v43 = vpack.c.bf16 %v376_v42, %v375_v38  ;;  %v380_v38 = vld [vmem:[%s9356_s17 + $0x55] sm:$0xff]  ;;  %v8843_v42 = vld [vmem:[%s11976_s1 + $0x260] sm:$0xff]  }
  0x57   : > { %2791 = vmatmul.mubr.bf16.vlgmr.msra.gmra.mrb[24].mxu0 %v335_v45  ;;  %v8833_v45 = vld [vmem:[%s11976_s1 + $0x2d8] sm:$0xff]  }
  0x58   : > { %2872 = vmatmul.mubr.bf16.vlgmr.msra.gmra.mrb[24].mxu1 %v383_v47  ;;  %2798 = vmatprep.mubr.bf16.mxu0 %v9611_v60  ;;  %v8835_v47 = vld [vmem:[%s11976_s1 + $0x250] sm:$0xff]  }
  0x59   : > { %7699 = vmatpush3.bf16.msra.mxu1 %v8824_v53  ;;  %2879 = vmatprep.mubr.bf16.mxu1 %v408_v63  ;;  %v353_v53 = vld [vmem:[%s9356_s17 + $0x3c] sm:$0xff]  ;;  %v410_v63 = vpack.c.bf16 %v402_v61, %v401_v59  ;;  %v9725_v61 = vld [vmem:[%s9356_s17 + $0x64] sm:$0xff] }
  0x5a   : > { %7700 = vmatprep.subr.bf16.mxu1 %v8825_v55  ;;  %7647 = vmatpush3.bf16.msra.mxu0 %v8828_v20  ;;  %v354_v55 = vld [vmem:[%s9356_s17 + $0x44] sm:$0xff]  ;;  %v8840_v20 = vld [vmem:[%s11976_s1 + $0x218] sm:$0xff]  }
  0x5b   : > { %7648 = vmatprep.subr.bf16.mxu0 %v8831_v25  ;;  %v9665_v57 = vpack.c.bf16 %v354_v55, %v353_v53  ;;  %v356_v25 = vld [vmem:[%s9356_s17 + $0x54] sm:$0xff]  ;;  %v357_v59 = vld [vmem:[%s9356_s17 + $0x5c] sm:$0xff] }
  0x5d   : > { %7701 = vmatpush3.bf16.msra.mxu1 %v8826_v4  ;;  %v378_v4 = vld [vmem:[%s9356_s17 + $0x45] sm:$0xff] }
  0x5e   : > { %7702 = vmatprep.subr.bf16.mxu1 %v8829_v23  ;;  %7649 = vmatpush3.bf16.msra.mxu0 %v8832_v37  ;;  %v8841_v23 = vld [vmem:[%s11976_s1 + $0x2e8] sm:$0xff]  }
  0x5f   : > { %2799 = vmatmul.mubr.bf16.gmra.mrb[28].mxu0 %v336_v6  ;;  %7650 = vmatprep.subr.bf16.mxu0 %v8835_v47  ;;  %v9675_v6 = vpack.c.bf16 %v353_v53, %v352_v31  ;;  %v403_v31 = vld [vmem:[%s9356_s17 + $0x4e] sm:$0xff] }
  0x60   : > { %2880 = vmatmul.mubr.bf16.gmra.mrb[28].mxu1 %v384_v16  ;;  %2806 = vmatprep.mubr.bf16.mxu0 %v9638_v32  ;;  %v386_v16 = vpack.c.bf16 %v378_v4, %v377_v62  ;;  %v411_v35 = vpack.c.bf16 %v404_v34, %v403_v31  ;;  %v379_v37 = vld [vmem:[%s9356_s17 + $0x4d] sm:$0xff]  ;;  %v9728_v62 = vpack.c.bf16 %v9725_v61, %v357_v59  ;;  %v8851_v31 = vld [vmem:[%s11976_s1 + $0x2f8] sm:$0xff]  }
  0x61   : > { %7703 = vmatpush3.bf16.msra.mxu1 %v8830_v24  ;;  %2887 = vmatprep.mubr.bf16.mxu1 %v409_v36  ;;  %v355_v24 = vld [vmem:[%s9356_s17 + $0x4c] sm:$0xff]  ;;  %v8852_v34 = vld [vmem:[%s11976_s1 + $0x2b8] sm:$0xff]  }
  0x62   : > { %7704 = vmatprep.subr.bf16.mxu1 %v8833_v45  ;;  %7651 = vmatpush3.bf16.msra.mxu0 %v8836_v51  ;;  %v9692_v29 = vpack.c.bf16 %v356_v25, %v355_v24  ;;  %v8842_v36 = vld [vmem:[%s11976_s1 + $0x2a8] sm:$0xff]   ;;  %v8844_v45 = vld [vmem:[%s11976_s1 + $0x220] sm:$0xff]   ;;  %v8846_v51 = vld [vmem:[%s11976_s1 + $0x2f0] sm:$0xff]  }
  0x63   : > { %7652 = vmatprep.subr.bf16.mxu0 %v8839_v17  ;;  %v8845_v47 = vld [vmem:[%s11976_s1 + $0x268] sm:$0xff]   ;;  %v8849_v17 = vld [vmem:[%s11976_s1 + $0x270] sm:$0xff]  }
  0x64   : > { %v8847_v53 = vld [vmem:[%s11976_s1 + $0x228] sm:$0xff]  }
  0x65   : > { %7705 = vmatpush3.bf16.msra.mxu1 %v8834_v46  ;;  %v387_v46 = vpack.c.bf16 %v380_v38, %v379_v37  ;;  %v406_v4 = vld [vmem:[%s9356_s17 + $0x66] sm:$0xff]  ;;  %v420_v37 = vld [vmem:[%s9356_s17 + $0x17] sm:$0xff] }
  0x66   : > { %7706 = vmatprep.subr.bf16.mxu1 %v8837_v5  ;;  %7653 = vmatpush3.bf16.msra.mxu0 %v8840_v20  ;;  %v381_v5 = vld [vmem:[%s9356_s17 + $0x5d] sm:$0xff]  ;;  %v9738_v20 = vpack.c.bf16 %v357_v59, %v356_v25  ;;  %v8868_v59 = vld [vmem:[%s11976_s1 + $0x310] sm:$0xff]  }
  0x67   : > { %2807 = vmatmul.mubr.bf16.gmra.mrb[32].mxu0 %v9647_v39  ;;  %7654 = vmatprep.subr.bf16.mxu0 %v8843_v42  ;;  %v8853_v25 = vld [vmem:[%s11976_s1 + $0x278] sm:$0xff]   ;;  %v8855_v38 = vld [vmem:[%s11976_s1 + $0x3c0] sm:$0xff]  }
  0x68   : > { %2888 = vmatmul.mubr.bf16.gmra.mrb[32].mxu1 %v385_v43  ;;  %2814 = vmatprep.mubr.bf16.mxu0 %v9665_v57  ;;  %v9705_v43 = vpack.c.bf16 %v355_v24, %v354_v55  ;;  %v8848_v55 = vld [vmem:[%s11976_s1 + $0x2b0] sm:$0xff]  }
  0x69   : > { %2895 = vmatprep.mubr.bf16.mxu1 %v410_v63  ;;  %7707 = vmatpush3.bf16.msra.mxu1 %v8838_v12  ;;  %v405_v63 = vld [vmem:[%s9356_s17 + $0x5e] sm:$0xff] }
  0x6a   : > { %7708 = vmatprep.subr.bf16.mxu1 %v8841_v23  ;;  %7655 = vmatpush3.bf16.msra.mxu0 %v8844_v45  ;;  %v412_v12 = vpack.c.bf16 %v406_v4, %v405_v63  ;;  %v8850_v23 = vld [vmem:[%s11976_s1 + $0x230] sm:$0xff]   ;;  %v8856_v45 = vld [vmem:[%s11976_s1 + $0x380] sm:$0xff]   ;;  %v8866_v4 = vld [vmem:[%s11976_s1 + $0x398] sm:$0xff]  }
  0x6b   : > { %7656 = vmatprep.subr.bf16.mxu0 %v8845_v47  ;;  %v8859_v47 = vld [vmem:[%s11976_s1 + $0x340] sm:$0xff]  }
  0x6c   : > { %v9822_v63 = vld [vmem:[%s9356_s17 + $0x3f] sm:$0xff] }
  0x6d   : > { %7709 = vmatpush3.bf16.msra.mxu1 %v8842_v36  ;;  %v419_v36 = vld [vmem:[%s9356_s17 + $0xf] sm:$0xff] }
  0x6e   : > { %7710 = vmatprep.subr.bf16.mxu1 %v8846_v51  ;;  %7657 = vmatpush3.bf16.msra.mxu0 %v8847_v53  ;;  %v431_v42 = vpack.c.bf16 %v420_v37, %v419_v36  ;;  %v8861_v51 = vld [vmem:[%s11976_s1 + $0x3d0] sm:$0xff]   ;;  %v8863_v53 = vld [vmem:[%s11976_s1 + $0x348] sm:$0xff]  }
  0x6f   : > { %2815 = vmatmul.mubr.bf16.gmra.mrb[36].mxu0 %v9675_v6  ;;  %7658 = vmatprep.subr.bf16.mxu0 %v8849_v17  ;;  %v501_v36 = vld [vmem:[%s9356_s17 + $0x69] sm:$0xff]  ;;  %v502_v37 = vld [vmem:[%s9356_s17 + $0x71] sm:$0xff] }
  0x70   : > { %2896 = vmatmul.mubr.bf16.gmra.mrb[36].mxu1 %v386_v16  ;;  %2822 = vmatprep.mubr.bf16.mxu0 %v9692_v29  ;;  %v382_v16 = vld [vmem:[%s9356_s17 + $0x65] sm:$0xff] }
  0x71   : > { %2903 = vmatprep.mubr.bf16.mxu1 %v411_v35  ;;  %7711 = vmatpush3.bf16.msra.mxu1 %v8848_v55  ;;  %v388_v24 = vpack.c.bf16 %v382_v16, %v381_v5  ;;  %v8854_v35 = vld [vmem:[%s11976_s1 + $0x238] sm:$0xff]   ;;  %v8874_v16 = vld [vmem:[%s11976_s1 + $0x3a8] sm:$0xff]  }
  0x72   : > { %7659 = vmatpush3.bf16.msra.mxu0 %v8850_v23  ;;  %7712 = vmatprep.subr.bf16.mxu1 %v8851_v31  ;;  %v9816_v55 = vld [vmem:[%s9356_s17 + $0x37] sm:$0xff]  ;;  %v500_v23 = vld [vmem:[%s9356_s17 + $0x61] sm:$0xff] }
  0x73   : > { %7660 = vmatprep.subr.bf16.mxu0 %v8853_v25  ;;  %v672_v5 = vpack.c.bf16 %v9822_v63, %v9816_v55  ;;  %v8876_v31 = vld [vmem:[%s11976_s1 + $0x320] sm:$0xff]  }
  0x74   : > { %v9900_v25 = vld [vmem:[%s9356_s17 + $0x60] sm:$0xff] }
  0x75   : > { %7713 = vmatpush3.bf16.msra.mxu1 %v8852_v34  ;;  %v9897_v34 = vld [vmem:[%s9356_s17 + $0x5f] sm:$0xff] }
  0x76   : > { %7661 = vmatpush3.bf16.msra.mxu0 %v8854_v35  ;;  %7802 = vmatprep.subr.bf16.mxu1 %v8855_v38  ;;  %v674_v35 = vpack.c.bf16 %v9897_v34, %v9891_v0  ;;  %v8881_v38 = vld [vmem:[%s11976_s1 + $0x370] sm:$0xff]  }
  0x77   : > { %2823 = vmatmul.mubr.bf16.gmra.mrb[40].mxu0 %v9705_v43  ;;  %7750 = vmatprep.subr.bf16.mxu0 %v8859_v47  ;;  %v508_v47 = vpack.c.bf16 %v502_v37, %v501_v36  ;;  %v8893_v37 = vld [vmem:[%s11976_s1 + $0x4d0] sm:$0xff]  }
  0x78   : > { %2904 = vmatmul.mubr.bf16.gmra.mrb[40].mxu1 %v387_v46  ;;  %2830 = vmatprep.mubr.bf16.mxu0 %v9728_v62  ;;  %v8857_v46 = vld [vmem:[%s11976_s1 + $0x3c8] sm:$0xff]  }
  0x79   : > { %2911 = vmatprep.mubr.bf16.mxu1 %v412_v12  ;;  %v9857_v12 = vld [vmem:[%s9356_s17 + $0x4f] sm:$0xff] }
  0x7a   : > { %v435_v8 = vpack.c.bf16 %v9891_v0, %v9857_v12 }
  0x7f   : > { %2831 = vmatmul.mubr.bf16.gmra.mrb[44].mxu0 %v9738_v20 }
  0x80   : > { %2912 = vmatmul.mubr.bf16.gmra.mrb[44].mxu1 %v388_v24  ;;  %2952 = vmatprep.mubr.bf16.mxu0 %v9397_v58  ;;  %v421_v58 = vld [vmem:[%s9356_s17 + $0x1f] sm:$0xff] }
  0x81   : > { %3033 = vmatprep.mubr.bf16.mxu1 %v503_v7  ;;  %v9782_v7 = vld [vmem:[%s9356_s17 + $0x27] sm:$0xff] }
  0x82   : > { %v671_v3 = vpack.c.bf16 %v9801_v10, %v9782_v7  ;;  %v8875_v24 = vld [vmem:[%s11976_s1 + $0x360] sm:$0xff]  }
  0x87   : > { %2953 = vmatmul.mubr.bf16.vlgmr.msra.gmra.mrb[48].mxu0 %v431_v42  ;;  %v8882_v42 = vld [vmem:[%s11976_s1 + $0x330] sm:$0xff]  }
  0x88   : > { %3034 = vmatmul.mubr.bf16.vlgmr.msra.gmra.mrb[48].mxu1 %v479_v14  ;;  %2960 = vmatprep.mubr.bf16.mxu0 %v9443_v15  ;;  %v432_v14 = vpack.c.bf16 %v9782_v7, %v421_v58  ;;  %v8862_v15 = vld [vmem:[%s11976_s1 + $0x390] sm:$0xff]   ;;  %v9932_v58 = vld [vmem:[%s9356_s17 + $0x67] sm:$0xff] }
  0x89   : > { %7803 = vmatpush3.bf16.msra.mxu1 %v8856_v45  ;;  %3041 = vmatprep.mubr.bf16.mxu1 %v504_v28  ;;  %v8867_v28 = vld [vmem:[%s11976_s1 + $0x350] sm:$0xff]   ;;  %v8928_v7 = vld [vmem:[%s11976_s1 + $0x508] sm:$0xff]  }
  0x8a   : > { %7804 = vmatprep.subr.bf16.mxu1 %v8857_v46  ;;  %7751 = vmatpush3.bf16.msra.mxu0 %v8860_v49  ;;  %v8885_v46 = vld [vmem:[%s11976_s1 + $0x378] sm:$0xff]  }
  0x8b   : > { %7752 = vmatprep.subr.bf16.mxu0 %v8863_v53  ;;  %v8886_v49 = vld [vmem:[%s11976_s1 + $0x338] sm:$0xff]   ;;  %v540_v53 = vld [vmem:[%s9356_s17 + $0x23] sm:$0xff] }
  0x8d   : > { %7805 = vmatpush3.bf16.msra.mxu1 %v8858_v2  ;;  %v478_v2 = vld [vmem:[%s9356_s17 + $0x70] sm:$0xff] }
  0x8e   : > { %7806 = vmatprep.subr.bf16.mxu1 %v8861_v51  ;;  %7753 = vmatpush3.bf16.msra.mxu0 %v8864_v56  ;;  %v539_v51 = vld [vmem:[%s9356_s17 + $0x1b] sm:$0xff]  ;;  %v436_v56 = vpack.c.bf16 %v9932_v58, %v9897_v34 }
  0x8f   : > { %2961 = vmatmul.mubr.bf16.gmra.mrb[52].mxu0 %v432_v14  ;;  %7754 = vmatprep.subr.bf16.mxu0 %v8867_v28  ;;  %v515_v28 = vld [vmem:[%s9356_s17 + $0x1a] sm:$0xff] }
  0x90   : > { %3042 = vmatmul.mubr.bf16.gmra.mrb[52].mxu1 %v480_v33  ;;  %2968 = vmatprep.mubr.bf16.mxu0 %v9478_v30  ;;  %v433_v30 = vpack.c.bf16 %v9816_v55, %v9801_v10  ;;  %v9845_v33 = vld [vmem:[%s9356_s17 + $0x47] sm:$0xff]  ;;  %v8936_v55 = vld [vmem:[%s11976_s1 + $0x518] sm:$0xff]  }
  0x91   : > { %7807 = vmatpush3.bf16.msra.mxu1 %v8862_v15  ;;  %3049 = vmatprep.mubr.bf16.mxu1 %v505_v44  ;;  %v8873_v44 = vld [vmem:[%s11976_s1 + $0x3e8] sm:$0xff]   ;;  %v673_v17 = vpack.c.bf16 %v9857_v12, %v9845_v33  ;;  %v434_v48 = vpack.c.bf16 %v9845_v33, %v9822_v63  ;;  %v551_v15 = vpack.c.bf16 %v540_v53, %v539_v51  ;;  %v8898_v51 = vld [vmem:[%s11976_s1 + $0x498] sm:$0xff]   ;;  %v8942_v33 = vld [vmem:[%s11976_s1 + $0x5f0] sm:$0xff]  }
  0x92   : > { %7808 = vmatprep.subr.bf16.mxu1 %v8865_v21  ;;  %7755 = vmatpush3.bf16.msra.mxu0 %v8868_v59  ;;  %v8891_v21 = vld [vmem:[%s11976_s1 + $0x440] sm:$0xff]   ;;  %v8943_v12 = vld [vmem:[%s11976_s1 + $0x528] sm:$0xff]  }
  0x93   : > { %7756 = vmatprep.subr.bf16.mxu0 %v8871_v26  ;;  %v516_v59 = vld [vmem:[%s9356_s17 + $0x22] sm:$0xff] }
  0x94   : > { %v9959_v26 = vld [vmem:[%s9356_s17 + $0x3b] sm:$0xff] }
  0x95   : > { %7809 = vmatpush3.bf16.msra.mxu1 %v8866_v4  ;;  %v541_v4 = vld [vmem:[%s9356_s17 + $0x2b] sm:$0xff]  ;;  %v10324_v34 = vld [vmem:[%s11976_s1 + $0x600] sm:$0xff]  }
  0x96   : > { %7810 = vmatprep.subr.bf16.mxu1 %v8869_v11  ;;  %7757 = vmatpush3.bf16.msra.mxu0 %v8872_v40  ;;  %v9956_v11 = vld [vmem:[%s9356_s17 + $0x33] sm:$0xff] }
  0x97   : > { %2969 = vmatmul.mubr.bf16.gmra.mrb[56].mxu0 %v433_v30  ;;  %7758 = vmatprep.subr.bf16.mxu0 %v8875_v24  ;;  %v9962_v30 = vld [vmem:[%s9356_s17 + $0x32] sm:$0xff]  ;;  %v791_v40 = vpack.c.bf16 %v9959_v26, %v9956_v11  ;;  %v8889_v24 = vld [vmem:[%s11976_s1 + $0x4c8] sm:$0xff]  }
  0x98   : > { %3050 = vmatmul.mubr.bf16.gmra.mrb[56].mxu1 %v481_v54  ;;  %2976 = vmatprep.mubr.bf16.mxu0 %v9524_v52  ;;  %v507_v52 = vpack.c.bf16 %v500_v23, %v9552_v1  ;;  %v8880_v54 = vld [vmem:[%s11976_s1 + $0x3b0] sm:$0xff]   ;;  %v454_v1 = vld [vmem:[%s9356_s17 + $0x68] sm:$0xff]  ;;  %v552_v23 = vpack.c.bf16 %v9956_v11, %v541_v4 }
  0x99   : > { %3057 = vmatprep.mubr.bf16.mxu1 %v506_v9  ;;  %7811 = vmatpush3.bf16.msra.mxu1 %v8870_v22  ;;  %v8879_v9 = vld [vmem:[%s11976_s1 + $0x328] sm:$0xff]   ;;  %v460_v45 = vpack.c.bf16 %v454_v1, %v9900_v25  ;;  %v9945_v14 = vpack.c.bf16 %v478_v2, %v454_v1  ;;  %v9965_v22 = vld [vmem:[%s9356_s17 + $0x3a] sm:$0xff] }
  0x9a   : > { %7812 = vmatprep.subr.bf16.mxu1 %v8873_v44  ;;  %7759 = vmatpush3.bf16.msra.mxu0 %v8876_v31  ;;  %v527_v44 = vpack.c.bf16 %v516_v59, %v515_v28  ;;  %v517_v31 = vld [vmem:[%s9356_s17 + $0x2a] sm:$0xff]  ;;  %v10042_v2 = vld [vmem:[%s9356_s17 + $0x5a] sm:$0xff] }
  0x9b   : > { %7760 = vmatprep.subr.bf16.mxu0 %v8877_v27  ;;  %v8892_v27 = vld [vmem:[%s11976_s1 + $0x400] sm:$0xff]   ;;  %v9999_v1 = vld [vmem:[%s9356_s17 + $0x4a] sm:$0xff] }
  0x9c   : > { %v8902_v28 = vld [vmem:[%s11976_s1 + $0x4a0] sm:$0xff]   ;;  %v8905_v59 = vld [vmem:[%s11976_s1 + $0x4e8] sm:$0xff]  }
  0x9d   : > { %7813 = vmatpush3.bf16.msra.mxu1 %v8874_v16  ;;  %v767_v16 = vpack.c.bf16 %v9965_v22, %v9962_v30  ;;  %v10071_v4 = vld [vmem:[%s9356_s17 + $0x63] sm:$0xff] }
  0x9e   : > { %7814 = vmatprep.subr.bf16.mxu1 %v8878_v41  ;;  %7761 = vmatpush3.bf16.msra.mxu0 %v8879_v9  ;;  %v8895_v41 = vld [vmem:[%s11976_s1 + $0x448] sm:$0xff]  }
  0x9f   : > { %2977 = vmatmul.mubr.bf16.gmra.mrb[60].mxu0 %v434_v48  ;;  %7762 = vmatprep.subr.bf16.mxu0 %v8881_v38  ;;  %v8890_v48 = vld [vmem:[%s11976_s1 + $0x488] sm:$0xff]  }
  0xa0   : > { %3058 = vmatmul.mubr.bf16.gmra.mrb[60].mxu1 %v482_v18  ;;  %2984 = vmatprep.mubr.bf16.mxu0 %v9572_v19  ;;  %v8884_v18 = vld [vmem:[%s11976_s1 + $0x3b8] sm:$0xff]   ;;  %v483_v19 = vpack.c.bf16 %v9900_v25, %v9564_v13  ;;  %v8887_v13 = vld [vmem:[%s11976_s1 + $0x4c0] sm:$0xff]   ;;  %v8896_v38 = vld [vmem:[%s11976_s1 + $0x408] sm:$0xff]  }
  0xa1   : > { %3065 = vmatprep.mubr.bf16.mxu1 %v507_v52  ;;  %7815 = vmatpush3.bf16.msra.mxu1 %v8880_v54  ;;  %v9989_v52 = vld [vmem:[%s9356_s17 + $0x43] sm:$0xff]  ;;  %v9992_v54 = vld [vmem:[%s9356_s17 + $0x4b] sm:$0xff] }
  0xa2   : > { %7816 = vmatprep.subr.bf16.mxu1 %v8883_v50  ;;  %7763 = vmatpush3.bf16.msra.mxu0 %v8882_v42  ;;  %v9996_v9 = vld [vmem:[%s9356_s17 + $0x42] sm:$0xff]  ;;  %v792_v36 = vpack.c.bf16 %v9992_v54, %v9989_v52  ;;  %v528_v42 = vpack.c.bf16 %v9962_v30, %v517_v31  ;;  %v8899_v50 = vld [vmem:[%s11976_s1 + $0x450] sm:$0xff]  }
  0xa3   : > { %7764 = vmatprep.subr.bf16.mxu0 %v8885_v46  ;;  %v8900_v46 = vld [vmem:[%s11976_s1 + $0x410] sm:$0xff]  }
  0xa4   : > { %v10086_v31 = vld [vmem:[%s9356_s17 + $0x6a] sm:$0xff] }
  0xa5   : > { %7817 = vmatpush3.bf16.msra.mxu1 %v8884_v18  ;;  %v8897_v18 = vld [vmem:[%s11976_s1 + $0x4d8] sm:$0xff]   ;;  %v8953_v30 = vld [vmem:[%s11976_s1 + $0x610] sm:$0xff]  }
  0xa6   : > { %7906 = vmatprep.subr.bf16.mxu1 %v8887_v13  ;;  %7765 = vmatpush3.bf16.msra.mxu0 %v8886_v49  ;;  %v8903_v13 = vld [vmem:[%s11976_s1 + $0x458] sm:$0xff]  }
  0xa7   : > { %2985 = vmatmul.mubr.bf16.gmra.mrb[64].mxu0 %v435_v8  ;;  %7854 = vmatprep.subr.bf16.mxu0 %v8891_v21  ;;  %v553_v8 = vpack.c.bf16 %v9989_v52, %v9959_v26 }
  0xa8   : > { %3066 = vmatmul.mubr.bf16.gmra.mrb[64].mxu1 %v483_v19  ;;  %2992 = vmatprep.mubr.bf16.mxu0 %v460_v45  ;;  %v10025_v19 = vld [vmem:[%s9356_s17 + $0x53] sm:$0xff]  ;;  %v10028_v45 = vld [vmem:[%s9356_s17 + $0x5b] sm:$0xff] }
  0xa9   : > { %3073 = vmatprep.mubr.bf16.mxu1 %v508_v47  ;;  %v10034_v47 = vld [vmem:[%s9356_s17 + $0x52] sm:$0xff]  ;;  %v793_v49 = vpack.c.bf16 %v10028_v45, %v10025_v19  ;;  %v554_v21 = vpack.c.bf16 %v10025_v19, %v9992_v54 }
  0xaa   : > { %v769_v53 = vpack.c.bf16 %v10042_v2, %v10034_v47 }
  0xaf   : > { %2993 = vmatmul.mubr.bf16.gmra.mrb[68].mxu0 %v436_v56  ;;  %v8901_v56 = vld [vmem:[%s11976_s1 + $0x4e0] sm:$0xff]  }
  0xb0   : > { %3074 = vmatmul.mubr.bf16.gmra.mrb[68].mxu1 %v9945_v14  ;;  %3114 = vmatprep.mubr.bf16.mxu0 %v551_v15  ;;  %v529_v15 = vpack.c.bf16 %v9996_v9, %v9965_v22 }
  0xb1   : > { %3195 = vmatprep.mubr.bf16.mxu1 %v9647_v39  ;;  %v8888_v39 = vld [vmem:[%s11976_s1 + $0x480] sm:$0xff]  }
  0xb7   : > { %3115 = vmatmul.mubr.bf16.vlgmr.msra.gmra.mrb[72].mxu0 %v527_v44  ;;  %v8908_v44 = vld [vmem:[%s11976_s1 + $0x420] sm:$0xff]  }
  0xb8   : > { %3196 = vmatmul.mubr.bf16.vlgmr.msra.gmra.mrb[72].mxu1 %v9611_v60  ;;  %3122 = vmatprep.mubr.bf16.mxu0 %v552_v23  ;;  %v768_v60 = vpack.c.bf16 %v9999_v1, %v9996_v9  ;;  %v10080_v23 = vld [vmem:[%s9356_s17 + $0x62] sm:$0xff] }
  0xb9   : > { %7907 = vmatpush3.bf16.msra.mxu1 %v8888_v39  ;;  %3203 = vmatprep.mubr.bf16.mxu1 %v9675_v6  ;;  %v8894_v6 = vld [vmem:[%s11976_s1 + $0x490] sm:$0xff]  }
  0xba   : > { %7908 = vmatprep.subr.bf16.mxu1 %v8889_v24  ;;  %7855 = vmatpush3.bf16.msra.mxu0 %v8892_v27  ;;  %v10077_v39 = vld [vmem:[%s9356_s17 + $0x6b] sm:$0xff] }
  0xbb   : > { %7856 = vmatprep.subr.bf16.mxu0 %v8895_v41  ;;  %v8909_v24 = vld [vmem:[%s11976_s1 + $0x468] sm:$0xff]   ;;  %v794_v27 = vpack.c.bf16 %v10077_v39, %v10071_v4 }
  0xbc   : > { %v8906_v41 = vld [vmem:[%s11976_s1 + $0x4a8] sm:$0xff]  }
  0xbd   : > { %7909 = vmatpush3.bf16.msra.mxu1 %v8890_v48  ;;  %v596_v48 = vld [vmem:[%s9356_s17 + $0x6c] sm:$0xff] }
  0xbe   : > { %7910 = vmatprep.subr.bf16.mxu1 %v8893_v37  ;;  %7857 = vmatpush3.bf16.msra.mxu0 %v8896_v38  ;;  %v770_v37 = vpack.c.bf16 %v10086_v31, %v10080_v23  ;;  %v8910_v38 = vld [vmem:[%s11976_s1 + $0x4f0] sm:$0xff]  }
  0xbf   : > { %3123 = vmatmul.mubr.bf16.gmra.mrb[76].mxu0 %v528_v42  ;;  %7858 = vmatprep.subr.bf16.mxu0 %v8899_v50  ;;  %v530_v42 = vpack.c.bf16 %v10034_v47, %v9999_v1  ;;  %v603_v50 = vpack.c.bf16 %v596_v48, %v9725_v61  ;;  %v8917_v61 = vld [vmem:[%s11976_s1 + $0x478] sm:$0xff]   ;;  %v8957_v47 = vld [vmem:[%s11976_s1 + $0x630] sm:$0xff]  }
  0xc0   : > { %3204 = vmatmul.mubr.bf16.gmra.mrb[76].mxu1 %v9638_v32  ;;  %3130 = vmatprep.mubr.bf16.mxu0 %v553_v8  ;;  %v8904_v32 = vld [vmem:[%s11976_s1 + $0x418] sm:$0xff]   ;;  %v8912_v8 = vld [vmem:[%s11976_s1 + $0x4b0] sm:$0xff]  }
  0xc1   : > { %7911 = vmatpush3.bf16.msra.mxu1 %v8894_v6  ;;  %3211 = vmatprep.mubr.bf16.mxu1 %v9705_v43  ;;  %v8907_v43 = vld [vmem:[%s11976_s1 + $0x460] sm:$0xff]   ;;  %v555_v6 = vpack.c.bf16 %v10071_v4, %v10028_v45 }
  0xc2   : > { %7912 = vmatprep.subr.bf16.mxu1 %v8897_v18  ;;  %7859 = vmatpush3.bf16.msra.mxu0 %v8900_v46  ;;  %v8914_v18 = vld [vmem:[%s11976_s1 + $0x430] sm:$0xff]   ;;  %v8915_v46 = vld [vmem:[%s11976_s1 + $0x4f8] sm:$0xff]  }
  0xc3   : > { %7860 = vmatprep.subr.bf16.mxu0 %v8903_v13  ;;  %v10122_v13 = vld [vmem:[%s9356_s17 + $0x73] sm:$0xff] }
  0xc5   : > { %7913 = vmatpush3.bf16.msra.mxu1 %v8898_v51  ;;  %v597_v51 = vld [vmem:[%s9356_s17 + $0x74] sm:$0xff] }
  0xc6   : > { %7914 = vmatprep.subr.bf16.mxu1 %v8901_v56  ;;  %7861 = vmatpush3.bf16.msra.mxu0 %v8904_v32  ;;  %v598_v56 = vld [vmem:[%s9356_s17 + $0x7c] sm:$0xff] }
  0xc7   : > { %3131 = vmatmul.mubr.bf16.gmra.mrb[80].mxu0 %v529_v15  ;;  %7862 = vmatprep.subr.bf16.mxu0 %v8907_v43  ;;  %v8916_v32 = vld [vmem:[%s11976_s1 + $0x4b8] sm:$0xff]   ;;  %v531_v43 = vpack.c.bf16 %v10080_v23, %v10042_v2 }
  0xc8   : > { %3212 = vmatmul.mubr.bf16.gmra.mrb[80].mxu1 %v9665_v57  ;;  %3138 = vmatprep.mubr.bf16.mxu0 %v554_v21  ;;  %v8911_v57 = vld [vmem:[%s11976_s1 + $0x428] sm:$0xff]   ;;  %v8918_v15 = vld [vmem:[%s11976_s1 + $0x438] sm:$0xff]   ;;  %v556_v21 = vpack.c.bf16 %v10122_v13, %v10077_v39 }
  0xc9   : > { %3219 = vmatprep.mubr.bf16.mxu1 %v9738_v20  ;;  %7915 = vmatpush3.bf16.msra.mxu1 %v8902_v28  ;;  %v8913_v20 = vld [vmem:[%s11976_s1 + $0x470] sm:$0xff]   ;;  %v604_v28 = vpack.c.bf16 %v598_v56, %v597_v51  ;;  %v10167_v56 = vld [vmem:[%s9356_s17 + $0x40] sm:$0xff] }
  0xca   : > { %7916 = vmatprep.subr.bf16.mxu1 %v8905_v59  ;;  %7863 = vmatpush3.bf16.msra.mxu0 %v8908_v44  ;;  %v10144_v59 = vld [vmem:[%s9356_s17 + $0x72] sm:$0xff]  ;;  %v635_v44 = vld [vmem:[%s9356_s17 + $0x26] sm:$0xff] }
  0xcb   : > { %7864 = vmatprep.subr.bf16.mxu0 %v8909_v24  ;;  %v8923_v24 = vld [vmem:[%s11976_s1 + $0x540] sm:$0xff]  }
  0xcd   : > { %7917 = vmatpush3.bf16.msra.mxu1 %v8906_v41  ;;  %v636_v41 = vld [vmem:[%s9356_s17 + $0x2e] sm:$0xff] }
  0xce   : > { %7918 = vmatprep.subr.bf16.mxu1 %v8910_v38  ;;  %7865 = vmatpush3.bf16.msra.mxu0 %v8911_v57  ;;  %v683_v38 = vld [vmem:[%s9356_s17 + $0x28] sm:$0xff]  ;;  %v10154_v57 = vld [vmem:[%s9356_s17 + $0x30] sm:$0xff] }
  0xcf   : > { %3139 = vmatmul.mubr.bf16.gmra.mrb[84].mxu0 %v530_v42  ;;  %7866 = vmatprep.subr.bf16.mxu0 %v8913_v20  ;;  %v532_v42 = vpack.c.bf16 %v10144_v59, %v10086_v31  ;;  %v580_v20 = vpack.c.bf16 %v597_v51, %v596_v48  ;;  %v8920_v48 = vld [vmem:[%s11976_s1 + $0x580] sm:$0xff]  }
  0xd0   : > { %3220 = vmatmul.mubr.bf16.gmra.mrb[84].mxu1 %v9692_v29  ;;  %3146 = vmatprep.mubr.bf16.mxu0 %v555_v6  ;;  %v8919_v29 = vld [vmem:[%s11976_s1 + $0x5c0] sm:$0xff]   ;;  %v647_v6 = vpack.c.bf16 %v636_v41, %v635_v44  ;;  %v8922_v44 = vld [vmem:[%s11976_s1 + $0x588] sm:$0xff]   ;;  %v8925_v41 = vld [vmem:[%s11976_s1 + $0x5d0] sm:$0xff]  }
  0xd1   : > { %3227 = vmatprep.mubr.bf16.mxu1 %v603_v50  ;;  %7919 = vmatpush3.bf16.msra.mxu1 %v8912_v8  ;;  %v695_v50 = vpack.c.bf16 %v10154_v57, %v683_v38  ;;  %v612_v8 = vld [vmem:[%s9356_s17 + $0x2d] sm:$0xff] }
  0xd2   : > { %7867 = vmatpush3.bf16.msra.mxu0 %v8914_v18  ;;  %7920 = vmatprep.subr.bf16.mxu1 %v8915_v46  ;;  %v637_v18 = vld [vmem:[%s9356_s17 + $0x36] sm:$0xff]  ;;  %v638_v46 = vld [vmem:[%s9356_s17 + $0x3e] sm:$0xff]  ;;  %v639_v38 = vld [vmem:[%s9356_s17 + $0x46] sm:$0xff] }
  0xd3   : > { %7868 = vmatprep.subr.bf16.mxu0 %v8917_v61  ;;  %v10164_v61 = vld [vmem:[%s9356_s17 + $0x38] sm:$0xff]  ;;  %v648_v51 = vpack.c.bf16 %v638_v46, %v637_v18  ;;  %v615_v46 = vld [vmem:[%s9356_s17 + $0x45] sm:$0xff] }
  0xd4   : > { %v8929_v18 = vld [vmem:[%s11976_s1 + $0x5d8] sm:$0xff]  }
  0xd5   : > { %7921 = vmatpush3.bf16.msra.mxu1 %v8916_v32 }
  0xd6   : > { %7869 = vmatpush3.bf16.msra.mxu0 %v8918_v15  ;;  %8010 = vmatprep.subr.bf16.mxu1 %v8919_v29  ;;  %v8921_v15 = vld [vmem:[%s11976_s1 + $0x5c8] sm:$0xff]   ;;  %v696_v29 = vpack.c.bf16 %v10167_v56, %v10164_v61 }
  0xd7   : > { %3147 = vmatmul.mubr.bf16.gmra.mrb[88].mxu0 %v531_v43  ;;  %7958 = vmatprep.subr.bf16.mxu0 %v8923_v24  ;;  %v613_v43 = vld [vmem:[%s9356_s17 + $0x35] sm:$0xff]  ;;  %v8927_v24 = vld [vmem:[%s11976_s1 + $0x548] sm:$0xff]  }
  0xd8   : > { %3228 = vmatmul.mubr.bf16.gmra.mrb[88].mxu1 %v9728_v62  ;;  %3154 = vmatprep.mubr.bf16.mxu0 %v556_v21  ;;  %v611_v62 = vld [vmem:[%s9356_s17 + $0x25] sm:$0xff]  ;;  %v614_v21 = vld [vmem:[%s9356_s17 + $0x3d] sm:$0xff] }
  0xd9   : > { %3235 = vmatprep.mubr.bf16.mxu1 %v604_v28  ;;  %v623_v32 = vpack.c.bf16 %v612_v8, %v611_v62  ;;  %v8924_v28 = vld [vmem:[%s11976_s1 + $0x500] sm:$0xff]   ;;  %v624_v10 = vpack.c.bf16 %v614_v21, %v613_v43  ;;  %v10233_v21 = vld [vmem:[%s9356_s17 + $0x58] sm:$0xff] }
  0xda   : > { %v642_v43 = vld [vmem:[%s9356_s17 + $0x5e] sm:$0xff] }
  0xdf   : > { %3155 = vmatmul.mubr.bf16.gmra.mrb[92].mxu0 %v532_v42  ;;  %v640_v42 = vld [vmem:[%s9356_s17 + $0x4e] sm:$0xff] }
  0xe0   : > { %3236 = vmatmul.mubr.bf16.gmra.mrb[92].mxu1 %v580_v20  ;;  %3276 = vmatprep.mubr.bf16.mxu0 %v647_v6  ;;  %v10197_v20 = vld [vmem:[%s9356_s17 + $0x48] sm:$0xff]  ;;  %v10200_v6 = vld [vmem:[%s9356_s17 + $0x50] sm:$0xff]  ;;  %v649_v62 = vpack.c.bf16 %v640_v42, %v639_v38 }
  0xe1   : > { %3357 = vmatprep.mubr.bf16.mxu1 %v695_v50  ;;  %v8926_v50 = vld [vmem:[%s11976_s1 + $0x590] sm:$0xff]   ;;  %v697_v8 = vpack.c.bf16 %v10200_v6, %v10197_v20  ;;  %v8937_v38 = vld [vmem:[%s11976_s1 + $0x5e8] sm:$0xff]   ;;  %v721_v1 = vpack.c.bf16 %v10233_v21, %v10200_v6 }
  0xe2   : > { %v617_v42 = vld [vmem:[%s9356_s17 + $0x55] sm:$0xff]  ;;  %v8956_v6 = vld [vmem:[%s11976_s1 + $0x628] sm:$0xff]  }
  0xe7   : > { %3277 = vmatmul.mubr.bf16.vlgmr.msra.gmra.mrb[96].mxu0 %v623_v32  ;;  %v616_v32 = vld [vmem:[%s9356_s17 + $0x4d] sm:$0xff] }
  0xe8   : > { %3358 = vmatmul.mubr.bf16.vlgmr.msra.gmra.mrb[96].mxu1 %v671_v3  ;;  %3284 = vmatprep.mubr.bf16.mxu0 %v648_v51  ;;  %v8931_v3 = vld [vmem:[%s11976_s1 + $0x550] sm:$0xff]   ;;  %v8930_v51 = vld [vmem:[%s11976_s1 + $0x598] sm:$0xff]   ;;  %v625_v63 = vpack.c.bf16 %v616_v32, %v615_v46 }
  0xe9   : > { %8011 = vmatpush3.bf16.msra.mxu1 %v8920_v48  ;;  %3365 = vmatprep.mubr.bf16.mxu1 %v696_v29  ;;  %v8932_v48 = vld [vmem:[%s11976_s1 + $0x510] sm:$0xff]  }
  0xea   : > { %8012 = vmatprep.subr.bf16.mxu1 %v8921_v15  ;;  %7959 = vmatpush3.bf16.msra.mxu0 %v8924_v28  ;;  %v8935_v15 = vld [vmem:[%s11976_s1 + $0x558] sm:$0xff]   ;;  %v8933_v28 = vld [vmem:[%s11976_s1 + $0x5e0] sm:$0xff]  }
  0xeb   : > { %7960 = vmatprep.subr.bf16.mxu0 %v8927_v24  ;;  %v641_v29 = vld [vmem:[%s9356_s17 + $0x56] sm:$0xff]  ;;  %v8934_v24 = vld [vmem:[%s11976_s1 + $0x5a0] sm:$0xff]  }
  0xed   : > { %8013 = vmatpush3.bf16.msra.mxu1 %v8922_v44  ;;  %v650_v44 = vpack.c.bf16 %v642_v43, %v641_v29 }
  0xee   : > { %8014 = vmatprep.subr.bf16.mxu1 %v8925_v41  ;;  %7961 = vmatpush3.bf16.msra.mxu0 %v8928_v7  ;;  %v698_v41 = vpack.c.bf16 %v9900_v25, %v10233_v21  ;;  %v618_v7 = vld [vmem:[%s9356_s17 + $0x5d] sm:$0xff]  ;;  %v644_v25 = vld [vmem:[%s9356_s17 + $0x6e] sm:$0xff] }
  0xef   : > { %3285 = vmatmul.mubr.bf16.gmra.mrb[100].mxu0 %v624_v10  ;;  %7962 = vmatprep.subr.bf16.mxu0 %v8931_v3  ;;  %v8940_v10 = vld [vmem:[%s11976_s1 + $0x520] sm:$0xff]   ;;  %v626_v32 = vpack.c.bf16 %v618_v7, %v617_v42  ;;  %v620_v7 = vld [vmem:[%s9356_s17 + $0x6d] sm:$0xff] }
  0xf0   : > { %3366 = vmatmul.mubr.bf16.gmra.mrb[100].mxu1 %v672_v5  ;;  %3292 = vmatprep.mubr.bf16.mxu0 %v649_v62  ;;  %v8939_v5 = vld [vmem:[%s11976_s1 + $0x560] sm:$0xff]  }
  0xf1   : > { %8015 = vmatpush3.bf16.msra.mxu1 %v8926_v50  ;;  %3373 = vmatprep.mubr.bf16.mxu1 %v697_v8  ;;  %v643_v3 = vld [vmem:[%s9356_s17 + $0x66] sm:$0xff]  ;;  %v10268_v62 = vld [vmem:[%s11977_s2] ss:$0 sm:$0xff] }
  0xf2   : > { %8016 = vmatprep.subr.bf16.mxu1 %v8929_v18  ;;  %7963 = vmatpush3.bf16.msra.mxu0 %v8932_v48  ;;  %v8941_v50 = vld [vmem:[%s11976_s1 + $0x568] sm:$0xff]   ;;  %v8945_v48 = vld [vmem:[%s11976_s1 + $0x570] sm:$0xff]   ;;  %v651_v43 = vpack.c.bf16 %v644_v25, %v643_v3 }
  0xf3   : > { %7964 = vmatprep.subr.bf16.mxu0 %v8935_v15  ;;  %v8938_v8 = vld [vmem:[%s11976_s1 + $0x5a8] sm:$0xff]   ;;  %v645_v25 = vld [vmem:[%s9356_s17 + $0x76] sm:$0xff] }
  0xf4   : > { %v619_v42 = vld [vmem:[%s9356_s17 + $0x65] sm:$0xff] }
  0xf5   : > { %8017 = vmatpush3.bf16.msra.mxu1 %v8930_v51 }
  0xf6   : > { %8018 = vmatprep.subr.bf16.mxu1 %v8933_v28  ;;  %7965 = vmatpush3.bf16.msra.mxu0 %v8936_v55 }
  0xf7   : > { %3293 = vmatmul.mubr.bf16.gmra.mrb[104].mxu0 %v625_v63  ;;  %7966 = vmatprep.subr.bf16.mxu0 %v8939_v5  ;;  %v8944_v5 = vld [vmem:[%s11976_s1 + $0x5b0] sm:$0xff]  }
  0xf8   : > { %3374 = vmatmul.mubr.bf16.gmra.mrb[104].mxu1 %v673_v17  ;;  %3300 = vmatprep.mubr.bf16.mxu0 %v650_v44  ;;  %v8946_v44 = vld [vmem:[%s11976_s1 + $0x530] sm:$0xff]  }
  0xf9   : > { %3381 = vmatprep.mubr.bf16.mxu1 %v698_v41  ;;  %8019 = vmatpush3.bf16.msra.mxu1 %v8934_v24 }
  0xfa   : > { %v7454_v18 = vpop.f32.mrb[0].mxu0  ;;  %8020 = vmatprep.subr.bf16.mxu1 %v8937_v38  ;;  %7967 = vmatpush3.bf16.msra.mxu0 %v8940_v10  ;;  %v8947_v10 = vld [vmem:[%s11976_s1 + $0x5f8] sm:$0xff]  }
  0xfb   : > { %v7506_v17 = vpop.f32.mrb[0].mxu1  ;;  %v7455_v46 = vpop.f32.mrb[1].mxu0  ;;  %7968 = vmatprep.subr.bf16.mxu0 %v8941_v50  ;;  %v668_v50 = vld [vmem:[%s9356_s17 + $0x6f] sm:$0xff] }
  0xfc   : > { %v7456_v51 = vadd.f32 %v7455_v46, %v7454_v18  ;;  %v7507_v15 = vpop.f32.mrb[1].mxu1  ;;  %v7457_v29 = vpop.f32.mrb[2].mxu0  ;;  %v8949_v18 = vld [vmem:[%s11976_s1 + $0x578] sm:$0xff]   ;;  %v10311_v46 = vld [vmem:[%s9356_s17 + $0x80] sm:$0xff] }
  0xfd   : > { %v7508_v28 = vadd.f32 %v7507_v15, %v7506_v17  ;;  %v7509_v55 = vpop.f32.mrb[2].mxu1  ;;  %v7458_v63 = vpop.f32.mrb[3].mxu0  ;;  %8021 = vmatpush3.bf16.msra.mxu1 %v8938_v8  ;;  %v646_v8 = vld [vmem:[%s9356_s17 + $0x7e] sm:$0xff]  ;;  %v627_v15 = vpack.c.bf16 %v620_v7, %v619_v42 }
  0xfe   : > { %v2631_v24 = vadd.f32 %v7456_v51, %v10268_v62  ;;  %v7459_v41 = vadd.f32 %v7458_v63, %v7457_v29  ;;  %v7510_v38 = vpop.f32.mrb[3].mxu1  ;;  %8022 = vmatprep.subr.bf16.mxu1 %v8942_v33  ;;  %7969 = vmatpush3.bf16.msra.mxu0 %v8943_v12  ;;  %v10307_v12 = vld [vmem:[%s9356_s17 + $0x78] sm:$0xff]  ;;  %v652_v63 = vpack.c.bf16 %v646_v8, %v645_v25 }
  0xff   : > { %v7511_v3 = vadd.f32 %v7510_v38, %v7509_v55  ;;  %3301 = vmatmul.mubr.bf16.gmra.mrb[108].mxu0 %v626_v32  ;;  %7970 = vmatprep.subr.bf16.mxu0 %v8945_v48  ;;  %v8948_v32 = vld [vmem:[%s11976_s1 + $0x5b8] sm:$0xff]   ;;  %v675_v55 = vpack.c.bf16 %v668_v50, %v9932_v58 }
 0x100   : > { %v10300_v17 = vadd.f32 %v7508_v28, %v2631_v24  ;;  %v2634_v33 = vadd.f32 %v7459_v41, %v10268_v62  ;;  %3382 = vmatmul.mubr.bf16.gmra.mrb[108].mxu1 %v674_v35  ;;  %3308 = vmatprep.mubr.bf16.mxu0 %v651_v43  ;;  %v8950_v48 = vld [vmem:[%s11976_s1 + $0x538] sm:$0xff]   ;;  %v700_v41 = vpack.c.bf16 %v10311_v46, %v10307_v12 }
 0x101   : > { %3389 = vmatprep.mubr.bf16.mxu1 %v9945_v14  ;;  %8023 = vmatpush3.bf16.msra.mxu1 %v8944_v5  ;;  %v669_v8 = vld [vmem:[%s9356_s17 + $0x77] sm:$0xff] }
 0x102   : > { %v10319_v51 = vadd.f32 %v7511_v3, %v2634_v33  ;;  %v7460_v0 = vpop.f32.mrb[4].mxu0  ;;  %7971 = vmatpush3.bf16.msra.mxu0 %v8946_v44  ;;  %8024 = vmatprep.subr.bf16.mxu1 %v8947_v10  ;;  %v621_v10 = vld [vmem:[%s9356_s17 + $0x75] sm:$0xff]  ;;  %v622_v3 = vld [vmem:[%s9356_s17 + $0x7d] sm:$0xff] }
 0x103   : > { %v7512_v35 = vpop.f32.mrb[4].mxu1  ;;  %v7461_v14 = vpop.f32.mrb[5].mxu0  ;;  %7972 = vmatprep.subr.bf16.mxu0 %v8949_v18  ;;  %v670_v18 = vld [vmem:[%s9356_s17 + $0x7f] sm:$0xff]  ;;  %v731_v33 = vld [vmem:[%s9356_s17 + $0x31] sm:$0xff] }
 0x104   : > { %v7462_v29 = vadd.f32 %v7461_v14, %v7460_v0  ;;  %v7513_v43 = vpop.f32.mrb[5].mxu1  ;;  %v7463_v28 = vpop.f32.mrb[6].mxu0 }
 0x105   : > { %v7514_v5 = vadd.f32 %v7513_v43, %v7512_v35  ;;  %v7515_v44 = vpop.f32.mrb[6].mxu1  ;;  %v7464_v24 = vpop.f32.mrb[7].mxu0  ;;  %8025 = vmatpush3.bf16.msra.mxu1 %v8948_v32  ;;  %v732_v32 = vld [vmem:[%s9356_s17 + $0x39] sm:$0xff] }
 0x106   : > { %v2639_v38 = vadd.f32 %v7462_v29, %v10268_v62  ;;  %v7465_v42 = vadd.f32 %v7464_v24, %v7463_v28  ;;  %v7516_v7 = vpop.f32.mrb[7].mxu1  ;;  %7973 = vmatpush3.bf16.msra.mxu0 %v8950_v48  ;;  %8604 = vmatprep.subr.bf16.mxu1 %v10324_v34 }
 0x107   : > { %v7517_v58 = vadd.f32 %v7516_v7, %v7515_v44  ;;  %3309 = vmatmul.mubr.bf16.gmra.mrb[112].mxu0 %v627_v15  ;;  %8520 = vmatprep.subr.bf16.mxu0 %v10324_v34  ;;  %v628_v15 = vpack.c.bf16 %v622_v3, %v621_v10  ;;  %v743_v44 = vpack.c.bf16 %v732_v32, %v731_v33  ;;  %v733_v3 = vld [vmem:[%s9356_s17 + $0x41] sm:$0xff] }
 0x108   : > { %v10334_v50 = vadd.f32 %v7514_v5, %v2639_v38  ;;  %v2642_v25 = vadd.f32 %v7465_v42, %v10268_v62  ;;  %3390 = vmatmul.mubr.bf16.gmra.mrb[112].mxu1 %v675_v55  ;;  %3316 = vmatprep.mubr.bf16.mxu0 %v652_v63  ;;  %v676_v5 = vpack.c.bf16 %v670_v18, %v669_v8 }
 0x109   : > { %3397 = vmatprep.mubr.bf16.mxu1 %v700_v41 }
 0x10a   : > { %v10341_v48 = vadd.f32 %v7517_v58, %v2642_v25  ;;  %v7466_v0 = vpop.f32.mrb[8].mxu0  ;;  %v734_v25 = vld [vmem:[%s9356_s17 + $0x49] sm:$0xff] }
 0x10b   : > { %v7518_v35 = vpop.f32.mrb[8].mxu1  ;;  %v7467_v14 = vpop.f32.mrb[9].mxu0 }
 0x10c   : > { %v7468_v29 = vadd.f32 %v7467_v14, %v7466_v0  ;;  %v7519_v43 = vpop.f32.mrb[9].mxu1  ;;  %v7469_v28 = vpop.f32.mrb[10].mxu0  ;;  %v719_v0 = vpack.c.bf16 %v10164_v61, %v10154_v57 }
 0x10d   : > { %v7520_v55 = vadd.f32 %v7519_v43, %v7518_v35  ;;  %v7521_v63 = vpop.f32.mrb[10].mxu1  ;;  %v7470_v24 = vpop.f32.mrb[11].mxu0 }
 0x10e   : > { %v2647_v38 = vadd.f32 %v7468_v29, %v10268_v62  ;;  %v7471_v41 = vadd.f32 %v7470_v24, %v7469_v28  ;;  %v7522_v42 = vpop.f32.mrb[11].mxu1  ;;  %v744_v29 = vpack.c.bf16 %v734_v25, %v733_v3  ;;  %v736_v24 = vld [vmem:[%s9356_s17 + $0x59] sm:$0xff] }
 0x10f   : > { %v7523_v7 = vadd.f32 %v7522_v42, %v7521_v63  ;;  %3317 = vmatmul.mubr.bf16.gmra.mrb[116].mxu0 %v628_v15  ;;  %v735_v63 = vld [vmem:[%s9356_s17 + $0x51] sm:$0xff]  ;;  %v720_v42 = vpack.c.bf16 %v10197_v20, %v10167_v56 }
 0x110   : > { %v10344_v58 = vadd.f32 %v7520_v55, %v2647_v38  ;;  %v2650_v10 = vadd.f32 %v7471_v41, %v10268_v62  ;;  %3398 = vmatmul.mubr.bf16.gmra.mrb[116].mxu1 %v676_v5  ;;  %3438 = vmatprep.mubr.bf16.mxu0 %v743_v44  ;;  %v8952_v44 = vld [vmem:[%s11976_s1 + $0x608] sm:$0xff]   ;;  %v8954_v56 = vld [vmem:[%s11976_s1 + $0x618] sm:$0xff]  }
 0x111   : > { %3519 = vmatprep.mubr.bf16.mxu1 %v791_v40 }
 0x112   : > { %v10352_v8 = vadd.f32 %v7523_v7, %v2650_v10  ;;  %v7472_v18 = vpop.f32.mrb[12].mxu0  ;;  %v745_v7 = vpack.c.bf16 %v736_v24, %v735_v63  ;;  %v713_v24 = vld [vmem:[%s9356_s17 + $0x60] sm:$0xff] }
 0x113   : > { %v7524_v33 = vpop.f32.mrb[12].mxu1  ;;  %v7473_v32 = vpop.f32.mrb[13].mxu0 }
 0x114   : > { %v7474_v35 = vadd.f32 %v7473_v32, %v7472_v18  ;;  %v7525_v14 = vpop.f32.mrb[13].mxu1  ;;  %v7475_v15 = vpop.f32.mrb[14].mxu0 }
 0x115   : > { %v7526_v43 = vadd.f32 %v7525_v14, %v7524_v33  ;;  %v7527_v28 = vpop.f32.mrb[14].mxu1  ;;  %v7476_v11 = vpop.f32.mrb[15].mxu0  ;;  %v738_v14 = vld [vmem:[%s9356_s17 + $0x69] sm:$0xff] }
 0x116   : > { %v2655_v26 = vadd.f32 %v7474_v35, %v10268_v62  ;;  %v7477_v40 = vadd.f32 %v7476_v11, %v7475_v15  ;;  %v7528_v5 = vpop.f32.mrb[15].mxu1  ;;  %v737_v35 = vld [vmem:[%s9356_s17 + $0x61] sm:$0xff] }
 0x117   : > { %v7529_v55 = vadd.f32 %v7528_v5, %v7527_v28  ;;  %3439 = vmatmul.mubr.bf16.vlgmr.msra.gmra.mrb[120].mxu0 %v719_v0 }
 0x118   : > { %v10360_v57 = vadd.f32 %v7526_v43, %v2655_v26  ;;  %v2658_v61 = vadd.f32 %v7477_v40, %v10268_v62  ;;  %3520 = vmatmul.mubr.bf16.vlgmr.msra.gmra.mrb[120].mxu1 %v767_v16  ;;  %3446 = vmatprep.mubr.bf16.mxu0 %v744_v29  ;;  %v8955_v43 = vld [vmem:[%s11976_s1 + $0x620] sm:$0xff]  }
 0x119   : > { %8612 = vmatpush3.bf16.msra.mxu1 %v10324_v34  ;;  %3527 = vmatprep.mubr.bf16.mxu1 %v792_v36 }
 0x11a   : > { %v10372_v38 = vadd.f32 %v7529_v55, %v2658_v61  ;;  %v7478_v41 = vpop.f32.mrb[16].mxu0  ;;  %8605 = vmatprep.subr.bf16.mxu1 %v8952_v44  ;;  %8521 = vmatpush3.bf16.msra.mxu0 %v10324_v34 }
 0x11b   : > { %v7530_v22 = vpop.f32.mrb[16].mxu1  ;;  %v7479_v16 = vpop.f32.mrb[17].mxu0  ;;  %8522 = vmatprep.subr.bf16.mxu0 %v8952_v44 }
 0x11c   : > { %v7480_v52 = vadd.f32 %v7479_v16, %v7478_v41  ;;  %v7531_v54 = vpop.f32.mrb[17].mxu1  ;;  %v7481_v36 = vpop.f32.mrb[18].mxu0  ;;  %v714_v41 = vld [vmem:[%s9356_s17 + $0x68] sm:$0xff] }
 0x11d   : > { %v7532_v10 = vadd.f32 %v7531_v54, %v7530_v22  ;;  %v7533_v3 = vpop.f32.mrb[18].mxu1  ;;  %v7482_v25 = vpop.f32.mrb[19].mxu0  ;;  %8613 = vmatpush3.bf16.msra.mxu1 %v8952_v44  ;;  %v740_v22 = vld [vmem:[%s9356_s17 + $0x79] sm:$0xff] }
 0x11e   : > { %v2663_v34 = vadd.f32 %v7480_v52, %v10268_v62  ;;  %v7483_v18 = vadd.f32 %v7482_v25, %v7481_v36  ;;  %v7534_v33 = vpop.f32.mrb[19].mxu1  ;;  %8606 = vmatprep.subr.bf16.mxu1 %v8953_v30  ;;  %8523 = vmatpush3.bf16.msra.mxu0 %v8952_v44  ;;  %v788_v52 = vld [vmem:[%s9356_s17 + $0x7b] sm:$0xff] }
 0x11f   : > { %v7535_v20 = vadd.f32 %v7534_v33, %v7533_v3  ;;  %3447 = vmatmul.mubr.bf16.gmra.mrb[124].mxu0 %v720_v42  ;;  %8524 = vmatprep.subr.bf16.mxu0 %v8953_v30  ;;  %v795_v3 = vpack.c.bf16 %v788_v52, %v10122_v13  ;;  %v8958_v33 = vld [vmem:[%s11976_s1 + $0x638] sm:$0xff]  }
 0x120   : > { %v10384_v32 = vadd.f32 %v7532_v10, %v2663_v34  ;;  %v2666_v0 = vadd.f32 %v7483_v18, %v10268_v62  ;;  %3528 = vmatmul.mubr.bf16.gmra.mrb[124].mxu1 %v768_v60  ;;  %3454 = vmatprep.mubr.bf16.mxu0 %v745_v7  ;;  %v808_v52 = vld [vmem:[%s9356_s17 + $0x5c] sm:$0xff] }
 0x121   : > { %8614 = vmatpush3.bf16.msra.mxu1 %v8953_v30  ;;  %3535 = vmatprep.mubr.bf16.mxu1 %v793_v49  ;;  %v746_v49 = vpack.c.bf16 %v738_v14, %v737_v35  ;;  %v741_v35 = vld [vmem:[%s9356_s17 + $0x81] sm:$0xff]  ;;  %v742_v14 = vld [vmem:[%s9356_s17 + $0x89] sm:$0xff] }
 0x122   : > { %v10395_v15 = vadd.f32 %v7535_v20, %v2666_v0  ;;  %v7484_v29 = vpop.f32.mrb[20].mxu0  ;;  %8607 = vmatprep.subr.bf16.mxu1 %v8954_v56  ;;  %8525 = vmatpush3.bf16.msra.mxu0 %v8953_v30  ;;  %v739_v30 = vld [vmem:[%s9356_s17 + $0x71] sm:$0xff]  ;;  %v764_v0 = vld [vmem:[%s9356_s17 + $0x7a] sm:$0xff] }
 0x123   : > { %v7536_v28 = vpop.f32.mrb[20].mxu1  ;;  %v7485_v9 = vpop.f32.mrb[21].mxu0  ;;  %8526 = vmatprep.subr.bf16.mxu0 %v8954_v56 }
 0x124   : > { %v7486_v60 = vadd.f32 %v7485_v9, %v7484_v29  ;;  %v7537_v19 = vpop.f32.mrb[21].mxu1  ;;  %v7487_v45 = vpop.f32.mrb[22].mxu0  ;;  %v790_v9 = vld [vmem:[%s9356_s17 + $0x8b] sm:$0xff] }
 0x125   : > { %v7538_v11 = vadd.f32 %v7537_v19, %v7536_v28  ;;  %v7539_v26 = vpop.f32.mrb[22].mxu1  ;;  %v7488_v40 = vpop.f32.mrb[23].mxu0  ;;  %8615 = vmatpush3.bf16.msra.mxu1 %v8954_v56  ;;  %v789_v28 = vld [vmem:[%s9356_s17 + $0x83] sm:$0xff]  ;;  %v771_v19 = vpack.c.bf16 %v764_v0, %v10144_v59  ;;  %v810_v0 = vld [vmem:[%s9356_s17 + $0x6c] sm:$0xff] }
 0x126   : > { %v2671_v5 = vadd.f32 %v7486_v60, %v10268_v62  ;;  %v7489_v44 = vadd.f32 %v7488_v40, %v7487_v45  ;;  %v7540_v55 = vpop.f32.mrb[23].mxu1  ;;  %8608 = vmatprep.subr.bf16.mxu1 %v8955_v43  ;;  %8527 = vmatpush3.bf16.msra.mxu0 %v8954_v56  ;;  %v748_v45 = vpack.c.bf16 %v742_v14, %v741_v35  ;;  %v811_v14 = vld [vmem:[%s9356_s17 + $0x74] sm:$0xff] }
 0x127   : > { %v7541_v21 = vadd.f32 %v7540_v55, %v7539_v26  ;;  %3455 = vmatmul.mubr.bf16.gmra.mrb[128].mxu0 %v721_v1  ;;  %8528 = vmatprep.subr.bf16.mxu0 %v8955_v43  ;;  %v796_v40 = vpack.c.bf16 %v790_v9, %v789_v28 }
 0x128   : > { %v10406_v61 = vadd.f32 %v7538_v11, %v2671_v5  ;;  %v2674_v63 = vadd.f32 %v7489_v44, %v10268_v62  ;;  %3536 = vmatmul.mubr.bf16.gmra.mrb[128].mxu1 %v769_v53  ;;  %3462 = vmatprep.mubr.bf16.mxu0 %v746_v49  ;;  %v722_v62 = vpack.c.bf16 %v714_v41, %v713_v24  ;;  %v766_v24 = vld [vmem:[%s9356_s17 + $0x8a] sm:$0xff]  ;;  %v803_v41 = vld [vmem:[%s9356_s17 + $0x34] sm:$0xff] }
 0x129   : > { %3543 = vmatprep.mubr.bf16.mxu1 %v794_v27  ;;  %8616 = vmatpush3.bf16.msra.mxu1 %v8955_v43  ;;  %v747_v27 = vpack.c.bf16 %v740_v22, %v739_v30  ;;  %v804_v30 = vld [vmem:[%s9356_s17 + $0x3c] sm:$0xff] }
 0x12a   : > { %v10419_v16 = vadd.f32 %v7541_v21, %v2674_v63  ;;  %v7558_v42 = vpop.f32.mrb[24].mxu0  ;;  %8609 = vmatprep.subr.bf16.mxu1 %v8956_v6  ;;  %8529 = vmatpush3.bf16.msra.mxu0 %v8955_v43  ;;  %v718_v21 = vld [vmem:[%s9356_s17 + $0x88] sm:$0xff] }
 0x12b   : > { %v7610_v2 = vpop.f32.mrb[24].mxu1  ;;  %v7559_v53 = vpop.f32.mrb[25].mxu0  ;;  %8530 = vmatprep.subr.bf16.mxu0 %v8956_v6  ;;  %v765_v63 = vld [vmem:[%s9356_s17 + $0x82] sm:$0xff] }
 0x12c   : > { %v7560_v54 = vadd.f32 %v7559_v53, %v7558_v42  ;;  %v7611_v4 = vpop.f32.mrb[25].mxu1  ;;  %v7561_v39 = vpop.f32.mrb[26].mxu0  ;;  %v807_v42 = vld [vmem:[%s9356_s17 + $0x54] sm:$0xff]  ;;  %v724_v53 = vpack.c.bf16 %v718_v21, %v10311_v46 }
 0x12d   : > { %v7612_v36 = vadd.f32 %v7611_v4, %v7610_v2  ;;  %v7613_v7 = vpop.f32.mrb[26].mxu1  ;;  %v7562_v10 = vpop.f32.mrb[27].mxu0  ;;  %8617 = vmatpush3.bf16.msra.mxu1 %v8956_v6  ;;  %v772_v4 = vpack.c.bf16 %v766_v24, %v765_v63 }
 0x12e   : > { %v2793_v25 = vadd.f32 %v7560_v54, %v10300_v17  ;;  %v7563_v34 = vadd.f32 %v7562_v10, %v7561_v39  ;;  %v7614_v18 = vpop.f32.mrb[27].mxu1  ;;  %8610 = vmatprep.subr.bf16.mxu1 %v8957_v47  ;;  %8531 = vmatpush3.bf16.msra.mxu0 %v8956_v6  ;;  %v715_v17 = vld [vmem:[%s9356_s17 + $0x70] sm:$0xff]  ;;  %v815_v39 = vpack.c.bf16 %v804_v30, %v803_v41 }
 0x12f   : > { %v7615_v56 = vadd.f32 %v7614_v18, %v7613_v7  ;;  %3463 = vmatmul.mubr.bf16.gmra.mrb[132].mxu0 %v722_v62  ;;  %8532 = vmatprep.subr.bf16.mxu0 %v8957_v47  ;;  %v723_v60 = vpack.c.bf16 %v10307_v12, %v715_v17  ;;  %v817_v10 = vpack.c.bf16 %v808_v52, %v807_v42  ;;  %v809_v17 = vld [vmem:[%s9356_s17 + $0x64] sm:$0xff] }
 0x130   : > { %v10430_v13 = vadd.f32 %v7612_v36, %v2793_v25  ;;  %v2796_v20 = vadd.f32 %v7563_v34, %v10319_v51  ;;  %3544 = vmatmul.mubr.bf16.gmra.mrb[132].mxu1 %v770_v37  ;;  %3470 = vmatprep.mubr.bf16.mxu0 %v747_v27 }
 0x131   : > { %3551 = vmatprep.mubr.bf16.mxu1 %v795_v3  ;;  %8618 = vmatpush3.bf16.msra.mxu1 %v8957_v47 }
 0x132   : > { %v10440_v29 = vadd.f32 %v7615_v56, %v2796_v20  ;;  %v7564_v43 = vpop.f32.mrb[28].mxu0  ;;  %8533 = vmatpush3.bf16.msra.mxu0 %v8957_v47  ;;  %8611 = vmatprep.subr.bf16.mxu1 %v8958_v33  ;;  %v805_v56 = vld [vmem:[%s9356_s17 + $0x44] sm:$0xff]  ;;  %v806_v20 = vld [vmem:[%s9356_s17 + $0x4c] sm:$0xff] }
 0x133   : > { %v7616_v1 = vpop.f32.mrb[28].mxu1  ;;  %v7565_v51 = vpop.f32.mrb[29].mxu0  ;;  %8534 = vmatprep.subr.bf16.mxu0 %v8958_v33 }
 0x134   : > { %v7566_v23 = vadd.f32 %v7565_v51, %v7564_v43  ;;  %v7617_v31 = vpop.f32.mrb[29].mxu1  ;;  %v7567_v37 = vpop.f32.mrb[30].mxu0  ;;  %v812_v43 = vld [vmem:[%s9356_s17 + $0x7c] sm:$0xff] }
 0x135   : > { %v7618_v49 = vadd.f32 %v7617_v31, %v7616_v1  ;;  %v7619_v11 = vpop.f32.mrb[30].mxu1  ;;  %v7568_v26 = vpop.f32.mrb[31].mxu0  ;;  %8619 = vmatpush3.bf16.msra.mxu1 %v8958_v33  ;;  %v816_v1 = vpack.c.bf16 %v806_v20, %v805_v56 }
 0x136   : > { %v2801_v5 = vadd.f32 %v7566_v23, %v10334_v50  ;;  %v7569_v12 = vadd.f32 %v7568_v26, %v7567_v37  ;;  %v7620_v44 = vpop.f32.mrb[31].mxu1  ;;  %8535 = vmatpush3.bf16.msra.mxu0 %v8958_v33 }
 0x137   : > { %v7621_v55 = vadd.f32 %v7620_v44, %v7619_v11  ;;  %3471 = vmatmul.mubr.bf16.gmra.mrb[136].mxu0 %v723_v60  ;;  %v813_v44 = vld [vmem:[%s9356_s17 + $0x84] sm:$0xff] }
 0x138   : > { %v10447_v59 = vadd.f32 %v7618_v49, %v2801_v5  ;;  %v2804_v6 = vadd.f32 %v7569_v12, %v10341_v48  ;;  %3552 = vmatmul.mubr.bf16.gmra.mrb[136].mxu1 %v771_v19  ;;  %3478 = vmatprep.mubr.bf16.mxu0 %v748_v45  ;;  %v819_v45 = vpack.c.bf16 %v812_v43, %v811_v14 }
 0x139   : > { %3559 = vmatprep.mubr.bf16.mxu1 %v796_v40 }
 0x13a   : > { %v10455_v50 = vadd.f32 %v7621_v55, %v2804_v6  ;;  %v7570_v22 = vpop.f32.mrb[32].mxu0  ;;  %v814_v55 = vld [vmem:[%s9356_s17 + $0x8c] sm:$0xff] }
 0x13b   : > { %v7622_v47 = vpop.f32.mrb[32].mxu1  ;;  %v7571_v2 = vpop.f32.mrb[33].mxu0 }
 0x13c   : > { %v7572_v62 = vadd.f32 %v7571_v2, %v7570_v22  ;;  %v7623_v54 = vpop.f32.mrb[33].mxu1  ;;  %v7573_v48 = vpop.f32.mrb[34].mxu0  ;;  %v820_v22 = vpack.c.bf16 %v814_v55, %v813_v44 }
 0x13d   : > { %v7624_v27 = vadd.f32 %v7623_v54, %v7622_v47  ;;  %v7625_v36 = vpop.f32.mrb[34].mxu1  ;;  %v7574_v7 = vpop.f32.mrb[35].mxu0 }
 0x13e   : > { %v2809_v3 = vadd.f32 %v7572_v62, %v10344_v58  ;;  %v7575_v25 = vadd.f32 %v7574_v7, %v7573_v48  ;;  %v7626_v34 = vpop.f32.mrb[35].mxu1 }
 0x13f   : > { %v7627_v46 = vadd.f32 %v7626_v34, %v7625_v36  ;;  %3479 = vmatmul.mubr.bf16.gmra.mrb[140].mxu0 %v724_v53 }
 0x140   : > { %v10461_v18 = vadd.f32 %v7624_v27, %v2809_v3  ;;  %v2812_v33 = vadd.f32 %v7575_v25, %v10352_v8  ;;  %3560 = vmatmul.mubr.bf16.gmra.mrb[140].mxu1 %v772_v4  ;;  %8536 = vmatprep.mubr.bf16.mxu0 %v815_v39  ;;  %v818_v8 = vpack.c.bf16 %v810_v0, %v809_v17 }
 0x141   : > { %8540 = vmatprep.mubr.bf16.mxu1 %v817_v10 }
 0x142   : > { %v10468_v35 = vadd.f32 %v7627_v46, %v2812_v33  ;;  %v7576_v58 = vpop.f32.mrb[36].mxu0 }
 0x143   : > { %v7628_v28 = vpop.f32.mrb[36].mxu1  ;;  %v7577_v9 = vpop.f32.mrb[37].mxu0 }
 0x144   : > { %v7578_v51 = vadd.f32 %v7577_v9, %v7576_v58  ;;  %v7629_v60 = vpop.f32.mrb[37].mxu1  ;;  %v7579_v23 = vpop.f32.mrb[38].mxu0 }
 0x145   : > { %v7630_v31 = vadd.f32 %v7629_v60, %v7628_v28  ;;  %v7631_v37 = vpop.f32.mrb[38].mxu1  ;;  %v7580_v19 = vpop.f32.mrb[39].mxu0 }
 0x146   : > { %v2817_v49 = vadd.f32 %v7578_v51, %v10360_v57  ;;  %v7581_v11 = vadd.f32 %v7580_v19, %v7579_v23  ;;  %v7632_v26 = vpop.f32.mrb[39].mxu1 }
 0x147   : > { %v7633_v40 = vadd.f32 %v7632_v26, %v7631_v37  ;;  %8537 = vmatmul.mubr.bf16.vlgmr.msra.gmra.mrb[144].mxu0 %v816_v1 }
 0x148   : > { %v10473_v5 = vadd.f32 %v7630_v31, %v2817_v49  ;;  %v2820_v12 = vadd.f32 %v7581_v11, %v10372_v38  ;;  %8541 = vmatmul.mubr.bf16.vlgmr.msra.gmra.mrb[144].mxu1 %v818_v8 }
 0x149   : > { %8544 = vmatprep.mubr.bf16.mxu1 %v819_v45 }
 0x14a   : > { %v10478_v6 = vadd.f32 %v7633_v40, %v2820_v12  ;;  %v7582_v21 = vpop.f32.mrb[40].mxu0 }
 0x14b   : > { %v7634_v63 = vpop.f32.mrb[40].mxu1  ;;  %v7583_v24 = vpop.f32.mrb[41].mxu0 }
 0x14c   : > { %v7584_v41 = vadd.f32 %v7583_v24, %v7582_v21  ;;  %v7635_v30 = vpop.f32.mrb[41].mxu1  ;;  %v7585_v57 = vpop.f32.mrb[42].mxu0 }
 0x14d   : > { %v7636_v42 = vadd.f32 %v7635_v30, %v7634_v63  ;;  %v7637_v52 = vpop.f32.mrb[42].mxu1  ;;  %v7586_v47 = vpop.f32.mrb[43].mxu0 }
 0x14e   : > { %v2825_v2 = vadd.f32 %v7584_v41, %v10384_v32  ;;  %v7587_v53 = vadd.f32 %v7586_v47, %v7585_v57  ;;  %v7638_v38 = vpop.f32.mrb[43].mxu1 }
 0x14f   : > { %v7639_v62 = vadd.f32 %v7638_v38, %v7637_v52 }
 0x150   : > { %v10481_v54 = vadd.f32 %v7636_v42, %v2825_v2  ;;  %v2828_v48 = vadd.f32 %v7587_v53, %v10395_v15  ;;  %8545 = vmatmul.mubr.bf16.gmra.mrb[148].mxu1 %v820_v22 }
 0x152   : > { %v10484_v4 = vadd.f32 %v7639_v62, %v2828_v48  ;;  %v7588_v39 = vpop.f32.mrb[44].mxu0 }
 0x153   : > { %v7640_v27 = vpop.f32.mrb[44].mxu1  ;;  %v7589_v36 = vpop.f32.mrb[45].mxu0 }
 0x154   : > { %v7590_v7 = vadd.f32 %v7589_v36, %v7588_v39  ;;  %v7641_v10 = vpop.f32.mrb[45].mxu1  ;;  %v7591_v3 = vpop.f32.mrb[46].mxu0 }
 0x155   : > { %v7642_v25 = vadd.f32 %v7641_v10, %v7640_v27  ;;  %v7643_v34 = vpop.f32.mrb[46].mxu1  ;;  %v7592_v46 = vpop.f32.mrb[47].mxu0 }
 0x156   : > { %v2833_v32 = vadd.f32 %v7590_v7, %v10406_v61  ;;  %v7593_v33 = vadd.f32 %v7592_v46, %v7591_v3  ;;  %v7644_v56 = vpop.f32.mrb[47].mxu1 }
 0x157   : > { %v7645_v20 = vadd.f32 %v7644_v56, %v7643_v34 }
 0x158   : > { %v10487_v17 = vadd.f32 %v7642_v25, %v2833_v32  ;;  %v2836_v15 = vadd.f32 %v7593_v33, %v10419_v16 }
 0x15a   : > { %v10490_v0 = vadd.f32 %v7645_v20, %v2836_v15  ;;  %v7662_v58 = vpop.f32.mrb[48].mxu0 }
 0x15b   : > { %v7714_v14 = vpop.f32.mrb[48].mxu1  ;;  %v7663_v43 = vpop.f32.mrb[49].mxu0 }
 0x15c   : > { %v7664_v28 = vadd.f32 %v7663_v43, %v7662_v58  ;;  %v7715_v9 = vpop.f32.mrb[49].mxu1  ;;  %v7665_v1 = vpop.f32.mrb[50].mxu0 }
 0x15d   : > { %v7716_v51 = vadd.f32 %v7715_v9, %v7714_v14  ;;  %v7717_v60 = vpop.f32.mrb[50].mxu1  ;;  %v7666_v23 = vpop.f32.mrb[51].mxu0 }
 0x15e   : > { %v2955_v61 = vadd.f32 %v7664_v28, %v10430_v13  ;;  %v7667_v8 = vadd.f32 %v7666_v23, %v7665_v1  ;;  %v7718_v31 = vpop.f32.mrb[51].mxu1 }
 0x15f   : > { %v7719_v37 = vadd.f32 %v7718_v31, %v7717_v60 }
 0x160   : > { %v10493_v19 = vadd.f32 %v7716_v51, %v2955_v61  ;;  %v2958_v16 = vadd.f32 %v7667_v8, %v10440_v29 }
 0x162   : > { %v10496_v45 = vadd.f32 %v7719_v37, %v2958_v16  ;;  %v7668_v49 = vpop.f32.mrb[52].mxu0 }
 0x163   : > { %v7720_v11 = vpop.f32.mrb[52].mxu1  ;;  %v7669_v26 = vpop.f32.mrb[53].mxu0 }
 0x164   : > { %v7670_v40 = vadd.f32 %v7669_v26, %v7668_v49  ;;  %v7721_v12 = vpop.f32.mrb[53].mxu1  ;;  %v7671_v44 = vpop.f32.mrb[54].mxu0 }
 0x165   : > { %v7722_v55 = vadd.f32 %v7721_v12, %v7720_v11  ;;  %v7723_v21 = vpop.f32.mrb[54].mxu1  ;;  %v7672_v63 = vpop.f32.mrb[55].mxu0 }
 0x166   : > { %v2963_v13 = vadd.f32 %v7670_v40, %v10447_v59  ;;  %v7673_v24 = vadd.f32 %v7672_v63, %v7671_v44  ;;  %v7724_v41 = vpop.f32.mrb[55].mxu1 }
 0x167   : > { %v7725_v30 = vadd.f32 %v7724_v41, %v7723_v21 }
 0x168   : > { %v10499_v57 = vadd.f32 %v7722_v55, %v2963_v13  ;;  %v2966_v29 = vadd.f32 %v7673_v24, %v10455_v50 }
 0x16a   : > { %v10502_v22 = vadd.f32 %v7725_v30, %v2966_v29  ;;  %v7674_v42 = vpop.f32.mrb[56].mxu0 }
 0x16b   : > { %v7726_v52 = vpop.f32.mrb[56].mxu1  ;;  %v7675_v47 = vpop.f32.mrb[57].mxu0 }
 0x16c   : > { %v7676_v2 = vadd.f32 %v7675_v47, %v7674_v42  ;;  %v7727_v53 = vpop.f32.mrb[57].mxu1  ;;  %v7677_v38 = vpop.f32.mrb[58].mxu0 }
 0x16d   : > { %v7728_v62 = vadd.f32 %v7727_v53, %v7726_v52  ;;  %v7729_v48 = vpop.f32.mrb[58].mxu1  ;;  %v7678_v39 = vpop.f32.mrb[59].mxu0 }
 0x16e   : > { %v2971_v59 = vadd.f32 %v7676_v2, %v10461_v18  ;;  %v7679_v27 = vadd.f32 %v7678_v39, %v7677_v38  ;;  %v7730_v36 = vpop.f32.mrb[59].mxu1 }
 0x16f   : > { %v7731_v7 = vadd.f32 %v7730_v36, %v7729_v48 }
 0x170   : > { %v10505_v10 = vadd.f32 %v7728_v62, %v2971_v59  ;;  %v2974_v50 = vadd.f32 %v7679_v27, %v10468_v35 }
 0x172   : > { %v10508_v3 = vadd.f32 %v7731_v7, %v2974_v50  ;;  %v7680_v25 = vpop.f32.mrb[60].mxu0 }
 0x173   : > { %v7732_v34 = vpop.f32.mrb[60].mxu1  ;;  %v7681_v46 = vpop.f32.mrb[61].mxu0 }
 0x174   : > { %v7682_v32 = vadd.f32 %v7681_v46, %v7680_v25  ;;  %v7733_v33 = vpop.f32.mrb[61].mxu1  ;;  %v7683_v56 = vpop.f32.mrb[62].mxu0 }
 0x175   : > { %v7734_v20 = vadd.f32 %v7733_v33, %v7732_v34  ;;  %v7735_v15 = vpop.f32.mrb[62].mxu1  ;;  %v7684_v58 = vpop.f32.mrb[63].mxu0 }
 0x176   : > { %v2979_v18 = vadd.f32 %v7682_v32, %v10473_v5  ;;  %v7685_v14 = vadd.f32 %v7684_v58, %v7683_v56  ;;  %v7736_v43 = vpop.f32.mrb[63].mxu1 }
 0x177   : > { %v7737_v28 = vadd.f32 %v7736_v43, %v7735_v15 }
 0x178   : > { %v10511_v9 = vadd.f32 %v7734_v20, %v2979_v18  ;;  %v2982_v35 = vadd.f32 %v7685_v14, %v10478_v6 }
 0x17a   : > { %v10514_v1 = vadd.f32 %v7737_v28, %v2982_v35  ;;  %v7686_v51 = vpop.f32.mrb[64].mxu0 }
 0x17b   : > { %v7738_v60 = vpop.f32.mrb[64].mxu1  ;;  %v7687_v23 = vpop.f32.mrb[65].mxu0 }
 0x17c   : > { %v7688_v61 = vadd.f32 %v7687_v23, %v7686_v51  ;;  %v7739_v8 = vpop.f32.mrb[65].mxu1  ;;  %v7689_v31 = vpop.f32.mrb[66].mxu0 }
 0x17d   : > { %v7740_v37 = vadd.f32 %v7739_v8, %v7738_v60  ;;  %v7741_v16 = vpop.f32.mrb[66].mxu1  ;;  %v7690_v49 = vpop.f32.mrb[67].mxu0 }
 0x17e   : > { %v2987_v5 = vadd.f32 %v7688_v61, %v10481_v54  ;;  %v7691_v11 = vadd.f32 %v7690_v49, %v7689_v31  ;;  %v7742_v26 = vpop.f32.mrb[67].mxu1  ;;  %v3673_v31 = vlaneseq }
 0x17f   : > { %v7743_v40 = vadd.f32 %v7742_v26, %v7741_v16 }
 0x180   : > { %v10517_v12 = vadd.f32 %v7740_v37, %v2987_v5  ;;  %v2990_v6 = vadd.f32 %v7691_v11, %v10484_v4  ;;  %v10540_v49 = vshrl.u32 %v3673_v31, 7 }
 0x182   : > { %v10520_v44 = vadd.f32 %v7743_v40, %v2990_v6  ;;  %v7692_v55 = vpop.f32.mrb[68].mxu0 }
 0x183   : > { %v7744_v21 = vpop.f32.mrb[68].mxu1  ;;  %v7693_v63 = vpop.f32.mrb[69].mxu0 }
 0x184   : > { %v7694_v13 = vadd.f32 %v7693_v63, %v7692_v55  ;;  %v7745_v24 = vpop.f32.mrb[69].mxu1  ;;  %v7695_v41 = vpop.f32.mrb[70].mxu0  ;;  %v3675_v63 = vadd.s32 8, %v10540_v49 }
 0x185   : > { %v7746_v30 = vadd.f32 %v7745_v24, %v7744_v21  ;;  %v7747_v29 = vpop.f32.mrb[70].mxu1  ;;  %v7696_v42 = vpop.f32.mrb[71].mxu0 }
 0x186   : > { %v2995_v54 = vadd.f32 %v7694_v13, %v10487_v17  ;;  %v7697_v52 = vadd.f32 %v7696_v42, %v7695_v41  ;;  %v7748_v47 = vpop.f32.mrb[71].mxu1  ;;  %v3676_v13 = vadd.s32 16, %v10540_v49  ;;  %v10549_v42 = vadd.s32 32, %v10540_v49 }
 0x187   : > { %v7749_v2 = vadd.f32 %v7748_v47, %v7747_v29 }
 0x188   : > { %v10523_v53 = vadd.f32 %v7746_v30, %v2995_v54  ;;  %v2998_v4 = vadd.f32 %v7697_v52, %v10490_v0  ;;  %v10546_v30 = vadd.s32 24, %v10540_v49  ;;  %v10552_v54 = vadd.s32 40, %v10540_v49 }
 0x18a   : > { %v10526_v38 = vadd.f32 %v7749_v2, %v2998_v4  ;;  %v7766_v62 = vpop.f32.mrb[72].mxu0  ;;  %v10558_v2 = vmul.u32.u64.low 2863311531, %v10540_v49  ;;  %v10559_v4 = vmul.u32.u64.high 2863311531, %v10540_v49, %v10558_v2 }
 0x18b   : > { %v7818_v48 = vpop.f32.mrb[72].mxu1  ;;  %v7767_v39 = vpop.f32.mrb[73].mxu0 }
 0x18c   : > { %v7768_v59 = vadd.f32 %v7767_v39, %v7766_v62  ;;  %v7819_v27 = vpop.f32.mrb[73].mxu1  ;;  %v7769_v36 = vpop.f32.mrb[74].mxu0 }
 0x18d   : > { %v7820_v7 = vadd.f32 %v7819_v27, %v7818_v48  ;;  %v7821_v50 = vpop.f32.mrb[74].mxu1  ;;  %v7770_v25 = vpop.f32.mrb[75].mxu0  ;;  %v10564_v48 = vmul.u32.u64.low 2863311531, %v3676_v13  ;;  %v10565_v39 = vmul.u32.u64.high 2863311531, %v3676_v13, %v10564_v48 }
 0x18e   : > { %v3117_v17 = vadd.f32 %v7768_v59, %v10493_v19  ;;  %v7771_v34 = vadd.f32 %v7770_v25, %v7769_v36  ;;  %v7822_v46 = vpop.f32.mrb[75].mxu1  ;;  %v10570_v36 = vadd.s32 48, %v10540_v49 }
 0x18f   : > { %v7823_v32 = vadd.f32 %v7822_v46, %v7821_v50 }
 0x190   : > { %v10529_v33 = vadd.f32 %v7820_v7, %v3117_v17  ;;  %v3120_v0 = vadd.f32 %v7771_v34, %v10496_v45  ;;  %v10573_v7 = vmul.u32.u64.low 2863311531, %v10546_v30  ;;  %v10574_v50 = vmul.u32.u64.high 2863311531, %v10546_v30, %v10573_v7 }
 0x191   : > { %v10577_v17 = vadd.s32 56, %v10540_v49  ;;  %v10580_v34 = vadd.s32 64, %v10540_v49 }
 0x192   : > { %v10532_v56 = vadd.f32 %v7823_v32, %v3120_v0  ;;  %v7772_v20 = vpop.f32.mrb[76].mxu0  ;;  %v10583_v46 = vmul.u32.u64.low 2863311531, %v10549_v42  ;;  %v10584_v32 = vmul.u32.u64.high 2863311531, %v10549_v42, %v10583_v46 }
 0x193   : > { %v7824_v15 = vpop.f32.mrb[76].mxu1  ;;  %v7773_v58 = vpop.f32.mrb[77].mxu0 }
 0x194   : > { %v7774_v18 = vadd.f32 %v7773_v58, %v7772_v20  ;;  %v7825_v14 = vpop.f32.mrb[77].mxu1  ;;  %v7775_v43 = vpop.f32.mrb[78].mxu0  ;;  %v3692_v58 = vshrl.u32 %v10559_v4, 3 }
 0x195   : > { %v7826_v28 = vadd.f32 %v7825_v14, %v7824_v15  ;;  %v7827_v35 = vpop.f32.mrb[78].mxu1  ;;  %v7776_v51 = vpop.f32.mrb[79].mxu0 }
 0x196   : > { %v3125_v19 = vadd.f32 %v7774_v18, %v10499_v57  ;;  %v7777_v60 = vadd.f32 %v7776_v51, %v7775_v43  ;;  %v7828_v23 = vpop.f32.mrb[79].mxu1  ;;  %v10588_v18 = vmul.u32.u64.low 2863311531, %v10552_v54  ;;  %v10589_v14 = vmul.u32.u64.high 2863311531, %v10552_v54, %v10588_v18 }
 0x197   : > { %v7829_v61 = vadd.f32 %v7828_v23, %v7827_v35  ;;  %v10592_v51 = vadd.s32 72, %v10540_v49  ;;  %v3693_v31 = vmul.u32 12, %v3692_v58 }
 0x198   : > { %v10535_v8 = vadd.f32 %v7826_v28, %v3125_v19  ;;  %v3128_v45 = vadd.f32 %v7777_v60, %v10502_v22  ;;  %v3714_v60 = vshrl.u32 %v10565_v39, 3 }
 0x19a   : > { %v10538_v37 = vadd.f32 %v7829_v61, %v3128_v45  ;;  %v7778_v16 = vpop.f32.mrb[80].mxu0 }
 0x19b   : > { %v7830_v5 = vpop.f32.mrb[80].mxu1  ;;  %v7779_v11 = vpop.f32.mrb[81].mxu0 }
 0x19c   : > { %v7780_v26 = vadd.f32 %v7779_v11, %v7778_v16  ;;  %v7831_v40 = vpop.f32.mrb[81].mxu1  ;;  %v7781_v6 = vpop.f32.mrb[82].mxu0  ;;  %v3725_v16 = vshrl.u32 %v10574_v50, 3 }
 0x19d   : > { %v7832_v55 = vadd.f32 %v7831_v40, %v7830_v5  ;;  %v7833_v57 = vpop.f32.mrb[82].mxu1  ;;  %v7782_v21 = vpop.f32.mrb[83].mxu0  ;;  %v3736_v40 = vshrl.u32 %v10584_v32, 3 }
 0x19e   : > { %v3133_v22 = vadd.f32 %v7780_v26, %v10505_v10  ;;  %v7783_v24 = vadd.f32 %v7782_v21, %v7781_v6  ;;  %v7834_v41 = vpop.f32.mrb[83].mxu1  ;;  %v10561_v10 = vmul.u32.u64.low 2863311531, %v3675_v63  ;;  %v10562_v62 = vmul.u32.u64.high 2863311531, %v3675_v63, %v10561_v10 }
 0x19f   : > { %v7835_v29 = vadd.f32 %v7834_v41, %v7833_v57  ;;  %v3715_v26 = vmul.u32 12, %v3714_v60  ;;  %v10603_v57 = vadd.s32 80, %v10540_v49  ;;  %v3726_v21 = vmul.u32 12, %v3725_v16 }
 0x1a0   : > { %v10554_v52 = vadd.f32 %v7832_v55, %v3133_v22  ;;  %v3136_v47 = vadd.f32 %v7783_v24, %v10508_v3  ;;  %v3703_v19 = vshrl.u32 %v10562_v62, 3  ;;  %v10609_v22 = vsub.s32 %v10540_v49, %v3693_v31 }
 0x1a1   : > { %v3737_v24 = vmul.u32 12, %v3736_v40  ;;  %v3747_v41 = vshrl.u32 %v10589_v14, 3  ;;  %v10620_v48 = vsub.s32 %v3676_v13, %v3715_v26 }
 0x1a2   : > { %v10567_v59 = vadd.f32 %v7835_v29, %v3136_v47  ;;  %v7784_v27 = vpop.f32.mrb[84].mxu0  ;;  %v3704_v11 = vmul.u32 12, %v3703_v19  ;;  %vm3818_vm0 = vcmp.ne.s32.totalorder %v10609_v22, 0  ;;  %vm3830_vm10 = vcmp.lt.s32.totalorder %v10609_v22, 0 }
 0x1a3   : > { %v7836_v3 = vpop.f32.mrb[84].mxu1  ;;  %v7785_v25 = vpop.f32.mrb[85].mxu0  ;;  %v3748_v39 = vmul.u32 12, %v3747_v41  ;;  %v10634_v13 = vsub.s32 %v10549_v42, %v3737_v24  ;;  %v10648_v42 = vmul.u32.u64.low 2863311531, %v10603_v57  ;;  %v10649_v60 = vmul.u32.u64.high 2863311531, %v10603_v57, %v10648_v42  ;;  %vm10701_vm14 = vmand %vm3830_vm10, %vm3818_vm0 }
 0x1a4   : > { %v7786_v0 = vadd.f32 %v7785_v25, %v7784_v27  ;;  %v7837_v20 = vpop.f32.mrb[85].mxu1  ;;  %v7787_v15 = vpop.f32.mrb[86].mxu0  ;;  %v10614_v2 = vsub.s32 %v3675_v63, %v3704_v11  ;;  %v10627_v25 = vsub.s32 %v10546_v30, %v3726_v21  ;;  %vm3820_vm2 = vcmp.ne.s32.totalorder %v10620_v48, 0 }
 0x1a5   : > { %v7838_v43 = vadd.f32 %v7837_v20, %v7836_v3  ;;  %v7839_v28 = vpop.f32.mrb[86].mxu1  ;;  %v7788_v35 = vpop.f32.mrb[87].mxu0  ;;  %v10630_v63 = vmul.u32.u64.low 2863311531, %v10580_v34  ;;  %v10631_v46 = vmul.u32.u64.high 2863311531, %v10580_v34, %v10630_v63  ;;  %v10642_v30 = vsub.s32 %v10552_v54, %v3748_v39 }
 0x1a6   : > { %v3141_v23 = vadd.f32 %v7786_v0, %v10511_v9  ;;  %v7789_v61 = vadd.f32 %v7788_v35, %v7787_v15  ;;  %v7840_v45 = vpop.f32.mrb[87].mxu1  ;;  %v10606_v9 = vadd.s32 88, %v10540_v49  ;;  %vm3819_vm1 = vcmp.ne.s32.totalorder %v10614_v2, 0 }
 0x1a7   : > { %v7841_v5 = vadd.f32 %v7840_v45, %v7839_v28  ;;  %v10623_v49 = vmul.u32.u64.low 2863311531, %v10577_v17  ;;  %v10624_v27 = vmul.u32.u64.high 2863311531, %v10577_v17, %v10623_v49  ;;  %v3780_v54 = vshrl.u32 %v10631_v46, 3 }
 0x1a8   : > { %v10599_v6 = vadd.f32 %v7838_v43, %v3141_v23  ;;  %v3144_v55 = vadd.f32 %v7789_v61, %v10514_v1  ;;  %v10617_v1 = vmul.u32.u64.low 2863311531, %v10570_v36  ;;  %v10618_v4 = vmul.u32.u64.high 2863311531, %v10570_v36, %v10617_v1 }
 0x1a9   : > { %v10637_v15 = vmul.u32.u64.low 2863311531, %v10592_v51  ;;  %v10638_v58 = vmul.u32.u64.high 2863311531, %v10592_v51, %v10637_v15  ;;  %v3769_v19 = vshrl.u32 %v10624_v27, 3  ;;  %vm3821_vm3 = vcmp.ne.s32.totalorder %v10627_v25, 0 }
 0x1aa   : > { %v10612_v29 = vadd.f32 %v7841_v5, %v3144_v55  ;;  %v7790_v47 = vpop.f32.mrb[88].mxu0  ;;  %v3758_v28 = vshrl.u32 %v10618_v4, 3  ;;  %v10658_v16 = vmul.u32.u64.low 2863311531, %v10606_v9  ;;  %v10659_v5 = vmul.u32.u64.high 2863311531, %v10606_v9, %v10658_v16 }
 0x1ab   : > { %v7842_v10 = vpop.f32.mrb[88].mxu1  ;;  %v7791_v62 = vpop.f32.mrb[89].mxu0  ;;  %v3770_v45 = vmul.u32 12, %v3769_v19  ;;  %v3791_v31 = vshrl.u32 %v10638_v58, 3  ;;  %v3781_v55 = vmul.u32 12, %v3780_v54  ;;  %vm3822_vm4 = vcmp.ne.s32.totalorder %v10634_v13, 0 }
 0x1ac   : > { %v7792_v7 = vadd.f32 %v7791_v62, %v7790_v47  ;;  %v7843_v50 = vpop.f32.mrb[89].mxu1  ;;  %v7793_v3 = vpop.f32.mrb[90].mxu0  ;;  %v3759_v61 = vmul.u32 12, %v3758_v28  ;;  %v3802_v47 = vshrl.u32 %v10649_v60, 3  ;;  %vm3831_vm12 = vcmp.lt.s32.totalorder %v10614_v2, 0 }
 0x1ad   : > { %v7844_v32 = vadd.f32 %v7843_v50, %v7842_v10  ;;  %v7845_v0 = vpop.f32.mrb[90].mxu1  ;;  %v7794_v20 = vpop.f32.mrb[91].mxu0  ;;  %v10668_v24 = vsub.s32 %v10577_v17, %v3770_v45  ;;  %v3792_v41 = vmul.u32 12, %v3791_v31  ;;  %v10673_v62 = vsub.s32 %v10580_v34, %v3781_v55  ;;  %vm10712_vm11 = vmand %vm3831_vm12, %vm3819_vm1 }
 0x1ae   : > { %v3149_v18 = vadd.f32 %v7792_v7, %v10517_v12  ;;  %v7795_v14 = vadd.f32 %v7794_v20, %v7793_v3  ;;  %v7846_v43 = vpop.f32.mrb[91].mxu1  ;;  %v10664_v40 = vsub.s32 %v10570_v36, %v3759_v61  ;;  %v3803_v27 = vmul.u32 12, %v3802_v47 }
 0x1af   : > { %v7847_v35 = vadd.f32 %v7846_v43, %v7845_v0  ;;  %v10678_v17 = vsub.s32 %v10592_v51, %v3792_v41  ;;  %v3813_v7 = vshrl.u32 %v10659_v5, 3  ;;  %vm3832_vm13 = vcmp.lt.s32.totalorder %v10620_v48, 0 }
 0x1b0   : > { %v10652_v23 = vadd.f32 %v7844_v32, %v3149_v18  ;;  %v3152_v12 = vadd.f32 %v7795_v14, %v10520_v44  ;;  %v10685_v46 = vsub.s32 %v10603_v57, %v3803_v27  ;;  %vm3833_vm15 = vcmp.lt.s32.totalorder %v10627_v25, 0  ;;  %vm10722_vm5 = vmand %vm3832_vm13, %vm3820_vm2 }
 0x1b1   : > { %v3814_v32 = vmul.u32 12, %v3813_v7  ;;  %vm3834_vm9 = vcmp.lt.s32.totalorder %v10634_v13, 0  ;;  %vm3835_vm8 = vcmp.lt.s32.totalorder %v10642_v30, 0  ;;  %vm3836_vm10 = vcmp.lt.s32.totalorder %v10664_v40, 0  ;;  %vm10733_vm6 = vmand %vm3833_vm15, %vm3821_vm3 }
 0x1b2   : > { %v10661_v11 = vadd.f32 %v7847_v35, %v3152_v12  ;;  %v7796_v26 = vpop.f32.mrb[92].mxu0  ;;  %vm3837_vm7 = vcmp.lt.s32.totalorder %v10668_v24, 0  ;;  %vm3839_vm1 = vcmp.lt.s32.totalorder %v10678_v17, 0  ;;  %vm3840_vm12 = vcmp.lt.s32.totalorder %v10685_v46, 0  ;;  %vm10741_vm2 = vmand %vm3834_vm9, %vm3822_vm4 }
 0x1b3   : > { %v7848_v44 = vpop.f32.mrb[92].mxu1  ;;  %v7797_v21 = vpop.f32.mrb[93].mxu0  ;;  %v3854_v61 = vadd.s32 12, %v10609_v22  ;;  %v3855_v54 = vadd.s32 12, %v10614_v2  ;;  %v3856_v45 = vadd.s32 12, %v10620_v48  ;;  %vm11993_vm3 = vcmp.ne.s32.totalorder %v10642_v30, 0 }
 0x1b4   : > { %v7798_v1 = vadd.f32 %v7797_v21, %v7796_v26  ;;  %v7849_v4 = vpop.f32.mrb[93].mxu1  ;;  %v7799_v10 = vpop.f32.mrb[94].mxu0  ;;  %vm10753_vm13 = vmand %vm3835_vm8, %vm11993_vm3  ;;  %v3857_v55 = vadd.s32 12, %v10627_v25  ;;  %vm11996_vm4 = vcmp.ne.s32.totalorder %v10664_v40, 0  ;;  %v3859_v41 = vadd.s32 12, %v10642_v30 }
 0x1b5   : > { %v7850_v36 = vadd.f32 %v7849_v4, %v7848_v44  ;;  %v7851_v39 = vpop.f32.mrb[94].mxu1  ;;  %v7800_v49 = vpop.f32.mrb[95].mxu0  ;;  %v3858_v44 = vadd.s32 12, %v10634_v13  ;;  %vm10763_vm9 = vmand %vm3836_vm10, %vm11996_vm4  ;;  %v3860_v47 = vadd.s32 12, %v10664_v40  ;;  %vm11999_vm8 = vcmp.ne.s32.totalorder %v10668_v24, 0 }
 0x1b6   : > { %v3157_v50 = vadd.f32 %v7798_v1, %v10523_v53  ;;  %v7801_v3 = vadd.f32 %v7800_v49, %v7799_v10  ;;  %v7852_v63 = vpop.f32.mrb[95].mxu1  ;;  %v10694_v53 = vsub.s32 %v10606_v9, %v3814_v32  ;;  %v3861_v1 = vadd.s32 12, %v10668_v24  ;;  %vm10777_vm15 = vmand %vm3837_vm7, %vm11999_vm8 }
 0x1b7   : > { %v7853_v34 = vadd.f32 %v7852_v63, %v7851_v39  ;;  %v3862_v39 = vadd.s32 12, %v10673_v62  ;;  %v3863_v49 = vadd.s32 12, %v10678_v17  ;;  %vm12002_vm10 = vcmp.ne.s32.totalorder %v10673_v62, 0 }
 0x1b8   : > { %v10688_v51 = vadd.f32 %v7850_v36, %v3157_v50  ;;  %v3160_v0 = vadd.f32 %v7801_v3, %v10526_v38  ;;  %vm3841_vm0 = vcmp.lt.s32.totalorder %v10694_v53, 0  ;;  %vm12003_vm3 = vcmp.lt.s32.totalorder %v10673_v62, 0 }
 0x1b9   : > { %vm10787_vm4 = vmand %vm12003_vm3, %vm12002_vm10  ;;  %v3865_v7 = vadd.s32 12, %v10694_v53  ;;  %v10796_v50 = vsel %vm10701_vm14, %v3854_v61, %v10609_v22  ;;  %v10801_v3 = vsel %vm10712_vm11, %v3855_v54, %v10614_v2  ;;  %vm12006_vm7 = vcmp.ne.s32.totalorder %v10678_v17, 0 }
 0x1ba   : > { %v10705_v38 = vadd.f32 %v7853_v34, %v3160_v0  ;;  %v7870_v20 = vpop.f32.mrb[96].mxu0  ;;  %vm10809_vm8 = vmand %vm3839_vm1, %vm12006_vm7  ;;  %v10816_v22 = vsel %vm10722_vm5, %v3856_v45, %v10620_v48  ;;  %v10821_v2 = vsel %vm10733_vm6, %v3857_v55, %v10627_v25  ;;  %v10826_v0 = vsel %vm10741_vm2, %v3858_v44, %v10634_v13 }
 0x1bb   : > { %v7922_v15 = vpop.f32.mrb[96].mxu1  ;;  %v7871_v58 = vpop.f32.mrb[97].mxu0  ;;  %vm12009_vm11 = vcmp.ne.s32.totalorder %v10685_v46, 0  ;;  %v10835_v48 = vsel %vm10753_vm13, %v3859_v41, %v10642_v30  ;;  %v10840_v25 = vsel %vm10763_vm9, %v3860_v47, %v10664_v40  ;;  %v10845_v13 = vsel %vm10777_vm15, %v3861_v1, %v10668_v24 }
 0x1bc   : > { %v7872_v14 = vadd.f32 %v7871_v58, %v7870_v20  ;;  %v7923_v43 = vpop.f32.mrb[97].mxu1  ;;  %v7873_v28 = vpop.f32.mrb[98].mxu0  ;;  %vm3852_vm14 = vmand %vm3840_vm12, %vm12009_vm11  ;;  %v10850_v9 = vsel %vm10787_vm4, %v3862_v39, %v10673_v62  ;;  %vm12010_vm5 = vcmp.ne.s32.totalorder %v10694_v53, 0  ;;  %v10859_v30 = vsel %vm10809_vm8, %v3863_v49, %v10678_v17 }
 0x1bd   : > { %v7924_v19 = vadd.f32 %v7923_v43, %v7922_v15  ;;  %v7925_v42 = vpop.f32.mrb[98].mxu1  ;;  %v7874_v60 = vpop.f32.mrb[99].mxu0  ;;  %vm3853_vm6 = vmand %vm3841_vm0, %vm12010_vm5  ;;  %vm3879_vm12 = vcmp.eq.s32.totalorder %v10801_v3, 0  ;;  %vm3880_vm0 = vcmp.eq.s32.totalorder %v10816_v22, 0  ;;  %vm3881_vm2 = vcmp.eq.s32.totalorder %v10821_v2, 0 }
 0x1be   : > { %v3279_v31 = vadd.f32 %v7872_v14, %v10529_v33  ;;  %v7875_v16 = vadd.f32 %v7874_v60, %v7873_v28  ;;  %v7926_v5 = vpop.f32.mrb[99].mxu1  ;;  %v10866_v43 = vsel %vm3853_vm6, %v3865_v7, %v10694_v53  ;;  %vm3892_vm5 = vcmp.eq.s32.totalorder %v10816_v22, 9 }
 0x1bf   : > { %v7927_v21 = vadd.f32 %v7926_v5, %v7925_v42  ;;  %vm3893_vm6 = vcmp.eq.s32.totalorder %v10821_v2, 9  ;;  %vm3894_vm10 = vcmp.eq.s32.totalorder %v10826_v0, 9  ;;  %vm3895_vm4 = vcmp.eq.s32.totalorder %v10835_v48, 9 }
 0x1c0   : > { %v10770_v4 = vadd.f32 %v7924_v19, %v3279_v31  ;;  %v3282_v10 = vadd.f32 %v7875_v16, %v10532_v56  ;;  %v3864_v56 = vadd.s32 12, %v10685_v46  ;;  %vm3897_vm8 = vcmp.eq.s32.totalorder %v10845_v13, 9 }
 0x1c2   : > { %v10803_v63 = vadd.f32 %v7927_v21, %v3282_v10  ;;  %v7876_v34 = vpop.f32.mrb[100].mxu0  ;;  %v10862_v40 = vsel %vm3852_vm14, %v3864_v56, %v10685_v46  ;;  %vm3891_vm14 = vcmp.eq.s32.totalorder %v10801_v3, 9 }
 0x1c3   : > { %v7928_v57 = vpop.f32.mrb[100].mxu1  ;;  %v7877_v20 = vpop.f32.mrb[101].mxu0 }
 0x1c4   : > { %v7878_v15 = vadd.f32 %v7877_v20, %v7876_v34  ;;  %v7929_v58 = vpop.f32.mrb[101].mxu1  ;;  %v7879_v18 = vpop.f32.mrb[102].mxu0 }
 0x1c5   : > { %v7930_v24 = vadd.f32 %v7929_v58, %v7928_v57  ;;  %v7931_v62 = vpop.f32.mrb[102].mxu1  ;;  %v7880_v14 = vpop.f32.mrb[103].mxu0 }
 0x1c6   : > { %v3287_v28 = vadd.f32 %v7878_v15, %v10535_v8  ;;  %v7881_v35 = vadd.f32 %v7880_v14, %v7879_v18  ;;  %v7932_v17 = vpop.f32.mrb[103].mxu1 }
 0x1c7   : > { %v7933_v46 = vadd.f32 %v7932_v17, %v7931_v62 }
 0x1c8   : > { %v10876_v53 = vadd.f32 %v7930_v24, %v3287_v28  ;;  %v3290_v19 = vadd.f32 %v7881_v35, %v10538_v37 }
 0x1ca   : > { %v10885_v8 = vadd.f32 %v7933_v46, %v3290_v19  ;;  %v7882_v42 = vpop.f32.mrb[104].mxu0 }
 0x1cb   : > { %v7934_v37 = vpop.f32.mrb[104].mxu1  ;;  %v7883_v60 = vpop.f32.mrb[105].mxu0 }
 0x1cc   : > { %v7884_v12 = vadd.f32 %v7883_v60, %v7882_v42  ;;  %v7935_v61 = vpop.f32.mrb[105].mxu1  ;;  %v7885_v54 = vpop.f32.mrb[106].mxu0 }
 0x1cd   : > { %v7936_v45 = vadd.f32 %v7935_v61, %v7934_v37  ;;  %v7937_v31 = vpop.f32.mrb[106].mxu1  ;;  %v7886_v16 = vpop.f32.mrb[107].mxu0 }
 0x1ce   : > { %v3295_v5 = vadd.f32 %v7884_v12, %v10554_v52  ;;  %v7887_v26 = vadd.f32 %v7886_v16, %v7885_v54  ;;  %v7938_v55 = vpop.f32.mrb[107].mxu1 }
 0x1cf   : > { %v7939_v44 = vadd.f32 %v7938_v55, %v7937_v31 }
 0x1d0   : > { %v10898_v21 = vadd.f32 %v7936_v45, %v3295_v5  ;;  %v3298_v33 = vadd.f32 %v7887_v26, %v10567_v59 }
 0x1d2   : > { %v10901_v41 = vadd.f32 %v7939_v44, %v3298_v33  ;;  %v7888_v47 = vpop.f32.mrb[108].mxu0 }
 0x1d3   : > { %v7940_v1 = vpop.f32.mrb[108].mxu1  ;;  %v7889_v10 = vpop.f32.mrb[109].mxu0 }
 0x1d4   : > { %v7890_v36 = vadd.f32 %v7889_v10, %v7888_v47  ;;  %v7941_v39 = vpop.f32.mrb[109].mxu1  ;;  %v7891_v49 = vpop.f32.mrb[110].mxu0 }
 0x1d5   : > { %v7942_v27 = vadd.f32 %v7941_v39, %v7940_v1  ;;  %v7943_v56 = vpop.f32.mrb[110].mxu1  ;;  %v7892_v7 = vpop.f32.mrb[111].mxu0 }
 0x1d6   : > { %v3303_v52 = vadd.f32 %v7890_v36, %v10599_v6  ;;  %v7893_v34 = vadd.f32 %v7892_v7, %v7891_v49  ;;  %v7944_v32 = vpop.f32.mrb[111].mxu1 }
 0x1d7   : > { %v7945_v57 = vadd.f32 %v7944_v32, %v7943_v56 }
 0x1d8   : > { %v10904_v20 = vadd.f32 %v7942_v27, %v3303_v52  ;;  %v3306_v59 = vadd.f32 %v7893_v34, %v10612_v29 }
 0x1da   : > { %v10907_v15 = vadd.f32 %v7945_v57, %v3306_v59  ;;  %v7894_v58 = vpop.f32.mrb[112].mxu0 }
 0x1db   : > { %v7946_v18 = vpop.f32.mrb[112].mxu1  ;;  %v7895_v24 = vpop.f32.mrb[113].mxu0 }
 0x1dc   : > { %v7896_v62 = vadd.f32 %v7895_v24, %v7894_v58  ;;  %v7947_v14 = vpop.f32.mrb[113].mxu1  ;;  %v7897_v28 = vpop.f32.mrb[114].mxu0 }
 0x1dd   : > { %v7948_v35 = vadd.f32 %v7947_v14, %v7946_v18  ;;  %v7949_v17 = vpop.f32.mrb[114].mxu1  ;;  %v7898_v46 = vpop.f32.mrb[115].mxu0 }
 0x1de   : > { %v3311_v6 = vadd.f32 %v7896_v62, %v10652_v23  ;;  %v7899_v19 = vadd.f32 %v7898_v46, %v7897_v28  ;;  %v7950_v42 = vpop.f32.mrb[115].mxu1 }
 0x1df   : > { %v7951_v37 = vadd.f32 %v7950_v42, %v7949_v17 }
 0x1e0   : > { %v10910_v60 = vadd.f32 %v7948_v35, %v3311_v6  ;;  %v3314_v29 = vadd.f32 %v7899_v19, %v10661_v11 }
 0x1e2   : > { %v10913_v12 = vadd.f32 %v7951_v37, %v3314_v29  ;;  %v7900_v61 = vpop.f32.mrb[116].mxu0 }
 0x1e3   : > { %v7952_v54 = vpop.f32.mrb[116].mxu1  ;;  %v7901_v45 = vpop.f32.mrb[117].mxu0 }
 0x1e4   : > { %v7902_v31 = vadd.f32 %v7901_v45, %v7900_v61  ;;  %v7953_v16 = vpop.f32.mrb[117].mxu1  ;;  %v7903_v5 = vpop.f32.mrb[118].mxu0 }
 0x1e5   : > { %v7954_v26 = vadd.f32 %v7953_v16, %v7952_v54  ;;  %v7955_v55 = vpop.f32.mrb[118].mxu1  ;;  %v7904_v44 = vpop.f32.mrb[119].mxu0 }
 0x1e6   : > { %v3319_v23 = vadd.f32 %v7902_v31, %v10688_v51  ;;  %v7905_v33 = vadd.f32 %v7904_v44, %v7903_v5  ;;  %v7956_v47 = vpop.f32.mrb[119].mxu1 }
 0x1e7   : > { %v7957_v1 = vadd.f32 %v7956_v47, %v7955_v55 }
 0x1e8   : > { %v10916_v10 = vadd.f32 %v7954_v26, %v3319_v23  ;;  %v3322_v11 = vadd.f32 %v7905_v33, %v10705_v38 }
 0x1ea   : > { %v10919_v36 = vadd.f32 %v7957_v1, %v3322_v11  ;;  %v7974_v39 = vpop.f32.mrb[120].mxu0 }
 0x1eb   : > { %v8026_v49 = vpop.f32.mrb[120].mxu1  ;;  %v7975_v27 = vpop.f32.mrb[121].mxu0 }
 0x1ec   : > { %v7976_v56 = vadd.f32 %v7975_v27, %v7974_v39  ;;  %v8027_v7 = vpop.f32.mrb[121].mxu1  ;;  %v7977_v52 = vpop.f32.mrb[122].mxu0 }
 0x1ed   : > { %v8028_v34 = vadd.f32 %v8027_v7, %v8026_v49  ;;  %v8029_v32 = vpop.f32.mrb[122].mxu1  ;;  %v7978_v57 = vpop.f32.mrb[123].mxu0 }
 0x1ee   : > { %v3441_v51 = vadd.f32 %v7976_v56, %v10770_v4  ;;  %v7979_v59 = vadd.f32 %v7978_v57, %v7977_v52  ;;  %v8030_v58 = vpop.f32.mrb[123].mxu1 }
 0x1ef   : > { %v8031_v18 = vadd.f32 %v8030_v58, %v8029_v32 }
 0x1f0   : > { %v3444_v24 = vadd.f32 %v7979_v59, %v10803_v63  ;;  %v10923_v62 = vadd.f32 %v8028_v34, %v3441_v51 }
 0x1f2   : > { %v7980_v38 = vpop.f32.mrb[124].mxu0  ;;  %v10925_v14 = vadd.f32 %v8031_v18, %v3444_v24 }
 0x1f3   : > { %v8032_v28 = vpop.f32.mrb[124].mxu1  ;;  %v7981_v35 = vpop.f32.mrb[125].mxu0 }
 0x1f4   : > { %v7982_v17 = vadd.f32 %v7981_v35, %v7980_v38  ;;  %v8033_v46 = vpop.f32.mrb[125].mxu1  ;;  %v7983_v6 = vpop.f32.mrb[126].mxu0 }
 0x1f5   : > { %v8034_v19 = vadd.f32 %v8033_v46, %v8032_v28  ;;  %v8035_v42 = vpop.f32.mrb[126].mxu1  ;;  %v7984_v37 = vpop.f32.mrb[127].mxu0 }
 0x1f6   : > { %v3449_v4 = vadd.f32 %v7982_v17, %v10876_v53  ;;  %v7985_v29 = vadd.f32 %v7984_v37, %v7983_v6  ;;  %v8036_v61 = vpop.f32.mrb[127].mxu1 }
 0x1f7   : > { %v8037_v54 = vadd.f32 %v8036_v61, %v8035_v42 }
 0x1f8   : > { %v3452_v63 = vadd.f32 %v7985_v29, %v10885_v8  ;;  %v10929_v45 = vadd.f32 %v8034_v19, %v3449_v4 }
 0x1fa   : > { %v7986_v31 = vpop.f32.mrb[128].mxu0  ;;  %v10931_v16 = vadd.f32 %v8037_v54, %v3452_v63 }
 0x1fb   : > { %v8038_v5 = vpop.f32.mrb[128].mxu1  ;;  %v7987_v26 = vpop.f32.mrb[129].mxu0 }
 0x1fc   : > { %v7988_v55 = vadd.f32 %v7987_v26, %v7986_v31  ;;  %v8039_v44 = vpop.f32.mrb[129].mxu1  ;;  %v7989_v23 = vpop.f32.mrb[130].mxu0 }
 0x1fd   : > { %v8040_v33 = vadd.f32 %v8039_v44, %v8038_v5  ;;  %v8041_v47 = vpop.f32.mrb[130].mxu1  ;;  %v7990_v1 = vpop.f32.mrb[131].mxu0 }
 0x1fe   : > { %v3457_v53 = vadd.f32 %v7988_v55, %v10898_v21  ;;  %v7991_v11 = vadd.f32 %v7990_v1, %v7989_v23  ;;  %v8042_v39 = vpop.f32.mrb[131].mxu1 }
 0x1ff   : > { %v8043_v49 = vadd.f32 %v8042_v39, %v8041_v47 }
 0x200   : > { %v3460_v8 = vadd.f32 %v7991_v11, %v10901_v41  ;;  %v3538_v27 = vadd.f32 %v8040_v33, %v3457_v53 }
 0x202   : > { %v7992_v56 = vpop.f32.mrb[132].mxu0  ;;  %v10935_v7 = vadd.f32 %v8043_v49, %v3460_v8 }
 0x203   : > { %v8044_v52 = vpop.f32.mrb[132].mxu1  ;;  %v7993_v34 = vpop.f32.mrb[133].mxu0 }
 0x204   : > { %v7994_v32 = vadd.f32 %v7993_v34, %v7992_v56  ;;  %v8045_v57 = vpop.f32.mrb[133].mxu1  ;;  %v7995_v51 = vpop.f32.mrb[134].mxu0 }
 0x205   : > { %v8046_v59 = vadd.f32 %v8045_v57, %v8044_v52  ;;  %v8047_v58 = vpop.f32.mrb[134].mxu1  ;;  %v7996_v18 = vpop.f32.mrb[135].mxu0 }
 0x206   : > { %v3465_v24 = vadd.f32 %v7994_v32, %v10904_v20  ;;  %v7997_v21 = vadd.f32 %v7996_v18, %v7995_v51  ;;  %v8048_v38 = vpop.f32.mrb[135].mxu1  ;;  %v1379_v18 = vld [vmem:[%s9356_s17 + $0x2a] sm:$0xff] }
 0x207   : > { %v8049_v28 = vadd.f32 %v8048_v38, %v8047_v58 }
 0x208   : > { %v3468_v35 = vadd.f32 %v7997_v21, %v10907_v15  ;;  %v3546_v41 = vadd.f32 %v8046_v59, %v3465_v24 }
 0x20a   : > { %v7998_v17 = vpop.f32.mrb[136].mxu0  ;;  %v3549_v46 = vadd.f32 %v8049_v28, %v3468_v35  ;;  %v1383_v35 = vld [vmem:[%s9356_s17 + $0x4a] sm:$0xff] }
 0x20b   : > { %v8050_v6 = vpop.f32.mrb[136].mxu1  ;;  %v7999_v19 = vpop.f32.mrb[137].mxu0 }
 0x20c   : > { %v8000_v42 = vadd.f32 %v7999_v19, %v7998_v17  ;;  %v8051_v37 = vpop.f32.mrb[137].mxu1  ;;  %v8001_v4 = vpop.f32.mrb[138].mxu0  ;;  %v1377_v17 = vld [vmem:[%s9356_s17 + $0x1a] sm:$0xff] }
 0x20d   : > { %v8052_v29 = vadd.f32 %v8051_v37, %v8050_v6  ;;  %v8053_v61 = vpop.f32.mrb[138].mxu1  ;;  %v8002_v54 = vpop.f32.mrb[139].mxu0 }
 0x20e   : > { %v3473_v63 = vadd.f32 %v8000_v42, %v10910_v60  ;;  %v8003_v31 = vadd.f32 %v8002_v54, %v8001_v4  ;;  %v8054_v20 = vpop.f32.mrb[139].mxu1  ;;  %v1381_v4 = vld [vmem:[%s9356_s17 + $0x3a] sm:$0xff] }
 0x20f   : > { %v8055_v5 = vadd.f32 %v8054_v20, %v8053_v61  ;;  %v1384_v20 = vld [vmem:[%s9356_s17 + $0x52] sm:$0xff] }
 0x210   : > { %v3476_v26 = vadd.f32 %v8003_v31, %v10913_v12  ;;  %v3554_v55 = vadd.f32 %v8052_v29, %v3473_v63  ;;  %v1380_v29 = vld [vmem:[%s9356_s17 + $0x32] sm:$0xff] }
 0x212   : > { %v8004_v15 = vpop.f32.mrb[140].mxu0  ;;  %v10941_v44 = vadd.f32 %v8055_v5, %v3476_v26  ;;  %v1378_v5 = vld [vmem:[%s9356_s17 + $0x22] sm:$0xff] }
 0x213   : > { %v8056_v23 = vpop.f32.mrb[140].mxu1  ;;  %v8005_v33 = vpop.f32.mrb[141].mxu0 }
 0x214   : > { %v8006_v47 = vadd.f32 %v8005_v33, %v8004_v15  ;;  %v8057_v1 = vpop.f32.mrb[141].mxu1  ;;  %v8007_v53 = vpop.f32.mrb[142].mxu0  ;;  %v1382_v33 = vld [vmem:[%s9356_s17 + $0x42] sm:$0xff] }
 0x215   : > { %v8058_v11 = vadd.f32 %v8057_v1, %v8056_v23  ;;  %v8059_v39 = vpop.f32.mrb[142].mxu1  ;;  %v8008_v49 = vpop.f32.mrb[143].mxu0 }
 0x216   : > { %v3481_v60 = vadd.f32 %v8006_v47, %v10916_v10  ;;  %v8009_v8 = vadd.f32 %v8008_v49, %v8007_v53  ;;  %v8060_v56 = vpop.f32.mrb[143].mxu1 }
 0x217   : > { %v8061_v12 = vadd.f32 %v8060_v56, %v8059_v39 }
 0x218   : > { %v3484_v52 = vadd.f32 %v8009_v8, %v10919_v36  ;;  %v3562_v34 = vadd.f32 %v8058_v11, %v3481_v60  ;;  %v1387_v8 = vld [vmem:[%s9356_s17 + $0x6a] sm:$0xff] }
 0x21a   : > { %v8538_v32 = vpop.f32.mrb[144].mxu0  ;;  %v3565_v57 = vadd.f32 %v8061_v12, %v3484_v52  ;;  %v1385_v52 = vld [vmem:[%s9356_s17 + $0x5a] sm:$0xff] }
 0x21b   : > { %v3611_v51 = vadd.f32 %v8538_v32, %v10929_v45  ;;  %v8542_v59 = vpop.f32.mrb[144].mxu1  ;;  %v3602_v58 = vpop.f32.mrb[145].mxu0 }
 0x21c   : > { %v3627_v24 = vadd.f32 %v8542_v59, %v3546_v41  ;;  %v3603_v10 = vadd.f32 %v3602_v58, %v10923_v62  ;;  %v3618_v21 = vpop.f32.mrb[145].mxu1  ;;  %v8539_v38 = vpop.f32.mrb[146].mxu0  ;;  %v1388_v58 = vld [vmem:[%s9356_s17 + $0x72] sm:$0xff] }
 0x21d   : > { %v3651_v28 = vmax.f32 %v3611_v51, 0.0  ;;  %v3619_v36 = vadd.f32 %v3618_v21, %v3538_v27  ;;  %v3614_v6 = vadd.f32 %v8539_v38, %v10931_v16  ;;  %v8543_v19 = vpop.f32.mrb[146].mxu1  ;;  %v3605_v45 = vpop.f32.mrb[147].mxu0  ;;  %v1386_v21 = vld [vmem:[%s9356_s17 + $0x62] sm:$0xff]  ;;  %s10987_s17 = smov 0  }
 0x21e   : > { %v3655_v42 = vmax.f32 %v3627_v24, 0.0  ;;  %v3649_v37 = vmax.f32 %v3603_v10, 0.0  ;;  %v3630_v41 = vadd.f32 %v8543_v19, %v3549_v46  ;;  %v3606_v62 = vadd.f32 %v3605_v45, %v10925_v14  ;;  %v3621_v61 = vpop.f32.mrb[147].mxu1 }
 0x21f   : > { %v3663_v54 = vadd.f32 %v3651_v28, %v1379_v18   ;;  %v3653_v63 = vmax.f32 %v3619_v36, 0.0  ;;  %v3652_v31 = vmax.f32 %v3614_v6, 0.0  ;;  %v3622_v27 = vadd.f32 %v3621_v61, %v10935_v7 }
 0x220   : > { %v3667_v16 = vadd.f32 %v3655_v42, %v1383_v35   ;;  %v3661_v26 = vadd.f32 %v3649_v37, %v1377_v17   ;;  %v3656_v15 = vmax.f32 %v3630_v41, 0.0  ;;  %v3650_v23 = vmax.f32 %v3606_v62, 0.0 }
 0x221   : > { %v3665_v47 = vadd.f32 %v3653_v63, %v1381_v4   ;;  %v3664_v1 = vadd.f32 %v3652_v31, %v1380_v29   ;;  %v3654_v46 = vmax.f32 %v3622_v27, 0.0 }
 0x222   : > { %v3668_v14 = vadd.f32 %v3656_v15, %v1384_v20   ;;  %v3662_v53 = vadd.f32 %v3650_v23, %v1378_v5  }
 0x223   : > { %v3666_v11 = vadd.f32 %v3654_v46, %v1382_v33   ;;  %v8546_v39 = vpop.f32.mrb[148].mxu1 }
 0x224   : > { %v3643_v49 = vadd.f32 %v8546_v39, %v3562_v34  ;;  %v3634_v60 = vpop.f32.mrb[149].mxu1 }
 0x225   : > { %v3635_v56 = vadd.f32 %v3634_v60, %v3554_v55  ;;  %v8547_v7 = vpop.f32.mrb[150].mxu1 }
 0x226   : > { %v3659_v12 = vmax.f32 %v3643_v49, 0.0  ;;  %v3646_v32 = vadd.f32 %v8547_v7, %v3565_v57  ;;  %v3637_v51 = vpop.f32.mrb[151].mxu1 }
 0x227   : > { %v3657_v59 = vmax.f32 %v3635_v56, 0.0  ;;  %v3638_v18 = vadd.f32 %v3637_v51, %v10941_v44 }
 0x228   : > { %v3671_v24 = vadd.f32 %v3659_v12, %v1387_v8   ;;  %v3660_v10 = vmax.f32 %v3646_v32, 0.0 }
 0x229   : > { %v3669_v38 = vadd.f32 %v3657_v59, %v1385_v52   ;;  %v3658_v28 = vmax.f32 %v3638_v18, 0.0 }
 0x22a   : > { %v3672_v35 = vadd.f32 %v3660_v10, %v1388_v58  }
 0x22b   : > { %v3670_v17 = vadd.f32 %v3658_v28, %v1386_v21  }
 0x22c LB: >> { %12011 = vst [vmem:[#allocation5_spill] sm:$0xff] %v9165_v35  ;;  %12012 = vst [vmem:[#allocation6_spill] sm:$0xff] %v9173_v17  ;;  %s7437_s7 = smul.u32 1152, %s9213_s17  ;;  %vm3932_vm13 = vcmask 1046528   ;;  %v3934_v55 = vrot.slane %v9205_v53, 1  ;;  %v3933_v44 = vrot.slane %v9209_v26, 1  ;;  %s9213_s17 = sphi %s10987_s17, %s3907_s17   ;;  %v9209_v26 = vphi %v3661_v26, %v12061_v26   ;;  %v9205_v53 = vphi %v3662_v53, %v12060_v53   ;;  %v9201_v54 = vphi %v3663_v54, %v12059_v54   ;;  %v9197_v1 = vphi %v3664_v1, %v12058_v1   ;;  %v9193_v47 = vphi %v3665_v47, %v12057_v47   ;;  %v9189_v11 = vphi %v3666_v11, %v12056_v11   ;;  %v9185_v16 = vphi %v3667_v16, %v12055_v16   ;;  %v9181_v14 = vphi %v3668_v14, %v12054_v14   ;;  %v9177_v38 = vphi %v3669_v38, %v12053_v38   ;;  %v9173_v17 = vphi %v3670_v17, %v12052_v17   ;;  %v9169_v24 = vphi %v3671_v24, %v12051_v24   ;;  %v9165_v35 = vphi %v3672_v35, %v12050_v35  }
 0x22d   : >> { %v3936_v34 = vrot.slane %v9201_v54, 1  ;;  %v3938_v57 = vrot.slane %v9197_v1, 1  ;;  %v3970_v36 = vrot.slane %v9165_v35, 5  ;;  %vm3972_vm9 = vcmask 1042432   ;;  %s7138_s11 = sshll.u32 %s9213_s17, 1  ;;  %s3907_s17 = sadd.s32 1, %s9213_s17  }
 0x22e   : >> { %s11037_s10 = scalar_lea.vmem %s11978_s3, %s7437_s7  ;;  %v3973_v6 = vrot.slane %v9209_v26, 5  ;;  %v3974_v19 = vrot.slane %v9205_v53, 5  ;;  %v3976_v45 = vrot.slane %v9201_v54, 5  ;;  %v3935_v37 = vsel %vm3932_vm13, %v3933_v44, %v3934_v55  ;;  %s11412_s14 = scalar_lea.vmem %s11979_s4, %s7138_s11 }
 0x22f   : >> { %v8959_v42 = vld [vmem:[%s11037_s10 + $0x40] sm:$0xff]   ;;  %v4008_v4 = vrot.slane %v9165_v35, 7  ;;  %v3937_v41 = vsel %vm3932_vm13, %v3934_v55, %v3936_v34  ;;  %v3939_v62 = vsel %vm3932_vm13, %v3936_v34, %v3938_v57  ;;  %vm4010_vm15 = vcmask 1040384   ;;  %v8963_v23 = vld [vmem:[%s11037_s10 + $0x48] sm:$0xff]   ;;  %v8967_v21 = vld [vmem:[%s11037_s10 + $0x50] sm:$0xff]   ;;  %p11928_p4 = scmp.ge.s32.totalorder %s3907_s17, 5  }
 0x230   : >> { %v8960_v29 = vld [vmem:[%s11037_s10] sm:$0xff]   ;;  %v4007_v61 = vsel %vm3972_vm9, %v3970_v36, %v3973_v6  ;;  %8076 = vmatprep.subr.bf16.mxu0 %v8959_v42  ;;  %v4011_v31 = vrot.slane %v9209_v26, 7  ;;  %v3975_v5 = vsel %vm3972_vm9, %v3973_v6, %v3974_v19  ;;  %v3977_v27 = vsel %vm3972_vm9, %v3974_v19, %v3976_v45  ;;  %v8964_v39 = vld [vmem:[%s11037_s10 + $0x8] sm:$0xff]   ;;  %v8968_v19 = vld [vmem:[%s11037_s10 + $0x10] sm:$0xff]  }
 0x231   : >> { %v8961_v63 = vld [vmem:[%s11037_s10 + $0xc0] sm:$0xff]   ;;  %8077 = vmatpush3.bf16.msra.mxu0 %v8960_v29  ;;  %v4012_v15 = vrot.slane %v9205_v53, 7  ;;  %v4014_v33 = vrot.slane %v9201_v54, 7  ;;  %vm12013_vm11 = vcmp.eq.s32.totalorder %v10796_v50, 9  ;;  %v3940_v8 = vrot.slane %v9193_v47, 1  ;;  %v8965_v56 = vld [vmem:[%s11037_s10 + $0xc8] sm:$0xff]  }
 0x232   : >> { %v8962_v20 = vld [vmem:[%s11037_s10 + $0x80] sm:$0xff]   ;;  %8128 = vmatprep.subr.bf16.mxu1 %v8961_v63  ;;  %v4045_v46 = vsel %vm4010_vm15, %v4008_v4, %v4011_v31  ;;  %8078 = vmatprep.subr.bf16.mxu0 %v8963_v23  ;;  %vm12014_vm1 = vcmp.eq.s32.totalorder %v10796_v50, 0  ;;  %v3978_v32 = vrot.slane %v9197_v1, 5  ;;  %v8966_v51 = vld [vmem:[%s11037_s10 + $0x88] sm:$0xff]   ;;  %v4016_v10 = vrot.slane %v9197_v1, 7 }
 0x233   : >> { %8129 = vmatpush3.bf16.msra.mxu1 %v8962_v20  ;;  %v4013_v49 = vsel %vm4010_vm15, %v4011_v31, %v4012_v15  ;;  %v4046_v60 = vsel %vm12013_vm11, %v4007_v61, %v4045_v46  ;;  %v4015_v7 = vsel %vm4010_vm15, %v4012_v15, %v4014_v33  ;;  %v3941_v18 = vsel %vm3932_vm13, %v3938_v57, %v3940_v8  ;;  %v8971_v20 = vld [vmem:[%s11037_s10 + $0x58] sm:$0xff]  }
 0x234   : >> { %v4047_v12 = vsel %vm3891_vm14, %v3975_v5, %v4013_v49  ;;  %v4058_v52 = vsel %vm12014_vm1, %v3935_v37, %v4046_v60  ;;  %v4048_v59 = vsel %vm3892_vm5, %v3977_v27, %v4015_v7  ;;  %8130 = vmatprep.subr.bf16.mxu1 %v8965_v56  ;;  %v3979_v34 = vsel %vm3972_vm9, %v3976_v45, %v3978_v32  ;;  %v8969_v37 = vld [vmem:[%s11037_s10 + $0xd0] sm:$0xff]   ;;  %v8972_v15 = vld [vmem:[%s11037_s10 + $0x18] sm:$0xff]  }
 0x235   : >> { %8079 = vmatpush3.bf16.msra.mxu0 %v8964_v39  ;;  %v4059_v58 = vsel %vm3879_vm12, %v3937_v41, %v4047_v12  ;;  %4070 = vst [vmem:[#allocation2 + $0xc] sm:$0xff] %v4058_v52  ;;  %v11086_v28 = vsel %vm3880_vm0, %v3939_v62, %v4048_v59  ;;  %v3942_v6 = vrot.slane %v9189_v11, 1  ;;  %v4017_v57 = vsel %vm4010_vm15, %v4014_v33, %v4016_v10  ;;  %v8970_v41 = vld [vmem:[%s11037_s10 + $0x90] sm:$0xff]   ;;  %v8973_v46 = vld [vmem:[%s11037_s10 + $0xd8] sm:$0xff]   ;;  %v8976_v59 = vld [vmem:[%s11037_s10 + $0x20] sm:$0xff]  }
 0x236   : >> { %4082 = vst [vmem:[#allocation2 - $0x4] sm:$0xf0] %v4059_v58  ;;  %4071 = vst [vmem:[#allocation2 + $0x14] sm:$0xff] %v4059_v58  ;;  %v4171_v55 = vpack.c.bf16 %v4059_v58, %v4058_v52  ;;  %v3980_v42 = vrot.slane %v9193_v47, 5  ;;  %8080 = vmatprep.subr.bf16.mxu0 %v8967_v21  ;;  %v4049_v45 = vsel %vm3893_vm6, %v3979_v34, %v4017_v57  ;;  %v4018_v29 = vrot.slane %v9193_v47, 7  ;;  %v8974_v56 = vld [vmem:[%s11037_s10 + $0x98] sm:$0xff]  }
 0x237   : >> { %8131 = vmatpush3.bf16.msra.mxu1 %v8966_v51  ;;  %4072 = vst [vmem:[#allocation2 + $0x1c] sm:$0xff] %v11086_v28  ;;  %4083 = vst [vmem:[#allocation2 + $0x4] sm:$0xff] %v11086_v28  ;;  %v11102_v62 = vsel %vm3881_vm2, %v3941_v18, %v4049_v45  ;;  %v3943_v61 = vsel %vm3932_vm13, %v3940_v8, %v3942_v6  ;;  %v3944_v31 = vrot.slane %v9185_v16, 1  ;;  %v3982_v27 = vrot.slane %v9189_v11, 5  ;;  %v8975_v52 = vld [vmem:[%s11037_s10 + $0x60] sm:$0xff]  }
 0x238   : >> { %5057 = vmatprep.mubr.bf16.mxu1 %v4171_v55  ;;  %v3981_v63 = vsel %vm3972_vm9, %v3978_v32, %v3980_v42  ;;  %8132 = vmatprep.subr.bf16.mxu1 %v8969_v37  ;;  %4073 = vst [vmem:[#allocation2 + $0x24] sm:$0xff] %v11102_v62  ;;  %v4019_v5 = vsel %vm4010_vm15, %v4016_v10, %v4018_v29  ;;  %v4020_v33 = vrot.slane %v9189_v11, 7  ;;  %vm12015_vm1 = vcmp.eq.s32.totalorder %v10826_v0, 0  ;;  %v8977_v55 = vld [vmem:[%s11037_s10 + $0xe0] sm:$0xff]   ;;  %v8979_v37 = vld [vmem:[%s11037_s10 + $0x68] sm:$0xff]  }
 0x239   : >> { %8081 = vmatpush3.bf16.msra.mxu0 %v8968_v19  ;;  %v4050_v23 = vsel %vm3894_vm10, %v3981_v63, %v4019_v5  ;;  %v3945_v49 = vsel %vm3932_vm13, %v3942_v6, %v3944_v31  ;;  %v3983_v60 = vsel %vm3972_vm9, %v3980_v42, %v3982_v27  ;;  %v3946_v8 = vrot.slane %v9181_v14, 1  ;;  %v8978_v19 = vld [vmem:[%s11037_s10 + $0xa0] sm:$0xff]   ;;  %v8980_v63 = vld [vmem:[%s11037_s10 + $0x28] sm:$0xff]  }
 0x23a   : >> { %8082 = vmatprep.subr.bf16.mxu0 %v8971_v20  ;;  %v11118_v39 = vsel %vm12015_vm1, %v3943_v61, %v4050_v23  ;;  %v4021_v7 = vsel %vm4010_vm15, %v4018_v29, %v4020_v33  ;;  %v3984_v12 = vrot.slane %v9185_v16, 5  ;;  %v4022_v51 = vrot.slane %v9185_v16, 7  ;;  %v8981_v5 = vld [vmem:[%s11037_s10 + $0xe8] sm:$0xff]  }
 0x23b   : >> { %8133 = vmatpush3.bf16.msra.mxu1 %v8970_v41  ;;  %4074 = vst [vmem:[#allocation2 + $0x2c] sm:$0xff] %v11118_v39  ;;  %v4051_v32 = vsel %vm3895_vm4, %v3983_v60, %v4021_v7  ;;  %vm12016_vm1 = vcmp.eq.s32.totalorder %v10835_v48, 0  ;;  %v3947_v18 = vsel %vm3932_vm13, %v3944_v31, %v3946_v8  ;;  %v3948_v21 = vrot.slane %v9177_v38, 1  ;;  %v8982_v23 = vld [vmem:[%s11037_s10 + $0xa8] sm:$0xff]  }
 0x23c   : >> { %8134 = vmatprep.subr.bf16.mxu1 %v8973_v46  ;;  %v11134_v58 = vsel %vm12016_vm1, %v3945_v49, %v4051_v32  ;;  %v3985_v10 = vsel %vm3972_vm9, %v3982_v27, %v3984_v12  ;;  %v4023_v34 = vsel %vm4010_vm15, %v4020_v33, %v4022_v51  ;;  %v3986_v6 = vrot.slane %v9181_v14, 5 }
 0x23d   : >> { %8083 = vmatpush3.bf16.msra.mxu0 %v8972_v15  ;;  %4075 = vst [vmem:[#allocation2 + $0x34] sm:$0xff] %v11134_v58  ;;  %vm12017_vm7 = vcmp.eq.s32.totalorder %v10840_v25, 9  ;;  %v4024_v42 = vrot.slane %v9181_v14, 7  ;;  %vm12018_vm1 = vcmp.eq.s32.totalorder %v10840_v25, 0  ;;  %v3949_v29 = vsel %vm3932_vm13, %v3946_v8, %v3948_v21  ;;  %v8983_v8 = vld [vmem:[%s11037_s10 + $0x70] sm:$0xff]  }
 0x23e   : >> { %8084 = vmatprep.subr.bf16.mxu0 %v8975_v52  ;;  %v4052_v57 = vsel %vm12017_vm7, %v3985_v10, %v4023_v34  ;;  %v3987_v41 = vsel %vm3972_vm9, %v3984_v12, %v3986_v6  ;;  %v3950_v61 = vrot.slane %v9173_v17, 1  ;;  %v3988_v20 = vrot.slane %v9177_v38, 5  ;;  %v8984_v12 = vld [vmem:[%s11037_s10 + $0x30] sm:$0xff]  }
 0x23f   : >> { %8135 = vmatpush3.bf16.msra.mxu1 %v8974_v56  ;;  %v11150_v45 = vsel %vm12018_vm1, %v3947_v18, %v4052_v57  ;;  %v4025_v31 = vsel %vm4010_vm15, %v4022_v51, %v4024_v42  ;;  %v4026_v15 = vrot.slane %v9177_v38, 7  ;;  %vm12019_vm1 = vcmp.eq.s32.totalorder %v10845_v13, 0  ;;  %v8985_v51 = vld [vmem:[%s11037_s10 + $0xf0] sm:$0xff]  }
 0x240   : >> { %8136 = vmatprep.subr.bf16.mxu1 %v8977_v55  ;;  %4076 = vst [vmem:[#allocation2 + $0x3c] sm:$0xff] %v11150_v45  ;;  %v4053_v27 = vsel %vm3897_vm8, %v3987_v41, %v4025_v31  ;;  %v3951_v46 = vsel %vm3932_vm13, %v3948_v21, %v3950_v61  ;;  %v3989_v49 = vsel %vm3972_vm9, %v3986_v6, %v3988_v20  ;;  %v3952_v60 = vrot.slane %v9169_v24, 1  ;;  %v8986_v55 = vld [vmem:[%s11037_s10 + $0xb0] sm:$0xff]  }
 0x241   : >> { %8085 = vmatpush3.bf16.msra.mxu0 %v8976_v59  ;;  %v11166_v33 = vsel %vm12019_vm1, %v3949_v29, %v4053_v27  ;;  %v4027_v56 = vsel %vm4010_vm15, %v4024_v42, %v4026_v15  ;;  %v3990_v7 = vrot.slane %v9173_v17, 5  ;;  %vm12020_vm3 = vcmp.eq.s32.totalorder %v10850_v9, 9  ;;  %v8988_v29 = vld [vmem:[%s11037_s10 + $0x38] sm:$0xff]  }
 0x242   : >> { %8086 = vmatprep.subr.bf16.mxu0 %v8979_v37  ;;  %4077 = vst [vmem:[#allocation2 + $0x44] sm:$0xff] %v11166_v33  ;;  %v4054_v52 = vsel %vm12020_vm3, %v3989_v49, %v4027_v56  ;;  %v4028_v32 = vrot.slane %v9173_v17, 7  ;;  %vm12021_vm1 = vcmp.eq.s32.totalorder %v10850_v9, 0  ;;  %v3953_v18 = vsel %vm3932_vm13, %v3950_v61, %v3952_v60  ;;  %v8990_v49 = vld [vmem:[%s11037_s10 + $0xb8] sm:$0xff]   ;;  %v4088_v56 = vld [vmem:[#allocation2 + $0x8] sm:$0xff] }
 0x243   : >> { %8137 = vmatpush3.bf16.msra.mxu1 %v8978_v19  ;;  %v11182_v59 = vsel %vm12021_vm1, %v3951_v46, %v4054_v52  ;;  %v3991_v10 = vsel %vm3972_vm9, %v3988_v20, %v3990_v7  ;;  %v3954_v21 = vrot.slane %v9165_v35, 1  ;;  %v3992_v6 = vrot.slane %v9169_v24, 5  ;;  %v8987_v19 = vld [vmem:[%s11037_s10 + $0x78] sm:$0xff]   ;;  %v8992_v52 = vld [vmem:[%s11037_s10 + $0x100] sm:$0xff]  }
 0x244   : >> { %8138 = vmatprep.subr.bf16.mxu1 %v8981_v5  ;;  %4078 = vst [vmem:[#allocation2 + $0x4c] sm:$0xff] %v11182_v59  ;;  %v4029_v34 = vsel %vm4010_vm15, %v4026_v15, %v4028_v32  ;;  %vm12022_vm1 = vcmp.eq.s32.totalorder %v10859_v30, 9  ;;  %v4030_v37 = vrot.slane %v9169_v24, 7  ;;  %vm12023_vm11 = vcmp.eq.s32.totalorder %v10859_v30, 0  ;;  %v8989_v20 = vld [vmem:[%s11037_s10 + $0xf8] sm:$0xff]   ;;  %v4111_v15 = vld [vmem:[#allocation2 + $0x1] sm:$0xff] }
 0x245   : >> { %8087 = vmatpush3.bf16.msra.mxu0 %v8980_v63  ;;  %v4055_v57 = vsel %vm12022_vm1, %v3991_v10, %v4029_v34  ;;  %v3955_v42 = vsel %vm3932_vm13, %v3952_v60, %v3954_v21  ;;  %v3993_v61 = vsel %vm3972_vm9, %v3990_v7, %v3992_v6  ;;  %v3969_v63 = vsel %vm3932_vm13, %v3954_v21, %v3933_v44  ;;  %v4087_v60 = vld [vmem:[#allocation2] sm:$0xff]  ;;  %v8993_v21 = vld [vmem:[%s11037_s10 + $0x148] sm:$0xff]  }
 0x246   : >> { %8088 = vmatprep.subr.bf16.mxu0 %v8983_v8  ;;  %v11199_v41 = vsel %vm12023_vm11, %v3953_v18, %v4055_v57  ;;  %v3994_v31 = vsel %vm3972_vm9, %v3992_v6, %v3970_v36  ;;  %v4031_v5 = vsel %vm4010_vm15, %v4028_v32, %v4030_v37  ;;  %v4032_v27 = vsel %vm4010_vm15, %v4030_v37, %v4008_v4  ;;  %v4135_v32 = vld [vmem:[#allocation2 + $0x2] sm:$0xff]  ;;  %v11236_v34 = vld [vmem:[#allocation2 + $0x19] sm:$0xff]  ;;  %v4089_v57 = vld [vmem:[#allocation2 + $0x10] sm:$0xff] }
 0x247   : >> { %8139 = vmatpush3.bf16.msra.mxu1 %v8982_v23  ;;  %4079 = vst [vmem:[#allocation2 + $0x54] sm:$0xff] %v11199_v41  ;;  %4084 = vst [vmem:[#allocation2 + $0x6c] sm:$0xff] %v11199_v41  ;;  %v4112_v23 = vld [vmem:[#allocation2 + $0x9] sm:$0xff]  ;;  %vm12024_vm11 = vcmp.eq.s32.totalorder %v10862_v40, 9  ;;  %vm12025_vm1 = vcmp.eq.s32.totalorder %v10866_v43, 9  ;;  %vm12026_vm3 = vcmp.eq.s32.totalorder %v10862_v40, 0  ;;  %v4099_v7 = vpack.c.bf16 %v4088_v56, %v4087_v60 }
 0x248   : >> { %8140 = vmatprep.subr.bf16.mxu1 %v8985_v51  ;;  %v4056_v44 = vsel %vm12024_vm11, %v3993_v61, %v4031_v5  ;;  %v4057_v36 = vsel %vm12025_vm1, %v3994_v31, %v4032_v27  ;;  %v4123_v46 = vpack.c.bf16 %v4112_v23, %v4111_v15  ;;  %vm12027_vm7 = vcmp.eq.s32.totalorder %v10866_v43, 0  ;;  %v4136_v51 = vld [vmem:[#allocation2 + $0xa] sm:$0xff]  ;;  %v11248_v31 = vld [vmem:[#allocation2 + $0x21] sm:$0xff]  ;;  %v8999_v60 = vld [vmem:[%s11037_s10 + $0x118] sm:$0xff]  }
 0x249   : >> { %8089 = vmatpush3.bf16.msra.mxu0 %v8984_v12  ;;  %v11222_v8 = vsel %vm12026_vm3, %v3955_v42, %v4056_v44  ;;  %v11226_v4 = vsel %vm12027_vm7, %v3969_v63, %v4057_v36  ;;  %v8991_v12 = vld [vmem:[%s11037_s10 + $0x140] sm:$0xff]   ;;  %v4172_v18 = vpack.c.bf16 %v11102_v62, %v11086_v28  ;;  %v4147_v10 = vpack.c.bf16 %v4136_v51, %v4135_v32  ;;  %v11240_v42 = vld [vmem:[#allocation2 + $0x18] sm:$0xff]  ;;  %v8996_v61 = vld [vmem:[%s11037_s10 + $0x110] sm:$0xff]  }
 0x24a   : >> { %8090 = vmatprep.subr.bf16.mxu0 %v8987_v19  ;;  %4080 = vst [vmem:[#allocation2 + $0x5c] sm:$0xff] %v11222_v8  ;;  %4085 = vst [vmem:[#allocation2 + $0x74] sm:$0xf] %v11222_v8  ;;  %4976 = vmatprep.mubr.bf16.mxu0 %v4123_v46  ;;  %v8994_v19 = vld [vmem:[%s11037_s10 + $0x108] sm:$0xff]   ;;  %v4137_v28 = vld [vmem:[#allocation2 + $0x12] sm:$0xff]  ;;  %v4100_v37 = vpack.c.bf16 %v11240_v42, %v4089_v57  ;;  %v4173_v23 = vpack.c.bf16 %v11134_v58, %v11118_v39  ;;  %vm12028_vm3 = vcmp.eq.s32.totalorder %v10826_v0, 0 }
 0x24b   : >> { %8141 = vmatpush3.bf16.msra.mxu1 %v8986_v55  ;;  %4081 = vst [vmem:[#allocation2 + $0x64] sm:$0xff] %v11226_v4  ;;  %v4113_v55 = vld [vmem:[#allocation2 + $0x11] sm:$0xff]  ;;  %v11242_v62 = vld [vmem:[#allocation2 + $0x1a] sm:$0xff]  ;;  %v11256_v15 = vld [vmem:[#allocation2 + $0x28] sm:$0xff]  ;;  %vm12029_vm7 = vcmp.eq.s32.totalorder %v10840_v25, 9  ;;  %vm12030_vm11 = vcmp.eq.s32.totalorder %v10835_v48, 0 }
 0x24c   : >> { %8142 = vmatprep.subr.bf16.mxu1 %v8989_v20  ;;  %v4124_v6 = vpack.c.bf16 %v11236_v34, %v4113_v55  ;;  %v4148_v63 = vpack.c.bf16 %v11242_v62, %v4137_v28  ;;  %v11250_v20 = vld [vmem:[#allocation2 + $0x29] sm:$0xff]  ;;  %v11254_v27 = vld [vmem:[#allocation2 + $0x20] sm:$0xff]  ;;  %v8997_v44 = vld [vmem:[%s11037_s10 + $0x158] sm:$0xff]   ;;  %vm12031_vm1 = vcmp.eq.s32.totalorder %v10840_v25, 0 }
 0x24d   : >> { %8091 = vmatpush3.bf16.msra.mxu0 %v8988_v29  ;;  %v8995_v29 = vld [vmem:[%s11037_s10 + $0x150] sm:$0xff]   ;;  %v4125_v5 = vpack.c.bf16 %v11250_v20, %v11248_v31  ;;  %v11261_v36 = vld [vmem:[#allocation2 + $0x22] sm:$0xff]  ;;  %v4101_v39 = vpack.c.bf16 %v11256_v15, %v11254_v27  ;;  %v11290_v57 = vld [vmem:[#allocation2 + $0x3a] sm:$0xff] }
 0x24e   : >> { %8180 = vmatprep.subr.bf16.mxu0 %v8991_v12  ;;  %v11263_v46 = vld [vmem:[#allocation2 + $0x2a] sm:$0xff]  ;;  %v9000_v56 = vld [vmem:[%s11037_s10 + $0x180] sm:$0xff]  }
 0x24f   : >> { %8143 = vmatpush3.bf16.msra.mxu1 %v8990_v49  ;;  %v8998_v49 = vld [vmem:[%s11037_s10 + $0x1c0] sm:$0xff]   ;;  %v9001_v58 = vld [vmem:[%s11037_s10 + $0x1c8] sm:$0xff]   ;;  %v9005_v28 = vld [vmem:[%s11037_s10 + $0x1d0] sm:$0xff]  }
 0x250   : >> { %4977 = vmatmul.mubr.bf16.vlgmr.msra.gmra.mrb[0].mxu0 %v4099_v7  ;;  %8232 = vmatprep.subr.bf16.mxu1 %v8998_v49  ;;  %v11271_v7 = vld [vmem:[#allocation2 + $0x31] sm:$0xff]  ;;  %v11273_v12 = vld [vmem:[#allocation2 + $0x39] sm:$0xff]  ;;  %v9002_v51 = vld [vmem:[%s11037_s10 + $0x188] sm:$0xff]   ;;  %v4175_v49 = vpack.c.bf16 %v11199_v41, %v11182_v59 }
 0x251   : >> { %8181 = vmatpush3.bf16.msra.mxu0 %v8992_v52  ;;  %4984 = vmatprep.mubr.bf16.mxu0 %v4124_v6  ;;  %v4149_v52 = vpack.c.bf16 %v11263_v46, %v11261_v36  ;;  %v4126_v32 = vpack.c.bf16 %v11273_v12, %v11271_v7  ;;  %v9003_v55 = vld [vmem:[%s11037_s10 + $0x160] sm:$0xff]  }
 0x252   : >> { %5058 = vmatmul.mubr.bf16.vlgmr.msra.gmra.mrb[0].mxu1 %v4147_v10  ;;  %8182 = vmatprep.subr.bf16.mxu0 %v8993_v21  ;;  %v11282_v10 = vld [vmem:[#allocation2 + $0x38] sm:$0xff]  ;;  %v4174_v21 = vpack.c.bf16 %v11166_v33, %v11150_v45  ;;  %v9004_v6 = vld [vmem:[%s11037_s10 + $0x120] sm:$0xff]   ;;  %v9007_v33 = vld [vmem:[%s11037_s10 + $0x168] sm:$0xff]  }
 0x253   : >> { %5065 = vmatprep.mubr.bf16.mxu1 %v4172_v18  ;;  %8233 = vmatpush3.bf16.msra.mxu1 %v9000_v56  ;;  %v11280_v18 = vld [vmem:[#allocation2 + $0x30] sm:$0xff]  ;;  %v11310_v56 = vld [vmem:[#allocation2 + $0x40] sm:$0xff] }
 0x254   : >> { %8234 = vmatprep.subr.bf16.mxu1 %v9001_v58  ;;  %v4102_v45 = vpack.c.bf16 %v11282_v10, %v11280_v18  ;;  %v11314_v58 = vld [vmem:[#allocation2 + $0x42] sm:$0xff] }
 0x255   : >> { %8183 = vmatpush3.bf16.msra.mxu0 %v8994_v19  ;;  %v11288_v19 = vld [vmem:[#allocation2 + $0x32] sm:$0xff]  ;;  %v9012_v59 = vld [vmem:[%s11037_s10 + $0x1a0] sm:$0xff]  }
 0x256   : >> { %8184 = vmatprep.subr.bf16.mxu0 %v8995_v29  ;;  %v9008_v29 = vld [vmem:[%s11037_s10 + $0x1d8] sm:$0xff]  }
 0x257   : >> { %8235 = vmatpush3.bf16.msra.mxu1 %v9002_v51  ;;  %v9013_v51 = vld [vmem:[%s11037_s10 + $0x170] sm:$0xff]  }
 0x258   : >> { %4985 = vmatmul.mubr.bf16.gmra.mrb[4].mxu0 %v4100_v37  ;;  %v9006_v37 = vld [vmem:[%s11037_s10 + $0x190] sm:$0xff]   ;;  %8236 = vmatprep.subr.bf16.mxu1 %v9005_v28 }
 0x259   : >> { %8185 = vmatpush3.bf16.msra.mxu0 %v8996_v61  ;;  %4992 = vmatprep.mubr.bf16.mxu0 %v4125_v5  ;;  %v4150_v61 = vpack.c.bf16 %v11290_v57, %v11288_v19  ;;  %v11302_v5 = vld [vmem:[#allocation2 + $0x49] sm:$0xff]  ;;  %v11327_v28 = vld [vmem:[#allocation2 + $0x51] sm:$0xff] }
 0x25a   : >> { %5066 = vmatmul.mubr.bf16.gmra.mrb[4].mxu1 %v4148_v63  ;;  %8186 = vmatprep.subr.bf16.mxu0 %v8997_v44  ;;  %v11300_v63 = vld [vmem:[#allocation2 + $0x41] sm:$0xff] }
 0x25b   : >> { %5073 = vmatprep.mubr.bf16.mxu1 %v4173_v23  ;;  %8237 = vmatpush3.bf16.msra.mxu1 %v9006_v37  ;;  %v4127_v23 = vpack.c.bf16 %v11302_v5, %v11300_v63  ;;  %v9009_v44 = vld [vmem:[%s11037_s10 + $0x128] sm:$0xff]   ;;  %v11329_v37 = vld [vmem:[#allocation2 + $0x59] sm:$0xff] }
 0x25c   : >> { %8238 = vmatprep.subr.bf16.mxu1 %v9008_v29  ;;  %v9016_v29 = vld [vmem:[%s11037_s10 + $0x1a8] sm:$0xff]  }
 0x25d   : >> { %8187 = vmatpush3.bf16.msra.mxu0 %v8999_v60  ;;  %v9010_v60 = vld [vmem:[%s11037_s10 + $0x198] sm:$0xff]  }
 0x25e   : >> { %8188 = vmatprep.subr.bf16.mxu0 %v9003_v55 }
 0x25f   : >> { %8239 = vmatpush3.bf16.msra.mxu1 %v9010_v60 }
 0x260   : >> { %4993 = vmatmul.mubr.bf16.gmra.mrb[8].mxu0 %v4101_v39  ;;  %v11312_v39 = vld [vmem:[#allocation2 + $0x48] sm:$0xff] }
 0x261   : >> { %5000 = vmatprep.mubr.bf16.mxu0 %v4126_v32  ;;  %8189 = vmatpush3.bf16.msra.mxu0 %v9004_v6  ;;  %v9011_v32 = vld [vmem:[%s11037_s10 + $0x1e0] sm:$0xff]   ;;  %v4103_v41 = vpack.c.bf16 %v11312_v39, %v11310_v56  ;;  %v9015_v6 = vld [vmem:[%s11037_s10 + $0x1e8] sm:$0xff]  }
 0x262   : >> { %5074 = vmatmul.mubr.bf16.gmra.mrb[8].mxu1 %v4149_v52  ;;  %8190 = vmatprep.subr.bf16.mxu0 %v9007_v33  ;;  %v11316_v52 = vld [vmem:[#allocation2 + $0x4a] sm:$0xff]  ;;  %v4128_v33 = vpack.c.bf16 %v11329_v37, %v11327_v28 }
 0x263   : >> { %5081 = vmatprep.mubr.bf16.mxu1 %v4174_v21  ;;  %8240 = vmatprep.subr.bf16.mxu1 %v9011_v32  ;;  %v9014_v21 = vld [vmem:[%s11037_s10 + $0x130] sm:$0xff]   ;;  %v4151_v55 = vpack.c.bf16 %v11316_v52, %v11314_v58  ;;  %v9019_v32 = vld [vmem:[%s11037_s10 + $0x138] sm:$0xff]  }
 0x264   : >> { %8241 = vmatpush3.bf16.msra.mxu1 %v9012_v59  ;;  %v9020_v59 = vld [vmem:[%s11037_s10 + $0x1b0] sm:$0xff]  }
 0x265   : >> { %8191 = vmatpush3.bf16.msra.mxu0 %v9009_v44  ;;  %8242 = vmatprep.subr.bf16.mxu1 %v9015_v6  ;;  %v11340_v44 = vld [vmem:[#allocation2 + $0x52] sm:$0xff]  ;;  %v4267_v6 = vpack.c.bf16 %v11248_v31, %v11236_v34  ;;  %v4243_v34 = vpack.c.bf16 %v11254_v27, %v11240_v42  ;;  %v9024_v31 = vld [vmem:[%s11037_s10 + $0x208] sm:$0xff]   ;;  %v4244_v27 = vpack.c.bf16 %v11280_v18, %v11256_v15 }
 0x266   : >> { %8192 = vmatprep.subr.bf16.mxu0 %v9013_v51  ;;  %v9021_v51 = vld [vmem:[%s11037_s10 + $0x1f8] sm:$0xff]   ;;  %v9028_v15 = vld [vmem:[%s11037_s10 + $0x228] sm:$0xff]  }
 0x268   : >> { %5001 = vmatmul.mubr.bf16.gmra.mrb[12].mxu0 %v4102_v45  ;;  %v4176_v45 = vpack.c.bf16 %v11226_v4, %v11222_v8  ;;  %v9017_v8 = vld [vmem:[%s11037_s10 + $0x178] sm:$0xff]   ;;  %8243 = vmatpush3.bf16.msra.mxu1 %v9016_v29  ;;  %v9018_v4 = vld [vmem:[%s11037_s10 + $0x1f0] sm:$0xff]  }
 0x269   : >> { %5008 = vmatprep.mubr.bf16.mxu0 %v4127_v23  ;;  %8193 = vmatpush3.bf16.msra.mxu0 %v9014_v21  ;;  %v11338_v23 = vld [vmem:[#allocation2 + $0x58] sm:$0xff]  ;;  %v4207_v21 = vld [vmem:[#allocation2 + $0xe] sm:$0xff] }
 0x26a   : >> { %5082 = vmatmul.mubr.bf16.gmra.mrb[12].mxu1 %v4150_v61  ;;  %v11336_v61 = vld [vmem:[#allocation2 + $0x50] sm:$0xff]  ;;  %8194 = vmatprep.subr.bf16.mxu0 %v9017_v8 }
 0x26b   : >> { %5089 = vmatprep.mubr.bf16.mxu1 %v4175_v49  ;;  %v11342_v49 = vld [vmem:[#allocation2 + $0x5a] sm:$0xff]  ;;  %v4104_v60 = vpack.c.bf16 %v11338_v23, %v11336_v61  ;;  %8244 = vmatprep.subr.bf16.mxu1 %v9018_v4  ;;  %v4183_v29 = vld [vmem:[#allocation2 + $0xd] sm:$0xff] }
 0x26c   : >> { %8245 = vmatpush3.bf16.msra.mxu1 %v9020_v59  ;;  %v4184_v8 = vld [vmem:[#allocation2 + $0x15] sm:$0xff]  ;;  %v9023_v4 = vld [vmem:[%s11037_s10 + $0x200] sm:$0xff]  }
 0x26d   : >> { %8195 = vmatpush3.bf16.msra.mxu0 %v9019_v32  ;;  %8246 = vmatprep.subr.bf16.mxu1 %v9021_v51  ;;  %v4209_v32 = vld [vmem:[#allocation2 + $0x1e] sm:$0xff]  ;;  %v4210_v59 = vld [vmem:[#allocation2 + $0x26] sm:$0xff]  ;;  %v4195_v17 = vpack.c.bf16 %v4184_v8, %v4183_v29 }
 0x26e   : >> { %8548 = vmatprep.subr.bf16.mxu0 %v9023_v4  ;;  %v4220_v35 = vpack.c.bf16 %v4210_v59, %v4209_v32  ;;  %v4186_v51 = vld [vmem:[#allocation2 + $0x25] sm:$0xff]  ;;  %v4245_v32 = vpack.c.bf16 %v11310_v56, %v11282_v10  ;;  %v4270_v59 = vpack.c.bf16 %v11327_v28, %v11302_v5  ;;  %v4246_v56 = vpack.c.bf16 %v11336_v61, %v11312_v39  ;;  %v4192_v5 = vld [vmem:[#allocation2 + $0x55] sm:$0xff]  ;;  %v4193_v61 = vld [vmem:[#allocation2 + $0x5d] sm:$0xff] }
 0x26f   : >> { %v4214_v29 = vld [vmem:[#allocation2 + $0x46] sm:$0xff] }
 0x270   : >> { %5009 = vmatmul.mubr.bf16.gmra.mrb[16].mxu0 %v4103_v41  ;;  %v4152_v41 = vpack.c.bf16 %v11342_v49, %v11340_v44  ;;  %v9027_v8 = vld [vmem:[%s11037_s10 + $0x220] sm:$0xff]  }
 0x271   : >> { %5016 = vmatprep.mubr.bf16.mxu0 %v4128_v33  ;;  %v9022_v33 = vld [vmem:[%s11037_s10 + $0x1b8] sm:$0xff]  }
 0x272   : >> { %5090 = vmatmul.mubr.bf16.gmra.mrb[16].mxu1 %v4151_v55  ;;  %v4208_v55 = vld [vmem:[#allocation2 + $0x16] sm:$0xff] }
 0x273   : >> { %5097 = vmatprep.mubr.bf16.mxu1 %v4176_v45  ;;  %v4219_v45 = vpack.c.bf16 %v4208_v55, %v4207_v21  ;;  %8247 = vmatpush3.bf16.msra.mxu1 %v9022_v33  ;;  %v9025_v21 = vld [vmem:[%s11037_s10 + $0x210] sm:$0xff]   ;;  %v4213_v33 = vld [vmem:[#allocation2 + $0x3e] sm:$0xff] }
 0x274   : >> { %v4211_v55 = vld [vmem:[#allocation2 + $0x2e] sm:$0xff]  ;;  %v4222_v18 = vpack.c.bf16 %v4214_v29, %v4213_v33 }
 0x275   : >> { %v4242_v29 = vld [vmem:[#allocation2 + $0x70] sm:$0xff] }
 0x278   : >> { %5017 = vmatmul.mubr.bf16.gmra.mrb[20].mxu0 %v4104_v60  ;;  %v4268_v60 = vpack.c.bf16 %v11271_v7, %v11250_v20  ;;  %v4269_v20 = vpack.c.bf16 %v11300_v63, %v11273_v12  ;;  %v4188_v7 = vld [vmem:[#allocation2 + $0x35] sm:$0xff]  ;;  %v4189_v12 = vld [vmem:[#allocation2 + $0x3d] sm:$0xff]  ;;  %v4190_v63 = vld [vmem:[#allocation2 + $0x45] sm:$0xff] }
 0x279   : >> { %5138 = vmatprep.mubr.bf16.mxu0 %v4219_v45 }
 0x27a   : >> { %5098 = vmatmul.mubr.bf16.gmra.mrb[20].mxu1 %v4152_v41  ;;  %v4185_v41 = vld [vmem:[#allocation2 + $0x1d] sm:$0xff] }
 0x27b   : >> { %5219 = vmatprep.mubr.bf16.mxu1 %v4267_v6  ;;  %v4212_v6 = vld [vmem:[#allocation2 + $0x36] sm:$0xff]  ;;  %v4196_v45 = vpack.c.bf16 %v4186_v51, %v4185_v41  ;;  %v4264_v41 = vld [vmem:[#allocation2 + $0x61] sm:$0xff]  ;;  %v4198_v51 = vpack.c.bf16 %v4190_v63, %v4189_v12  ;;  %v4289_v12 = vld [vmem:[#allocation2 + $0x6a] sm:$0xff] }
 0x27c   : >> { %v4221_v42 = vpack.c.bf16 %v4212_v6, %v4211_v55  ;;  %v4191_v55 = vld [vmem:[#allocation2 + $0x4d] sm:$0xff]  ;;  %v4271_v28 = vpack.c.bf16 %v4264_v41, %v11329_v37  ;;  %v4217_v6 = vld [vmem:[#allocation2 + $0x5e] sm:$0xff] }
 0x27d   : >> { %v4241_v37 = vld [vmem:[#allocation2 + $0x68] sm:$0xff]  ;;  %v4290_v63 = vld [vmem:[#allocation2 + $0x72] sm:$0xff] }
 0x27e   : >> { %v9044_v41 = vld [vmem:[%s11037_s10 + $0x310] sm:$0xff]  }
 0x280   : >> { %5139 = vmatmul.mubr.bf16.vlgmr.msra.gmra.mrb[24].mxu0 %v4195_v17  ;;  %v9026_v17 = vld [vmem:[%s11037_s10 + $0x218] sm:$0xff]  }
 0x281   : >> { %8549 = vmatpush3.bf16.msra.mxu0 %v9023_v4  ;;  %5146 = vmatprep.mubr.bf16.mxu0 %v4220_v35  ;;  %v4187_v35 = vld [vmem:[#allocation2 + $0x2d] sm:$0xff] }
 0x282   : >> { %5220 = vmatmul.mubr.bf16.vlgmr.msra.gmra.mrb[24].mxu1 %v4243_v34  ;;  %8550 = vmatprep.subr.bf16.mxu0 %v9024_v31  ;;  %v4197_v4 = vpack.c.bf16 %v4188_v7, %v4187_v35  ;;  %v4215_v34 = vld [vmem:[#allocation2 + $0x4e] sm:$0xff]  ;;  %v4194_v7 = vld [vmem:[#allocation2 + $0x65] sm:$0xff] }
 0x283   : >> { %5227 = vmatprep.mubr.bf16.mxu1 %v4268_v60  ;;  %v9029_v60 = vld [vmem:[%s11037_s10 + $0x230] sm:$0xff]  }
 0x285   : >> { %8551 = vmatpush3.bf16.msra.mxu0 %v9024_v31  ;;  %v4216_v31 = vld [vmem:[#allocation2 + $0x56] sm:$0xff] }
 0x286   : >> { %8552 = vmatprep.subr.bf16.mxu0 %v9025_v21  ;;  %v4223_v10 = vpack.c.bf16 %v4216_v31, %v4215_v34  ;;  %v9035_v34 = vld [vmem:[%s11037_s10 + $0x290] sm:$0xff]  }
 0x287   : >> { %v9036_v31 = vld [vmem:[%s11037_s10 + $0x250] sm:$0xff]  }
 0x288   : >> { %5147 = vmatmul.mubr.bf16.gmra.mrb[28].mxu0 %v4196_v45  ;;  %v4218_v45 = vld [vmem:[#allocation2 + $0x66] sm:$0xff] }
 0x289   : >> { %8553 = vmatpush3.bf16.msra.mxu0 %v9025_v21  ;;  %5154 = vmatprep.mubr.bf16.mxu0 %v4221_v42  ;;  %v9030_v21 = vld [vmem:[%s11037_s10 + $0x238] sm:$0xff]   ;;  %v4240_v42 = vld [vmem:[#allocation2 + $0x60] sm:$0xff]  ;;  %v4224_v35 = vpack.c.bf16 %v4218_v45, %v4217_v6 }
 0x28a   : >> { %5228 = vmatmul.mubr.bf16.gmra.mrb[28].mxu1 %v4244_v27  ;;  %8554 = vmatprep.subr.bf16.mxu0 %v9026_v17  ;;  %v4265_v27 = vld [vmem:[#allocation2 + $0x69] sm:$0xff]  ;;  %v4247_v39 = vpack.c.bf16 %v4240_v42, %v11338_v23  ;;  %v4292_v23 = vpack.c.bf16 %v11288_v19, %v11263_v46  ;;  %v4296_v46 = vpack.c.bf16 %v4290_v63, %v4289_v12  ;;  %v9031_v19 = vld [vmem:[%s11037_s10 + $0x280] sm:$0xff]  }
 0x28b   : >> { %5235 = vmatprep.mubr.bf16.mxu1 %v4269_v20  ;;  %v4199_v20 = vpack.c.bf16 %v4192_v5, %v4191_v55  ;;  %8298 = vmatprep.subr.bf16.mxu1 %v9031_v19  ;;  %v9043_v55 = vld [vmem:[%s11037_s10 + $0x2a0] sm:$0xff]   ;;  %v9055_v19 = vld [vmem:[%s11037_s10 + $0x270] sm:$0xff]  }
 0x28c   : >> { %v9045_v5 = vld [vmem:[%s11037_s10 + $0x260] sm:$0xff]  }
 0x28d   : >> { %8555 = vmatpush3.bf16.msra.mxu0 %v9026_v17  ;;  %v4266_v17 = vld [vmem:[#allocation2 + $0x71] sm:$0xff]  ;;  %v9051_v6 = vld [vmem:[%s11037_s10 + $0x320] sm:$0xff]  }
 0x28e   : >> { %8556 = vmatprep.subr.bf16.mxu0 %v9027_v8  ;;  %v4272_v33 = vpack.c.bf16 %v4266_v17, %v4265_v27  ;;  %v9052_v45 = vld [vmem:[%s11037_s10 + $0x2e0] sm:$0xff]  }
 0x28f   : >> { %v11416_v27 = vld [vmem:[%s11412_s14] ss:$0 sm:$0xff] }
 0x290   : >> { %5155 = vmatmul.mubr.bf16.gmra.mrb[32].mxu0 %v4197_v4  ;;  %v4291_v4 = vpack.c.bf16 %v11261_v36, %v11242_v62  ;;  %v4294_v62 = vpack.c.bf16 %v11340_v44, %v11316_v52  ;;  %v9034_v52 = vld [vmem:[%s11037_s10 + $0x248] sm:$0xff]   ;;  %v9037_v44 = vld [vmem:[%s11037_s10 + $0x300] sm:$0xff]  }
 0x291   : >> { %5162 = vmatprep.mubr.bf16.mxu0 %v4222_v18  ;;  %8557 = vmatpush3.bf16.msra.mxu0 %v9027_v8  ;;  %v4200_v8 = vpack.c.bf16 %v4194_v7, %v4193_v61  ;;  %v4293_v18 = vpack.c.bf16 %v11314_v58, %v11290_v57  ;;  %v9032_v57 = vld [vmem:[%s11037_s10 + $0x240] sm:$0xff]   ;;  %v9033_v58 = vld [vmem:[%s11037_s10 + $0x288] sm:$0xff]  }
 0x292   : >> { %5236 = vmatmul.mubr.bf16.gmra.mrb[32].mxu1 %v4245_v32  ;;  %8558 = vmatprep.subr.bf16.mxu0 %v9028_v15  ;;  %v4288_v32 = vld [vmem:[#allocation2 + $0x62] sm:$0xff] }
 0x293   : >> { %5243 = vmatprep.mubr.bf16.mxu1 %v4270_v59  ;;  %v4295_v36 = vpack.c.bf16 %v4288_v32, %v11342_v49  ;;  %8299 = vmatpush3.bf16.msra.mxu1 %v9032_v57  ;;  %v9038_v49 = vld [vmem:[%s11037_s10 + $0x2c0] sm:$0xff]   ;;  %v9041_v59 = vld [vmem:[%s11037_s10 + $0x308] sm:$0xff]   ;;  %v9058_v57 = vld [vmem:[%s11037_s10 + $0x2f0] sm:$0xff]  }
 0x294   : >> { %8300 = vmatprep.subr.bf16.mxu1 %v9033_v58  ;;  %v9049_v7 = vld [vmem:[%s11037_s10 + $0x2a8] sm:$0xff]   ;;  %v9059_v58 = vld [vmem:[%s11037_s10 + $0x2b8] sm:$0xff]  }
 0x295   : >> { %8559 = vmatpush3.bf16.msra.mxu0 %v9028_v15  ;;  %v4248_v15 = vpack.c.bf16 %v4242_v29, %v4241_v37 }
 0x296   : >> { %8560 = vmatprep.subr.bf16.mxu0 %v9029_v60 }
 0x297   : >> { %8301 = vmatpush3.bf16.msra.mxu1 %v9034_v52  ;;  %v9061_v52 = vld [vmem:[%s11037_s10 + $0x338] sm:$0xff]  }
 0x298   : >> { %5163 = vmatmul.mubr.bf16.gmra.mrb[36].mxu0 %v4198_v51  ;;  %8302 = vmatprep.subr.bf16.mxu1 %v9035_v34  ;;  %v9046_v51 = vld [vmem:[%s11037_s10 + $0x2d0] sm:$0xff]  }
 0x299   : >> { %5170 = vmatprep.mubr.bf16.mxu0 %v4223_v10  ;;  %8561 = vmatpush3.bf16.msra.mxu0 %v9029_v60  ;;  %v9042_v60 = vld [vmem:[%s11037_s10 + $0x2c8] sm:$0xff]   ;;  %v9040_v10 = vld [vmem:[%s11037_s10 + $0x258] sm:$0xff]  }
 0x29a   : >> { %5244 = vmatmul.mubr.bf16.gmra.mrb[36].mxu1 %v4246_v56  ;;  %8562 = vmatprep.subr.bf16.mxu0 %v9030_v21  ;;  %v9047_v56 = vld [vmem:[%s11037_s10 + $0x318] sm:$0xff]  }
 0x29b   : >> { %5251 = vmatprep.mubr.bf16.mxu1 %v4271_v28  ;;  %8303 = vmatpush3.bf16.msra.mxu1 %v9036_v31  ;;  %v9048_v28 = vld [vmem:[%s11037_s10 + $0x2d8] sm:$0xff]  }
 0x29c   : >> { %v9060_v31 = vld [vmem:[%s11037_s10 + $0x278] sm:$0xff]  }
 0x29d   : >> { %8563 = vmatpush3.bf16.msra.mxu0 %v9030_v21  ;;  %v9039_v21 = vld [vmem:[%s11037_s10 + $0x298] sm:$0xff]  }
 0x29e   : >> { %8350 = vmatprep.subr.bf16.mxu0 %v9037_v44  ;;  %8304 = vmatprep.subr.bf16.mxu1 %v9039_v21 }
 0x29f   : >> { %8305 = vmatpush3.bf16.msra.mxu1 %v9040_v10 }
 0x2a0   : >> { %5171 = vmatmul.mubr.bf16.gmra.mrb[40].mxu0 %v4199_v20  ;;  %8306 = vmatprep.subr.bf16.mxu1 %v9043_v55  ;;  %v9054_v20 = vld [vmem:[%s11037_s10 + $0x328] sm:$0xff]  }
 0x2a1   : >> { %5178 = vmatprep.mubr.bf16.mxu0 %v4224_v35 }
 0x2a2   : >> { %5252 = vmatmul.mubr.bf16.gmra.mrb[40].mxu1 %v4247_v39 }
 0x2a3   : >> { %5259 = vmatprep.mubr.bf16.mxu1 %v4272_v33  ;;  %8307 = vmatpush3.bf16.msra.mxu1 %v9045_v5  ;;  %v9056_v33 = vld [vmem:[%s11037_s10 + $0x2e8] sm:$0xff]  }
 0x2a4   : >> { %8308 = vmatprep.subr.bf16.mxu1 %v9049_v7 }
 0x2a8   : >> { %5179 = vmatmul.mubr.bf16.gmra.mrb[44].mxu0 %v4200_v8  ;;  %v9050_v8 = vld [vmem:[%s11037_s10 + $0x268] sm:$0xff]  }
 0x2a9   : >> { %8564 = vmatprep.mubr.bf16.mxu0 %v4291_v4  ;;  %8309 = vmatpush3.bf16.msra.mxu1 %v9050_v8 }
 0x2aa   : >> { %5260 = vmatmul.mubr.bf16.gmra.mrb[44].mxu1 %v4248_v15 }
 0x2b0   : >> { %8565 = vmatmul.mubr.bf16.vlgmr.msra.gmra.mrb[48].mxu0 %v4292_v23 }
 0x2b1   : >> { %8568 = vmatprep.mubr.bf16.mxu0 %v4293_v18  ;;  %8351 = vmatpush3.bf16.msra.mxu0 %v9038_v49 }
 0x2b2   : >> { %8352 = vmatprep.subr.bf16.mxu0 %v9041_v59  ;;  %v9062_v59 = vld [vmem:[%s11037_s10 + $0x2f8] sm:$0xff]  }
 0x2b5   : >> { %8353 = vmatpush3.bf16.msra.mxu0 %v9042_v60 }
 0x2b6   : >> { %8354 = vmatprep.subr.bf16.mxu0 %v9044_v41 }
 0x2b8   : >> { %8569 = vmatmul.mubr.bf16.gmra.mrb[52].mxu0 %v4294_v62  ;;  %v9057_v62 = vld [vmem:[%s11037_s10 + $0x330] sm:$0xff]  }
 0x2b9   : >> { %8572 = vmatprep.mubr.bf16.mxu0 %v4295_v36  ;;  %8355 = vmatpush3.bf16.msra.mxu0 %v9046_v51 }
 0x2ba   : >> { %8356 = vmatprep.subr.bf16.mxu0 %v9047_v56 }
 0x2bd   : >> { %8357 = vmatpush3.bf16.msra.mxu0 %v9048_v28 }
 0x2be   : >> { %8358 = vmatprep.subr.bf16.mxu0 %v9051_v6 }
 0x2c0   : >> { %8573 = vmatmul.mubr.bf16.gmra.mrb[56].mxu0 %v4296_v46  ;;  %v9053_v46 = vld [vmem:[%s11037_s10 + $0x2b0] sm:$0xff]  }
 0x2c1   : >> { %8359 = vmatpush3.bf16.msra.mxu0 %v9052_v45  ;;  %8310 = vmatprep.subr.bf16.mxu1 %v9053_v46  ;;  %v9063_v45 = vld [vmem:[%s11037_s10 + $0x380] sm:$0xff]  }
 0x2c2   : >> { %8360 = vmatprep.subr.bf16.mxu0 %v9054_v20  ;;  %8311 = vmatpush3.bf16.msra.mxu1 %v9055_v19 }
 0x2c3   : >> { %8312 = vmatprep.subr.bf16.mxu1 %v9059_v58 }
 0x2c5   : >> { %8361 = vmatpush3.bf16.msra.mxu0 %v9056_v33 }
 0x2c6   : >> { %8362 = vmatprep.subr.bf16.mxu0 %v9057_v62  ;;  %8313 = vmatpush3.bf16.msra.mxu1 %v9060_v31 }
 0x2c7   : >> { %8402 = vmatprep.subr.bf16.mxu1 %v9063_v45 }
 0x2c9   : >> { %8363 = vmatpush3.bf16.msra.mxu0 %v9058_v57 }
 0x2ca   : >> { %8364 = vmatprep.subr.bf16.mxu0 %v9061_v52 }
 0x2cd   : >> { %8365 = vmatpush3.bf16.msra.mxu0 %v9062_v59 }
 0x323   : >> { %v8092_v42 = vpop.f32.mrb[0].mxu0 }
 0x324   : >> { %v8093_v17 = vpop.f32.mrb[1].mxu0 }
 0x325   : >> { %v8094_v35 = vadd.f32 %v8093_v17, %v8092_v42  ;;  %v8095_v39 = vpop.f32.mrb[2].mxu0  ;;  %v8144_v61 = vpop.f32.mrb[0].mxu1 }
 0x326   : >> { %v8096_v37 = vpop.f32.mrb[3].mxu0  ;;  %v8145_v29 = vpop.f32.mrb[1].mxu1 }
 0x327   : >> { %v4979_v4 = vadd.f32 %v8094_v35, %v11416_v27  ;;  %v8097_v15 = vadd.f32 %v8096_v37, %v8095_v39  ;;  %v8146_v23 = vadd.f32 %v8145_v29, %v8144_v61  ;;  %v8147_v18 = vpop.f32.mrb[2].mxu1 }
 0x328   : >> { %v8148_v32 = vpop.f32.mrb[3].mxu1 }
 0x329   : >> { %v4982_v36 = vadd.f32 %v8097_v15, %v11416_v27  ;;  %v11425_v12 = vadd.f32 %v8146_v23, %v4979_v4  ;;  %v8149_v63 = vadd.f32 %v8148_v32, %v8147_v18 }
 0x32b   : >> { %v11432_v44 = vadd.f32 %v8149_v63, %v4982_v36  ;;  %v8098_v49 = vpop.f32.mrb[4].mxu0 }
 0x32c   : >> { %v8099_v34 = vpop.f32.mrb[5].mxu0 }
 0x32d   : >> { %v8100_v60 = vadd.f32 %v8099_v34, %v8098_v49  ;;  %v8101_v41 = vpop.f32.mrb[6].mxu0  ;;  %v8150_v51 = vpop.f32.mrb[4].mxu1 }
 0x32e   : >> { %v8102_v21 = vpop.f32.mrb[7].mxu0  ;;  %v8151_v10 = vpop.f32.mrb[5].mxu1 }
 0x32f   : >> { %v4987_v56 = vadd.f32 %v8100_v60, %v11416_v27  ;;  %v8103_v55 = vadd.f32 %v8102_v21, %v8101_v41  ;;  %v8152_v5 = vadd.f32 %v8151_v10, %v8150_v51  ;;  %v8153_v28 = vpop.f32.mrb[6].mxu1  ;;  %v9069_v10 = vld [vmem:[%s11037_s10 + $0x400] sm:$0xff]  }
 0x330   : >> { %v8154_v6 = vpop.f32.mrb[7].mxu1  ;;  %8454 = vmatprep.subr.bf16.mxu0 %v9069_v10 }
 0x331   : >> { %v4990_v42 = vadd.f32 %v8103_v55, %v11416_v27  ;;  %v11439_v17 = vadd.f32 %v8152_v5, %v4987_v56  ;;  %v8155_v20 = vadd.f32 %v8154_v6, %v8153_v28 }
 0x333   : >> { %v11441_v35 = vadd.f32 %v8155_v20, %v4990_v42  ;;  %v8104_v39 = vpop.f32.mrb[8].mxu0 }
 0x334   : >> { %v8105_v61 = vpop.f32.mrb[9].mxu0 }
 0x335   : >> { %v8106_v7 = vadd.f32 %v8105_v61, %v8104_v39  ;;  %v8107_v33 = vpop.f32.mrb[10].mxu0  ;;  %v8156_v37 = vpop.f32.mrb[8].mxu1 }
 0x336   : >> { %v8108_v29 = vpop.f32.mrb[11].mxu0  ;;  %v8157_v8 = vpop.f32.mrb[9].mxu1 }
 0x337   : >> { %v4995_v4 = vadd.f32 %v8106_v7, %v11416_v27  ;;  %v8109_v15 = vadd.f32 %v8108_v29, %v8107_v33  ;;  %v8158_v23 = vadd.f32 %v8157_v8, %v8156_v37  ;;  %v8159_v18 = vpop.f32.mrb[10].mxu1 }
 0x338   : >> { %v8160_v32 = vpop.f32.mrb[11].mxu1 }
 0x339   : >> { %v4998_v62 = vadd.f32 %v8109_v15, %v11416_v27  ;;  %v11445_v36 = vadd.f32 %v8158_v23, %v4995_v4  ;;  %v8161_v63 = vadd.f32 %v8160_v32, %v8159_v18 }
 0x33b   : >> { %v11447_v46 = vadd.f32 %v8161_v63, %v4998_v62  ;;  %v8110_v19 = vpop.f32.mrb[12].mxu0 }
 0x33c   : >> { %v8111_v57 = vpop.f32.mrb[13].mxu0 }
 0x33d   : >> { %v8112_v58 = vadd.f32 %v8111_v57, %v8110_v19  ;;  %v8113_v52 = vpop.f32.mrb[14].mxu0  ;;  %v8162_v49 = vpop.f32.mrb[12].mxu1 }
 0x33e   : >> { %v8114_v59 = vpop.f32.mrb[15].mxu0  ;;  %v8163_v34 = vpop.f32.mrb[13].mxu1 }
 0x33f   : >> { %v5003_v31 = vadd.f32 %v8112_v58, %v11416_v27  ;;  %v8115_v60 = vadd.f32 %v8114_v59, %v8113_v52  ;;  %v8164_v41 = vadd.f32 %v8163_v34, %v8162_v49  ;;  %v8165_v51 = vpop.f32.mrb[14].mxu1 }
 0x340   : >> { %v8166_v21 = vpop.f32.mrb[15].mxu1 }
 0x341   : >> { %v5006_v56 = vadd.f32 %v8115_v60, %v11416_v27  ;;  %v11452_v55 = vadd.f32 %v8164_v41, %v5003_v31  ;;  %v8167_v5 = vadd.f32 %v8166_v21, %v8165_v51 }
 0x343   : >> { %v11454_v28 = vadd.f32 %v8167_v5, %v5006_v56  ;;  %v8116_v6 = vpop.f32.mrb[16].mxu0 }
 0x344   : >> { %v8117_v45 = vpop.f32.mrb[17].mxu0 }
 0x345   : >> { %v8118_v42 = vadd.f32 %v8117_v45, %v8116_v6  ;;  %v8119_v20 = vpop.f32.mrb[18].mxu0  ;;  %v8168_v39 = vpop.f32.mrb[16].mxu1 }
 0x346   : >> { %v8120_v61 = vpop.f32.mrb[19].mxu0  ;;  %v8169_v7 = vpop.f32.mrb[17].mxu1 }
 0x347   : >> { %v5011_v33 = vadd.f32 %v8118_v42, %v11416_v27  ;;  %v8121_v37 = vadd.f32 %v8120_v61, %v8119_v20  ;;  %v8170_v29 = vadd.f32 %v8169_v7, %v8168_v39  ;;  %v8171_v8 = vpop.f32.mrb[18].mxu1 }
 0x348   : >> { %v8172_v4 = vpop.f32.mrb[19].mxu1 }
 0x349   : >> { %v5014_v15 = vadd.f32 %v8121_v37, %v11416_v27  ;;  %v11458_v23 = vadd.f32 %v8170_v29, %v5011_v33  ;;  %v8173_v18 = vadd.f32 %v8172_v4, %v8171_v8 }
 0x34b   : >> { %v11460_v32 = vadd.f32 %v8173_v18, %v5014_v15  ;;  %v8122_v62 = vpop.f32.mrb[20].mxu0 }
 0x34c   : >> { %v8123_v63 = vpop.f32.mrb[21].mxu0 }
 0x34d   : >> { %v8124_v19 = vadd.f32 %v8123_v63, %v8122_v62  ;;  %v8125_v57 = vpop.f32.mrb[22].mxu0  ;;  %v8174_v58 = vpop.f32.mrb[20].mxu1 }
 0x34e   : >> { %v8126_v52 = vpop.f32.mrb[23].mxu0  ;;  %v8175_v49 = vpop.f32.mrb[21].mxu1 }
 0x34f   : >> { %v5019_v59 = vadd.f32 %v8124_v19, %v11416_v27  ;;  %v8127_v34 = vadd.f32 %v8126_v52, %v8125_v57  ;;  %v8176_v31 = vadd.f32 %v8175_v49, %v8174_v58  ;;  %v8177_v60 = vpop.f32.mrb[22].mxu1 }
 0x350   : >> { %v8178_v41 = vpop.f32.mrb[23].mxu1 }
 0x351   : >> { %v5022_v51 = vadd.f32 %v8127_v34, %v11416_v27  ;;  %v11464_v21 = vadd.f32 %v8176_v31, %v5019_v59  ;;  %v8179_v10 = vadd.f32 %v8178_v41, %v8177_v60 }
 0x353   : >> { %v11466_v56 = vadd.f32 %v8179_v10, %v5022_v51  ;;  %v8196_v5 = vpop.f32.mrb[24].mxu0 }
 0x354   : >> { %v8197_v6 = vpop.f32.mrb[25].mxu0 }
 0x355   : >> { %v8198_v45 = vadd.f32 %v8197_v6, %v8196_v5  ;;  %v8199_v42 = vpop.f32.mrb[26].mxu0  ;;  %v8248_v20 = vpop.f32.mrb[24].mxu1 }
 0x356   : >> { %v8200_v39 = vpop.f32.mrb[27].mxu0  ;;  %v8249_v61 = vpop.f32.mrb[25].mxu1 }
 0x357   : >> { %v5141_v7 = vadd.f32 %v8198_v45, %v11425_v12  ;;  %v8201_v33 = vadd.f32 %v8200_v39, %v8199_v42  ;;  %v8250_v37 = vadd.f32 %v8249_v61, %v8248_v20  ;;  %v8251_v29 = vpop.f32.mrb[26].mxu1 }
 0x358   : >> { %v8252_v8 = vpop.f32.mrb[27].mxu1 }
 0x359   : >> { %v5144_v27 = vadd.f32 %v8201_v33, %v11432_v44  ;;  %v8253_v4 = vadd.f32 %v8252_v8, %v8251_v29  ;;  %v11470_v15 = vadd.f32 %v8250_v37, %v5141_v7 }
 0x35b   : >> { %v8202_v18 = vpop.f32.mrb[28].mxu0  ;;  %v11472_v62 = vadd.f32 %v8253_v4, %v5144_v27 }
 0x35c   : >> { %v8203_v63 = vpop.f32.mrb[29].mxu0 }
 0x35d   : >> { %v8204_v19 = vadd.f32 %v8203_v63, %v8202_v18  ;;  %v8205_v57 = vpop.f32.mrb[30].mxu0  ;;  %v8254_v58 = vpop.f32.mrb[28].mxu1 }
 0x35e   : >> { %v8206_v52 = vpop.f32.mrb[31].mxu0  ;;  %v8255_v49 = vpop.f32.mrb[29].mxu1 }
 0x35f   : >> { %v5149_v12 = vadd.f32 %v8204_v19, %v11439_v17  ;;  %v8207_v59 = vadd.f32 %v8206_v52, %v8205_v57  ;;  %v8256_v34 = vadd.f32 %v8255_v49, %v8254_v58  ;;  %v8257_v31 = vpop.f32.mrb[30].mxu1 }
 0x360   : >> { %v8258_v60 = vpop.f32.mrb[31].mxu1 }
 0x361   : >> { %v5152_v44 = vadd.f32 %v8207_v59, %v11441_v35  ;;  %v8259_v41 = vadd.f32 %v8258_v60, %v8257_v31  ;;  %v11476_v51 = vadd.f32 %v8256_v34, %v5149_v12 }
 0x363   : >> { %v8208_v10 = vpop.f32.mrb[32].mxu0  ;;  %v11478_v5 = vadd.f32 %v8259_v41, %v5152_v44 }
 0x364   : >> { %v8209_v6 = vpop.f32.mrb[33].mxu0 }
 0x365   : >> { %v8210_v45 = vadd.f32 %v8209_v6, %v8208_v10  ;;  %v8211_v42 = vpop.f32.mrb[34].mxu0  ;;  %v8260_v20 = vpop.f32.mrb[32].mxu1 }
 0x366   : >> { %v8212_v39 = vpop.f32.mrb[35].mxu0  ;;  %v8261_v61 = vpop.f32.mrb[33].mxu1 }
 0x367   : >> { %v5157_v17 = vadd.f32 %v8210_v45, %v11445_v36  ;;  %v8213_v7 = vadd.f32 %v8212_v39, %v8211_v42  ;;  %v8262_v33 = vadd.f32 %v8261_v61, %v8260_v20  ;;  %v8263_v37 = vpop.f32.mrb[34].mxu1 }
 0x368   : >> { %v8264_v29 = vpop.f32.mrb[35].mxu1 }
 0x369   : >> { %v5160_v35 = vadd.f32 %v8213_v7, %v11447_v46  ;;  %v8265_v8 = vadd.f32 %v8264_v29, %v8263_v37  ;;  %v11482_v27 = vadd.f32 %v8262_v33, %v5157_v17 }
 0x36b   : >> { %v8214_v4 = vpop.f32.mrb[36].mxu0  ;;  %v11484_v18 = vadd.f32 %v8265_v8, %v5160_v35 }
 0x36c   : >> { %v8215_v63 = vpop.f32.mrb[37].mxu0 }
 0x36d   : >> { %v8216_v19 = vadd.f32 %v8215_v63, %v8214_v4  ;;  %v8217_v57 = vpop.f32.mrb[38].mxu0  ;;  %v8266_v58 = vpop.f32.mrb[36].mxu1 }
 0x36e   : >> { %v8218_v52 = vpop.f32.mrb[39].mxu0  ;;  %v8267_v49 = vpop.f32.mrb[37].mxu1 }
 0x36f   : >> { %v5165_v36 = vadd.f32 %v8216_v19, %v11452_v55  ;;  %v8219_v12 = vadd.f32 %v8218_v52, %v8217_v57  ;;  %v8268_v59 = vadd.f32 %v8267_v49, %v8266_v58  ;;  %v8269_v34 = vpop.f32.mrb[38].mxu1 }
 0x370   : >> { %v8270_v31 = vpop.f32.mrb[39].mxu1 }
 0x371   : >> { %v5168_v46 = vadd.f32 %v8219_v12, %v11454_v28  ;;  %v8271_v60 = vadd.f32 %v8270_v31, %v8269_v34  ;;  %v11488_v44 = vadd.f32 %v8268_v59, %v5165_v36 }
 0x373   : >> { %v8220_v41 = vpop.f32.mrb[40].mxu0  ;;  %v11490_v10 = vadd.f32 %v8271_v60, %v5168_v46 }
 0x374   : >> { %v8221_v6 = vpop.f32.mrb[41].mxu0 }
 0x375   : >> { %v8222_v45 = vadd.f32 %v8221_v6, %v8220_v41  ;;  %v8223_v42 = vpop.f32.mrb[42].mxu0  ;;  %v8272_v20 = vpop.f32.mrb[40].mxu1 }
 0x376   : >> { %v8224_v39 = vpop.f32.mrb[43].mxu0  ;;  %v8273_v61 = vpop.f32.mrb[41].mxu1 }
 0x377   : >> { %v5173_v55 = vadd.f32 %v8222_v45, %v11458_v23  ;;  %v8225_v17 = vadd.f32 %v8224_v39, %v8223_v42  ;;  %v8274_v7 = vadd.f32 %v8273_v61, %v8272_v20  ;;  %v8275_v33 = vpop.f32.mrb[42].mxu1 }
 0x378   : >> { %v8276_v37 = vpop.f32.mrb[43].mxu1 }
 0x379   : >> { %v5176_v28 = vadd.f32 %v8225_v17, %v11460_v32  ;;  %v8277_v29 = vadd.f32 %v8276_v37, %v8275_v33  ;;  %v11494_v35 = vadd.f32 %v8274_v7, %v5173_v55 }
 0x37b   : >> { %v8226_v8 = vpop.f32.mrb[44].mxu0  ;;  %v11496_v4 = vadd.f32 %v8277_v29, %v5176_v28 }
 0x37c   : >> { %v8227_v63 = vpop.f32.mrb[45].mxu0 }
 0x37d   : >> { %v8228_v19 = vadd.f32 %v8227_v63, %v8226_v8  ;;  %v8229_v57 = vpop.f32.mrb[46].mxu0  ;;  %v8278_v58 = vpop.f32.mrb[44].mxu1 }
 0x37e   : >> { %v8230_v52 = vpop.f32.mrb[47].mxu0  ;;  %v8279_v49 = vpop.f32.mrb[45].mxu1 }
 0x37f   : >> { %v5181_v23 = vadd.f32 %v8228_v19, %v11464_v21  ;;  %v8231_v36 = vadd.f32 %v8230_v52, %v8229_v57  ;;  %v8280_v12 = vadd.f32 %v8279_v49, %v8278_v58  ;;  %v8281_v59 = vpop.f32.mrb[46].mxu1 }
 0x380   : >> { %v8282_v34 = vpop.f32.mrb[47].mxu1 }
 0x381   : >> { %v5184_v32 = vadd.f32 %v8231_v36, %v11466_v56  ;;  %v8283_v31 = vadd.f32 %v8282_v34, %v8281_v59  ;;  %v11500_v46 = vadd.f32 %v8280_v12, %v5181_v23 }
 0x383   : >> { %v8566_v60 = vpop.f32.mrb[48].mxu0  ;;  %v11502_v41 = vadd.f32 %v8283_v31, %v5184_v32 }
 0x384   : >> { %v5311_v6 = vadd.f32 %v8566_v60, %v11476_v51  ;;  %v5302_v45 = vpop.f32.mrb[49].mxu0 }
 0x385   : >> { %v5303_v42 = vadd.f32 %v5302_v45, %v11470_v15  ;;  %v8567_v20 = vpop.f32.mrb[50].mxu0 }
 0x386   : >> { %v5351_v39 = vmax.f32 %v5311_v6, 0.0  ;;  %v5314_v21 = vadd.f32 %v8567_v20, %v11478_v5  ;;  %v5305_v61 = vpop.f32.mrb[51].mxu0 }
 0x387   : >> { %v11507_v55 = vmax.f32 %v5303_v42, 0.0  ;;  %v5306_v56 = vadd.f32 %v5305_v61, %v11472_v62 }
 0x388   : >> { %v5376_v17 = vrot.slane %v5351_v39, 1  ;;  %v5352_v7 = vmax.f32 %v5314_v21, 0.0  ;;  %v5415_v33 = vrot.slane %v5351_v39, 5  ;;  %v5452_v37 = vrot.slane %v5351_v39, 7 }
 0x389   : >> { %v5373_v28 = vrot.slane %v11507_v55, 1  ;;  %v5350_v29 = vmax.f32 %v5306_v56, 0.0  ;;  %v5412_v51 = vrot.slane %v11507_v55, 5  ;;  %v5449_v19 = vrot.slane %v11507_v55, 7 }
 0x38a   : >> { %v5378_v8 = vrot.slane %v5352_v7, 1  ;;  %v5417_v15 = vrot.slane %v5352_v7, 5  ;;  %v5454_v63 = vrot.slane %v5352_v7, 7 }
 0x38b   : >> { %v5374_v5 = vrot.slane %v5350_v29, 1  ;;  %v5413_v57 = vrot.slane %v5350_v29, 5  ;;  %v5450_v58 = vrot.slane %v5350_v29, 7  ;;  %v8570_v52 = vpop.f32.mrb[52].mxu0 }
 0x38c   : >> { %v5379_v62 = vsel %vm3932_vm13, %v5376_v17, %v5378_v8  ;;  %v5418_v49 = vsel %vm3972_vm9, %v5415_v33, %v5417_v15  ;;  %v5455_v23 = vsel %vm4010_vm15, %v5452_v37, %v5454_v63  ;;  %v5327_v36 = vadd.f32 %v8570_v52, %v11488_v44  ;;  %v5318_v12 = vpop.f32.mrb[53].mxu0 }
 0x38d   : >> { %v5487_v59 = vsel %vm3893_vm6, %v5418_v49, %v5455_v23  ;;  %v11522_v34 = vsel %vm3932_vm13, %v5373_v28, %v5374_v5  ;;  %v5377_v32 = vsel %vm3932_vm13, %v5374_v5, %v5376_v17  ;;  %v5414_v31 = vsel %vm3972_vm9, %v5412_v51, %v5413_v57  ;;  %v8571_v60 = vpop.f32.mrb[54].mxu0 }
 0x38e   : >> { %v5416_v6 = vsel %vm3972_vm9, %v5413_v57, %v5415_v33  ;;  %v5451_v44 = vsel %vm4010_vm15, %v5449_v19, %v5450_v58  ;;  %v5453_v45 = vsel %vm4010_vm15, %v5450_v58, %v5452_v37  ;;  %v5355_v42 = vmax.f32 %v5327_v36, 0.0  ;;  %v5321_v20 = vpop.f32.mrb[55].mxu0 }
 0x38f   : >> { %v5485_v39 = vsel %vm3891_vm14, %v5414_v31, %v5451_v44  ;;  %v5486_v21 = vsel %vm3892_vm5, %v5416_v6, %v5453_v45  ;;  %v5319_v61 = vadd.f32 %v5318_v12, %v11482_v27  ;;  %v5330_v56 = vadd.f32 %v8571_v60, %v11490_v10 }
 0x390   : >> { %v11541_v17 = vsel %vm3879_vm12, %v5377_v32, %v5485_v39  ;;  %v11545_v7 = vsel %vm3880_vm0, %v5379_v62, %v5486_v21  ;;  %v5322_v10 = vadd.f32 %v5321_v20, %v11484_v18  ;;  %v5384_v37 = vrot.slane %v5355_v42, 1 }
 0x391   : >> { %5520 = vst [vmem:[#allocation2 - $0x4] sm:$0xf0] %v11541_v17  ;;  %5521 = vst [vmem:[#allocation2 + $0x4] sm:$0xff] %v11545_v7  ;;  %v5353_v33 = vmax.f32 %v5319_v61, 0.0  ;;  %v11551_v27 = vmax.f32 %v5330_v56, 0.0  ;;  %v5423_v29 = vrot.slane %v5355_v42, 5 }
 0x392   : >> { %5509 = vst [vmem:[#allocation2 + $0x14] sm:$0xff] %v11541_v17  ;;  %5510 = vst [vmem:[#allocation2 + $0x1c] sm:$0xff] %v11545_v7  ;;  %v5460_v5 = vrot.slane %v5355_v42, 7  ;;  %v5354_v12 = vmax.f32 %v5322_v10, 0.0 }
 0x393   : >> { %v5380_v57 = vrot.slane %v5353_v33, 1  ;;  %v5419_v58 = vrot.slane %v5353_v33, 5  ;;  %v5456_v52 = vrot.slane %v5353_v33, 7  ;;  %v5386_v62 = vrot.slane %v11551_v27, 1  ;;  %v8574_v49 = vpop.f32.mrb[56].mxu0 }
 0x394   : >> { %v5425_v23 = vrot.slane %v11551_v27, 5  ;;  %v5462_v36 = vrot.slane %v11551_v27, 7  ;;  %v5343_v32 = vadd.f32 %v8574_v49, %v11500_v46  ;;  %v5334_v31 = vpop.f32.mrb[57].mxu0  ;;  %v5458_v61 = vrot.slane %v5354_v12, 7 }
 0x395   : >> { %v5381_v60 = vsel %vm3932_vm13, %v5378_v8, %v5380_v57  ;;  %v5420_v18 = vsel %vm3972_vm9, %v5417_v15, %v5419_v58  ;;  %v5457_v6 = vsel %vm4010_vm15, %v5454_v63, %v5456_v52  ;;  %v5387_v44 = vsel %vm3932_vm13, %v5384_v37, %v5386_v62  ;;  %v8575_v45 = vpop.f32.mrb[58].mxu0 }
 0x396   : >> { %v5488_v42 = vsel %vm3894_vm10, %v5420_v18, %v5457_v6  ;;  %v11566_v20 = vsel %vm3881_vm2, %v5381_v60, %v5487_v59  ;;  %v5426_v39 = vsel %vm3972_vm9, %v5423_v29, %v5425_v23  ;;  %v5463_v46 = vsel %vm4010_vm15, %v5460_v5, %v5462_v36  ;;  %v5337_v21 = vpop.f32.mrb[59].mxu0 }
 0x397   : >> { %5511 = vst [vmem:[#allocation2 + $0x24] sm:$0xff] %v11566_v20  ;;  %v5491_v8 = vsel %vm3897_vm8, %v5426_v39, %v5463_v46  ;;  %v5382_v15 = vrot.slane %v5354_v12, 1  ;;  %v5421_v63 = vrot.slane %v5354_v12, 5  ;;  %v5359_v56 = vmax.f32 %v5343_v32, 0.0 }
 0x398   : >> { %v5335_v33 = vadd.f32 %v5334_v31, %v11494_v35  ;;  %v5346_v27 = vadd.f32 %v8575_v45, %v11502_v41  ;;  %v5338_v59 = vadd.f32 %v5337_v21, %v11496_v4  ;;  %v5459_v6 = vsel %vm4010_vm15, %v5456_v52, %v5458_v61 }
 0x399   : >> { %v5383_v10 = vsel %vm3932_vm13, %v5380_v57, %v5382_v15  ;;  %v5385_v49 = vsel %vm3932_vm13, %v5382_v15, %v5384_v37  ;;  %v5422_v60 = vsel %vm3972_vm9, %v5419_v58, %v5421_v63  ;;  %v5424_v18 = vsel %vm3972_vm9, %v5421_v63, %v5423_v29 }
 0x39a   : >> { %v5461_v39 = vsel %vm4010_vm15, %v5458_v61, %v5460_v5  ;;  %v11584_v12 = vsel %vm12028_vm3, %v5383_v10, %v5488_v42  ;;  %v5489_v35 = vsel %vm3895_vm4, %v5422_v60, %v5459_v6  ;;  %v5392_v41 = vrot.slane %v5359_v56, 1 }
 0x39b   : >> { %v5490_v4 = vsel %vm12029_vm7, %v5424_v18, %v5461_v39  ;;  %5512 = vst [vmem:[#allocation2 + $0x2c] sm:$0xff] %v11584_v12  ;;  %v5431_v37 = vrot.slane %v5359_v56, 5  ;;  %v11593_v29 = vsel %vm12030_vm11, %v5385_v49, %v5489_v35  ;;  %v5357_v57 = vmax.f32 %v5335_v33, 0.0 }
 0x39c   : >> { %v11597_v5 = vsel %vm12031_vm1, %v5387_v44, %v5490_v4  ;;  %v5360_v58 = vmax.f32 %v5346_v27, 0.0  ;;  %5513 = vst [vmem:[#allocation2 + $0x34] sm:$0xff] %v11593_v29  ;;  %v5468_v52 = vrot.slane %v5359_v56, 7  ;;  %v5358_v32 = vmax.f32 %v5338_v59, 0.0 }
 0x39d   : >> { %5514 = vst [vmem:[#allocation2 + $0x3c] sm:$0xff] %v11597_v5  ;;  %v5610_v31 = vpack.c.bf16 %v11566_v20, %v11545_v7  ;;  %v5611_v45 = vpack.c.bf16 %v11593_v29, %v11584_v12  ;;  %v5388_v42 = vrot.slane %v5357_v57, 1  ;;  %v5427_v46 = vrot.slane %v5357_v57, 5  ;;  %v9076_v7 = vld [vmem:[%s11037_s10 + $0x410] sm:$0xff]  }
 0x39e   : >> { %v5464_v21 = vrot.slane %v5357_v57, 7  ;;  %v5394_v15 = vrot.slane %v5360_v58, 1  ;;  %v5410_v44 = vrot.slane %v5360_v58, 5  ;;  %v5447_v63 = vrot.slane %v5360_v58, 7  ;;  %v11738_v12 = vld [vmem:[#allocation2 + $0x20] sm:$0xff] }
 0x39f   : >> { %v5390_v61 = vrot.slane %v5358_v32, 1  ;;  %v5429_v33 = vrot.slane %v5358_v32, 5  ;;  %v5389_v27 = vsel %vm3932_vm13, %v5386_v62, %v5388_v42  ;;  %v5428_v10 = vsel %vm3972_vm9, %v5425_v23, %v5427_v46 }
 0x3a0   : >> { %v5465_v56 = vsel %vm4010_vm15, %v5462_v36, %v5464_v21  ;;  %v5395_v59 = vsel %vm3932_vm13, %v5392_v41, %v5394_v15  ;;  %vm12032_vm3 = vcmp.eq.s32.totalorder %v10850_v9, 9  ;;  %vm12033_vm7 = vcmp.eq.s32.totalorder %v10845_v13, 0 }
 0x3a1   : >> { %v5492_v49 = vsel %vm12032_vm3, %v5428_v10, %v5465_v56  ;;  %v11613_v60 = vsel %vm12033_vm7, %v5389_v27, %v5491_v8  ;;  %v5409_v18 = vsel %vm3932_vm13, %v5394_v15, %v5373_v28  ;;  %v5433_v6 = vsel %vm3972_vm9, %v5431_v37, %v5410_v44  ;;  %v5549_v27 = vld [vmem:[#allocation2 + $0x1] sm:$0xff] }
 0x3a2   : >> { %5515 = vst [vmem:[#allocation2 + $0x44] sm:$0xff] %v11613_v60  ;;  %v5446_v62 = vsel %vm3972_vm9, %v5410_v44, %v5412_v51  ;;  %v5470_v23 = vsel %vm4010_vm15, %v5468_v52, %v5447_v63  ;;  %v5483_v36 = vsel %vm4010_vm15, %v5447_v63, %v5449_v19  ;;  %v5391_v8 = vsel %vm3932_vm13, %v5388_v42, %v5390_v61  ;;  %v11681_v10 = vld [vmem:[#allocation2 + $0x1a] sm:$0xff]  ;;  %v11711_v20 = vld [vmem:[#allocation2 + $0x29] sm:$0xff] }
 0x3a3   : >> { %vm12034_vm11 = vcmp.eq.s32.totalorder %v10796_v50, 9  ;;  %vm12035_vm1 = vcmp.eq.s32.totalorder %v10866_v43, 9  ;;  %v5393_v35 = vsel %vm3932_vm13, %v5390_v61, %v5392_v41  ;;  %v5430_v4 = vsel %vm3972_vm9, %v5427_v46, %v5429_v33  ;;  %v11673_v44 = vld [vmem:[#allocation2 + $0x32] sm:$0xff]  ;;  %v5525_v56 = vld [vmem:[#allocation2] sm:$0xff] }
 0x3a4   : >> { %v5484_v39 = vsel %vm12034_vm11, %v5446_v62, %v5483_v36  ;;  %v5495_v28 = vsel %vm12035_vm1, %v5433_v6, %v5470_v23  ;;  %vm12036_vm3 = vcmp.eq.s32.totalorder %v10796_v50, 0  ;;  %vm12037_vm7 = vcmp.eq.s32.totalorder %v10866_v43, 0 }
 0x3a5   : >> { %v5496_v51 = vsel %vm12036_vm3, %v11522_v34, %v5484_v39  ;;  %v11639_v55 = vsel %vm12037_vm7, %v5409_v18, %v5495_v28  ;;  %v5432_v19 = vsel %vm3972_vm9, %v5429_v33, %v5431_v37  ;;  %v5466_v57 = vrot.slane %v5358_v32, 7  ;;  %v9096_v18 = vld [vmem:[%s11037_s10 + $0x448] sm:$0xff]  }
 0x3a6   : >> { %5508 = vst [vmem:[#allocation2 + $0xc] sm:$0xff] %v5496_v51  ;;  %5519 = vst [vmem:[#allocation2 + $0x64] sm:$0xff] %v11639_v55  ;;  %vm12038_vm11 = vcmp.eq.s32.totalorder %v10850_v9, 0  ;;  %v5609_v41 = vpack.c.bf16 %v11541_v17, %v5496_v51  ;;  %vm12039_vm13 = vcmp.eq.s32.totalorder %v10859_v30, 9  ;;  %vm12040_vm9 = vcmp.eq.s32.totalorder %v10862_v40, 9  ;;  %v9064_v51 = vld [vmem:[%s11037_s10 + $0x340] sm:$0xff]  }
 0x3a7   : >> { %v11645_v58 = vsel %vm12038_vm11, %v5391_v8, %v5492_v49  ;;  %v5467_v42 = vsel %vm4010_vm15, %v5464_v21, %v5466_v57  ;;  %v5469_v34 = vsel %vm4010_vm15, %v5466_v57, %v5468_v52  ;;  %v5612_v32 = vpack.c.bf16 %v11613_v60, %v11597_v5  ;;  %v11665_v52 = vld [vmem:[#allocation2 + $0x22] sm:$0xff]  ;;  %v11671_v21 = vld [vmem:[#allocation2 + $0x2a] sm:$0xff]  ;;  %v11683_v49 = vld [vmem:[#allocation2 + $0x3a] sm:$0xff] }
 0x3a8   : >> { %5516 = vst [vmem:[#allocation2 + $0x4c] sm:$0xff] %v11645_v58  ;;  %v5493_v46 = vsel %vm12039_vm13, %v5430_v4, %v5467_v42  ;;  %v5494_v37 = vsel %vm12040_vm9, %v5432_v19, %v5469_v34  ;;  %6495 = vmatprep.mubr.bf16.mxu0 %v5609_v41  ;;  %vm12041_vm1 = vcmp.eq.s32.totalorder %v10859_v30, 0  ;;  %vm12042_vm3 = vcmp.eq.s32.totalorder %v10862_v40, 0  ;;  %v11692_v19 = vld [vmem:[#allocation2 + $0x19] sm:$0xff]  ;;  %v9065_v57 = vld [vmem:[%s11037_s10 + $0x388] sm:$0xff]   ;;  %v9087_v60 = vld [vmem:[%s11037_s10 + $0x370] sm:$0xff]  }
 0x3a9   : >> { %v11659_v15 = vsel %vm12041_vm1, %v5393_v35, %v5493_v46  ;;  %v11663_v17 = vsel %vm12042_vm3, %v5395_v59, %v5494_v37  ;;  %v11677_v61 = vld [vmem:[#allocation2 + $0x42] sm:$0xff]  ;;  %v5587_v29 = vpack.c.bf16 %v11671_v21, %v11665_v52  ;;  %v5588_v5 = vpack.c.bf16 %v11683_v49, %v11673_v44 }
 0x3aa   : >> { %5522 = vst [vmem:[#allocation2 + $0x6c] sm:$0xff] %v11659_v15  ;;  %5523 = vst [vmem:[#allocation2 + $0x74] sm:$0xf] %v11663_v17  ;;  %v5613_v63 = vpack.c.bf16 %v11659_v15, %v11645_v58  ;;  %v5614_v33 = vpack.c.bf16 %v11639_v55, %v11663_v17  ;;  %v5573_v59 = vld [vmem:[#allocation2 + $0x2] sm:$0xff] }
 0x3ab   : >> { %5517 = vst [vmem:[#allocation2 + $0x54] sm:$0xff] %v11659_v15  ;;  %5518 = vst [vmem:[#allocation2 + $0x5c] sm:$0xff] %v11663_v17  ;;  %v9070_v41 = vld [vmem:[%s11037_s10 + $0x3c0] sm:$0xff]   ;;  %v9073_v34 = vld [vmem:[%s11037_s10 + $0x408] sm:$0xff]  }
 0x3ac   : >> { %v9066_v37 = vld [vmem:[%s11037_s10 + $0x348] sm:$0xff]   ;;  %v5647_v8 = vld [vmem:[#allocation2 + $0x1e] sm:$0xff] }
 0x3ad   : >> { %v5550_v6 = vld [vmem:[#allocation2 + $0x9] sm:$0xff]  ;;  %v5551_v4 = vld [vmem:[#allocation2 + $0x11] sm:$0xff] }
 0x3ae   : >> { %v5526_v62 = vld [vmem:[#allocation2 + $0x8] sm:$0xff]  ;;  %v5561_v39 = vpack.c.bf16 %v5550_v6, %v5549_v27  ;;  %v5562_v42 = vpack.c.bf16 %v11692_v19, %v5551_v4 }
 0x3af   : >> { %v5574_v23 = vld [vmem:[#allocation2 + $0xa] sm:$0xff]  ;;  %v5537_v28 = vpack.c.bf16 %v5526_v62, %v5525_v56  ;;  %v5575_v56 = vld [vmem:[#allocation2 + $0x12] sm:$0xff]  ;;  %v11718_v4 = vld [vmem:[#allocation2 + $0x21] sm:$0xff] }
 0x3b0   : >> { %v5585_v35 = vpack.c.bf16 %v5574_v23, %v5573_v59  ;;  %6414 = vmatprep.mubr.bf16.mxu1 %v5561_v39  ;;  %v11698_v46 = vld [vmem:[#allocation2 + $0x4a] sm:$0xff]  ;;  %v5586_v39 = vpack.c.bf16 %v11681_v10, %v5575_v56  ;;  %v9080_v56 = vld [vmem:[%s11037_s10 + $0x3d8] sm:$0xff]   ;;  %v5705_v55 = vpack.c.bf16 %v11718_v4, %v11692_v19 }
 0x3b1   : >> { %6415 = vmatmul.mubr.bf16.vlgmr.msra.gmra.mrb[48].mxu1 %v5537_v28  ;;  %v9067_v59 = vld [vmem:[%s11037_s10 + $0x390] sm:$0xff]   ;;  %v9074_v6 = vld [vmem:[%s11037_s10 + $0x3c8] sm:$0xff]   ;;  %v5589_v58 = vpack.c.bf16 %v11698_v46, %v11677_v61 }
 0x3b2   : >> { %6496 = vmatmul.mubr.bf16.vlgmr.msra.gmra.mrb[60].mxu0 %v5585_v35  ;;  %6422 = vmatprep.mubr.bf16.mxu1 %v5562_v42  ;;  %v11704_v27 = vld [vmem:[#allocation2 + $0x52] sm:$0xff] }
 0x3b3   : >> { %6503 = vmatprep.mubr.bf16.mxu0 %v5610_v31  ;;  %8403 = vmatpush3.bf16.msra.mxu1 %v9064_v51  ;;  %v5527_v23 = vld [vmem:[#allocation2 + $0x10] sm:$0xff]  ;;  %v11713_v31 = vld [vmem:[#allocation2 + $0x18] sm:$0xff] }
 0x3b4   : >> { %8404 = vmatprep.subr.bf16.mxu1 %v9065_v57  ;;  %8455 = vmatpush3.bf16.msra.mxu0 %v9070_v41  ;;  %v9068_v28 = vld [vmem:[%s11037_s10 + $0x350] sm:$0xff]   ;;  %v5538_v35 = vpack.c.bf16 %v11713_v31, %v5527_v23  ;;  %v9071_v51 = vld [vmem:[%s11037_s10 + $0x398] sm:$0xff]   ;;  %v5563_v41 = vpack.c.bf16 %v11711_v20, %v11718_v4 }
 0x3b5   : >> { %8456 = vmatprep.subr.bf16.mxu0 %v9073_v34  ;;  %v9078_v57 = vld [vmem:[%s11037_s10 + $0x3d0] sm:$0xff]   ;;  %v9079_v42 = vld [vmem:[%s11037_s10 + $0x418] sm:$0xff]  }
 0x3b6   : >> { %v9072_v34 = vld [vmem:[%s11037_s10 + $0x358] sm:$0xff]   ;;  %v9097_v4 = vld [vmem:[%s11037_s10 + $0x450] sm:$0xff]  }
 0x3b7   : >> { %8405 = vmatpush3.bf16.msra.mxu1 %v9066_v37  ;;  %v9075_v37 = vld [vmem:[%s11037_s10 + $0x3a0] sm:$0xff]   ;;  %v11734_v23 = vld [vmem:[#allocation2 + $0x31] sm:$0xff] }
 0x3b8   : >> { %8406 = vmatprep.subr.bf16.mxu1 %v9067_v59  ;;  %8457 = vmatpush3.bf16.msra.mxu0 %v9074_v6  ;;  %v11731_v59 = vld [vmem:[#allocation2 + $0x28] sm:$0xff]  ;;  %v9083_v6 = vld [vmem:[%s11037_s10 + $0x420] sm:$0xff]   ;;  %v5706_v36 = vpack.c.bf16 %v11734_v23, %v11711_v20 }
 0x3b9   : >> { %8458 = vmatprep.subr.bf16.mxu0 %v9076_v7  ;;  %6423 = vmatmul.mubr.bf16.gmra.mrb[52].mxu1 %v5538_v35  ;;  %v11736_v7 = vld [vmem:[#allocation2 + $0x39] sm:$0xff] }
 0x3ba   : >> { %6504 = vmatmul.mubr.bf16.gmra.mrb[64].mxu0 %v5586_v39  ;;  %6430 = vmatprep.mubr.bf16.mxu1 %v5563_v41  ;;  %v5539_v39 = vpack.c.bf16 %v11731_v59, %v11738_v12  ;;  %v9084_v35 = vld [vmem:[%s11037_s10 + $0x3e0] sm:$0xff]   ;;  %v9082_v41 = vld [vmem:[%s11037_s10 + $0x368] sm:$0xff]  }
 0x3bb   : >> { %6511 = vmatprep.mubr.bf16.mxu0 %v5611_v45  ;;  %8407 = vmatpush3.bf16.msra.mxu1 %v9068_v28  ;;  %v9077_v45 = vld [vmem:[%s11037_s10 + $0x360] sm:$0xff]   ;;  %v9081_v28 = vld [vmem:[%s11037_s10 + $0x3a8] sm:$0xff]  }
 0x3bc   : >> { %8408 = vmatprep.subr.bf16.mxu1 %v9071_v51  ;;  %8459 = vmatpush3.bf16.msra.mxu0 %v9078_v57  ;;  %v5564_v51 = vpack.c.bf16 %v11736_v7, %v11734_v23  ;;  %v9086_v57 = vld [vmem:[%s11037_s10 + $0x428] sm:$0xff]   ;;  %v11785_v62 = vld [vmem:[#allocation2 + $0x59] sm:$0xff] }
 0x3bd   : >> { %8460 = vmatprep.subr.bf16.mxu0 %v9079_v42  ;;  %v9085_v42 = vld [vmem:[%s11037_s10 + $0x3b0] sm:$0xff]   ;;  %v9098_v23 = vld [vmem:[%s11037_s10 + $0x458] sm:$0xff]  }
 0x3bf   : >> { %8409 = vmatpush3.bf16.msra.mxu1 %v9072_v34  ;;  %v9088_v34 = vld [vmem:[%s11037_s10 + $0x3e8] sm:$0xff]  }
 0x3c0   : >> { %8410 = vmatprep.subr.bf16.mxu1 %v9075_v37  ;;  %8461 = vmatpush3.bf16.msra.mxu0 %v9080_v56  ;;  %v11756_v37 = vld [vmem:[#allocation2 + $0x30] sm:$0xff]  ;;  %v11758_v56 = vld [vmem:[#allocation2 + $0x38] sm:$0xff] }
 0x3c1   : >> { %8462 = vmatprep.subr.bf16.mxu0 %v9083_v6  ;;  %6431 = vmatmul.mubr.bf16.gmra.mrb[56].mxu1 %v5539_v39  ;;  %v9089_v6 = vld [vmem:[%s11037_s10 + $0x430] sm:$0xff]  }
 0x3c2   : >> { %6512 = vmatmul.mubr.bf16.gmra.mrb[68].mxu0 %v5587_v29  ;;  %6438 = vmatprep.mubr.bf16.mxu1 %v5564_v51  ;;  %v11761_v29 = vld [vmem:[#allocation2 + $0x49] sm:$0xff]  ;;  %v9093_v51 = vld [vmem:[%s11037_s10 + $0x438] sm:$0xff]  }
 0x3c3   : >> { %6519 = vmatprep.mubr.bf16.mxu0 %v5612_v32  ;;  %8411 = vmatpush3.bf16.msra.mxu1 %v9077_v45  ;;  %v5540_v32 = vpack.c.bf16 %v11758_v56, %v11756_v37  ;;  %v11768_v45 = vld [vmem:[#allocation2 + $0x41] sm:$0xff]  ;;  %v9090_v39 = vld [vmem:[%s11037_s10 + $0x3f0] sm:$0xff]  }
 0x3c4   : >> { %8412 = vmatprep.subr.bf16.mxu1 %v9081_v28  ;;  %8463 = vmatpush3.bf16.msra.mxu0 %v9084_v35  ;;  %v9091_v28 = vld [vmem:[%s11037_s10 + $0x3b8] sm:$0xff]   ;;  %v5565_v35 = vpack.c.bf16 %v11761_v29, %v11768_v45 }
 0x3c5   : >> { %8464 = vmatprep.subr.bf16.mxu0 %v9086_v57  ;;  %v9092_v57 = vld [vmem:[%s11037_s10 + $0x378] sm:$0xff]  }
 0x3c7   : >> { %8413 = vmatpush3.bf16.msra.mxu1 %v9082_v41  ;;  %v9094_v41 = vld [vmem:[%s11037_s10 + $0x3f8] sm:$0xff]  }
 0x3c8   : >> { %8414 = vmatprep.subr.bf16.mxu1 %v9085_v42  ;;  %8465 = vmatpush3.bf16.msra.mxu0 %v9088_v34  ;;  %v9095_v42 = vld [vmem:[%s11037_s10 + $0x440] sm:$0xff]   ;;  %v11781_v34 = vld [vmem:[#allocation2 + $0x48] sm:$0xff] }
 0x3c9   : >> { %8466 = vmatprep.subr.bf16.mxu0 %v9089_v6  ;;  %6439 = vmatmul.mubr.bf16.gmra.mrb[60].mxu1 %v5540_v32  ;;  %v11787_v6 = vld [vmem:[#allocation2 + $0x40] sm:$0xff]  ;;  %v11800_v32 = vld [vmem:[#allocation2 + $0x50] sm:$0xff] }
 0x3ca   : >> { %6520 = vmatmul.mubr.bf16.gmra.mrb[72].mxu0 %v5588_v5  ;;  %6446 = vmatprep.mubr.bf16.mxu1 %v5565_v35  ;;  %v11783_v5 = vld [vmem:[#allocation2 + $0x51] sm:$0xff]  ;;  %v5541_v15 = vpack.c.bf16 %v11781_v34, %v11787_v6 }
 0x3cb   : >> { %6527 = vmatprep.mubr.bf16.mxu0 %v5613_v63  ;;  %8415 = vmatpush3.bf16.msra.mxu1 %v9087_v60  ;;  %v5566_v63 = vpack.c.bf16 %v11785_v62, %v11783_v5  ;;  %v11798_v60 = vld [vmem:[#allocation2 + $0x5a] sm:$0xff] }
 0x3cc   : >> { %8467 = vmatpush3.bf16.msra.mxu0 %v9090_v39  ;;  %8416 = vmatprep.subr.bf16.mxu1 %v9091_v28  ;;  %v11802_v39 = vld [vmem:[#allocation2 + $0x58] sm:$0xff]  ;;  %v5645_v28 = vld [vmem:[#allocation2 + $0xe] sm:$0xff]  ;;  %v5590_v35 = vpack.c.bf16 %v11798_v60, %v11704_v27 }
 0x3cd   : >> { %8468 = vmatprep.subr.bf16.mxu0 %v9093_v51  ;;  %v5542_v51 = vpack.c.bf16 %v11802_v39, %v11800_v32 }
 0x3cf   : >> { %8417 = vmatpush3.bf16.msra.mxu1 %v9092_v57  ;;  %v5646_v57 = vld [vmem:[#allocation2 + $0x16] sm:$0xff] }
 0x3d0   : >> { %8469 = vmatpush3.bf16.msra.mxu0 %v9094_v41  ;;  %8576 = vmatprep.subr.bf16.mxu1 %v9095_v42  ;;  %v5657_v17 = vpack.c.bf16 %v5646_v57, %v5645_v28  ;;  %v5648_v41 = vld [vmem:[#allocation2 + $0x26] sm:$0xff]  ;;  %v5626_v57 = vld [vmem:[#allocation2 + $0x35] sm:$0xff] }
 0x3d1   : >> { %6447 = vmatmul.mubr.bf16.gmra.mrb[64].mxu1 %v5541_v15  ;;  %v5681_v15 = vpack.c.bf16 %v11738_v12, %v11713_v31  ;;  %v5658_v19 = vpack.c.bf16 %v5648_v41, %v5647_v8  ;;  %v5624_v28 = vld [vmem:[#allocation2 + $0x25] sm:$0xff]  ;;  %v5623_v31 = vld [vmem:[#allocation2 + $0x1d] sm:$0xff]  ;;  %v5682_v12 = vpack.c.bf16 %v11756_v37, %v11731_v59  ;;  %v5707_v8 = vpack.c.bf16 %v11768_v45, %v11736_v7  ;;  %v9101_v41 = vld [vmem:[%s11037_s10 + $0x470] sm:$0xff]  }
 0x3d2   : >> { %6528 = vmatmul.mubr.bf16.gmra.mrb[76].mxu0 %v5589_v58  ;;  %6454 = vmatprep.mubr.bf16.mxu1 %v5566_v63  ;;  %v5622_v58 = vld [vmem:[#allocation2 + $0x15] sm:$0xff]  ;;  %v5634_v20 = vpack.c.bf16 %v5624_v28, %v5623_v31  ;;  %v5683_v59 = vpack.c.bf16 %v11787_v6, %v11758_v56  ;;  %v5651_v37 = vld [vmem:[#allocation2 + $0x3e] sm:$0xff]  ;;  %v5708_v45 = vpack.c.bf16 %v11783_v5, %v11761_v29 }
 0x3d3   : >> { %6535 = vmatprep.mubr.bf16.mxu0 %v5614_v33  ;;  %v5621_v33 = vld [vmem:[#allocation2 + $0xd] sm:$0xff]  ;;  %v5654_v6 = vld [vmem:[#allocation2 + $0x56] sm:$0xff] }
 0x3d4   : >> { %v5633_v63 = vpack.c.bf16 %v5622_v58, %v5621_v33  ;;  %v5628_v58 = vld [vmem:[#allocation2 + $0x45] sm:$0xff]  ;;  %v5653_v56 = vld [vmem:[#allocation2 + $0x4e] sm:$0xff] }
 0x3d5   : >> { %v5661_v28 = vpack.c.bf16 %v5654_v6, %v5653_v56  ;;  %v5630_v31 = vld [vmem:[#allocation2 + $0x55] sm:$0xff] }
 0x3d9   : >> { %6455 = vmatmul.mubr.bf16.gmra.mrb[68].mxu1 %v5542_v51  ;;  %v5650_v51 = vld [vmem:[#allocation2 + $0x36] sm:$0xff] }
 0x3da   : >> { %6536 = vmatmul.mubr.bf16.gmra.mrb[80].mxu0 %v5590_v35  ;;  %6576 = vmatprep.mubr.bf16.mxu1 %v5657_v17  ;;  %v5649_v35 = vld [vmem:[#allocation2 + $0x2e] sm:$0xff] }
 0x3db   : >> { %6657 = vmatprep.mubr.bf16.mxu0 %v5705_v55  ;;  %v5652_v55 = vld [vmem:[#allocation2 + $0x46] sm:$0xff] }
 0x3dc   : >> { %v9100_v17 = vld [vmem:[%s11037_s10 + $0x468] sm:$0xff]   ;;  %v5660_v33 = vpack.c.bf16 %v5652_v55, %v5651_v37  ;;  %v12044_v37 = vpack.c.bf16 %v11673_v44, %v11671_v21  ;;  %v11847_v44 = vld [vmem:[%s11412_s14 + $0x1] ss:$0 sm:$0xff] }
 0x3dd   : >> { %v5632_v55 = vld [vmem:[#allocation2 + $0x65] sm:$0xff] }
 0x3e1   : >> { %6577 = vmatmul.mubr.bf16.vlgmr.msra.gmra.mrb[72].mxu1 %v5633_v63  ;;  %v5627_v63 = vld [vmem:[#allocation2 + $0x3d] sm:$0xff] }
 0x3e2   : >> { %6658 = vmatmul.mubr.bf16.vlgmr.msra.gmra.mrb[84].mxu0 %v5681_v15  ;;  %6584 = vmatprep.mubr.bf16.mxu1 %v5658_v19  ;;  %v5702_v15 = vld [vmem:[#allocation2 + $0x61] sm:$0xff]  ;;  %v5684_v19 = vpack.c.bf16 %v11800_v32, %v11781_v34  ;;  %v5636_v29 = vpack.c.bf16 %v5628_v58, %v5627_v63  ;;  %v5727_v58 = vld [vmem:[#allocation2 + $0x6a] sm:$0xff] }
 0x3e3   : >> { %6665 = vmatprep.mubr.bf16.mxu0 %v5706_v36  ;;  %8577 = vmatpush3.bf16.msra.mxu1 %v9095_v42  ;;  %v5659_v36 = vpack.c.bf16 %v5650_v51, %v5649_v35  ;;  %v9099_v42 = vld [vmem:[%s11037_s10 + $0x460] sm:$0xff]   ;;  %v5709_v5 = vpack.c.bf16 %v5702_v15, %v11785_v62  ;;  %v5629_v35 = vld [vmem:[#allocation2 + $0x4d] sm:$0xff] }
 0x3e4   : >> { %8578 = vmatprep.subr.bf16.mxu1 %v9096_v18  ;;  %v5678_v51 = vld [vmem:[#allocation2 + $0x60] sm:$0xff]  ;;  %v5637_v62 = vpack.c.bf16 %v5630_v31, %v5629_v35  ;;  %v5728_v15 = vld [vmem:[#allocation2 + $0x72] sm:$0xff] }
 0x3e5   : >> { %v5656_v34 = vld [vmem:[#allocation2 + $0x66] sm:$0xff]  ;;  %v5685_v32 = vpack.c.bf16 %v5678_v51, %v11802_v39  ;;  %v12043_v39 = vpack.c.bf16 %v11665_v52, %v11681_v10  ;;  %v5734_v52 = vpack.c.bf16 %v5728_v15, %v5727_v58 }
 0x3e7   : >> { %8579 = vmatpush3.bf16.msra.mxu1 %v9096_v18  ;;  %v5625_v18 = vld [vmem:[#allocation2 + $0x2d] sm:$0xff] }
 0x3e8   : >> { %8580 = vmatprep.subr.bf16.mxu1 %v9097_v4  ;;  %v5635_v7 = vpack.c.bf16 %v5626_v57, %v5625_v18  ;;  %v5680_v18 = vld [vmem:[#allocation2 + $0x70] sm:$0xff]  ;;  %v5631_v57 = vld [vmem:[#allocation2 + $0x5d] sm:$0xff] }
 0x3e9   : >> { %6585 = vmatmul.mubr.bf16.gmra.mrb[76].mxu1 %v5634_v20  ;;  %v5704_v20 = vld [vmem:[#allocation2 + $0x71] sm:$0xff] }
 0x3ea   : >> { %6666 = vmatmul.mubr.bf16.gmra.mrb[88].mxu0 %v5682_v12  ;;  %6592 = vmatprep.mubr.bf16.mxu1 %v5659_v36  ;;  %v5703_v12 = vld [vmem:[#allocation2 + $0x69] sm:$0xff] }
 0x3eb   : >> { %6673 = vmatprep.mubr.bf16.mxu0 %v5707_v8  ;;  %8581 = vmatpush3.bf16.msra.mxu1 %v9097_v4  ;;  %v9102_v4 = vld [vmem:[%s11037_s10 + $0x478] sm:$0xff]  }
 0x3ec   : >> { %8582 = vmatprep.subr.bf16.mxu1 %v9098_v23  ;;  %v5655_v8 = vld [vmem:[#allocation2 + $0x5e] sm:$0xff] }
 0x3ed   : >> { %v5662_v36 = vpack.c.bf16 %v5656_v34, %v5655_v8 }
 0x3ef   : >> { %8583 = vmatpush3.bf16.msra.mxu1 %v9098_v23  ;;  %v5710_v23 = vpack.c.bf16 %v5704_v20, %v5703_v12 }
 0x3f0   : >> { %8584 = vmatprep.subr.bf16.mxu1 %v9099_v42 }
 0x3f1   : >> { %6593 = vmatmul.mubr.bf16.gmra.mrb[80].mxu1 %v5635_v7  ;;  %v5638_v7 = vpack.c.bf16 %v5632_v55, %v5631_v57 }
 0x3f2   : >> { %6674 = vmatmul.mubr.bf16.gmra.mrb[92].mxu0 %v5683_v59  ;;  %6600 = vmatprep.mubr.bf16.mxu1 %v5660_v33 }
 0x3f3   : >> { %6681 = vmatprep.mubr.bf16.mxu0 %v5708_v45  ;;  %8585 = vmatpush3.bf16.msra.mxu1 %v9099_v42  ;;  %v5679_v42 = vld [vmem:[#allocation2 + $0x68] sm:$0xff]  ;;  %v12045_v45 = vpack.c.bf16 %v11677_v61, %v11683_v49 }
 0x3f4   : >> { %8586 = vmatprep.subr.bf16.mxu1 %v9100_v17  ;;  %v5686_v59 = vpack.c.bf16 %v5680_v18, %v5679_v42 }
 0x3f7   : >> { %8587 = vmatpush3.bf16.msra.mxu1 %v9100_v17  ;;  %v5726_v17 = vld [vmem:[#allocation2 + $0x62] sm:$0xff] }
 0x3f8   : >> { %8588 = vmatprep.subr.bf16.mxu1 %v9101_v41  ;;  %v5733_v33 = vpack.c.bf16 %v5726_v17, %v11798_v60 }
 0x3f9   : >> { %6601 = vmatmul.mubr.bf16.gmra.mrb[84].mxu1 %v5636_v29 }
 0x3fa   : >> { %6682 = vmatmul.mubr.bf16.gmra.mrb[96].mxu0 %v5684_v19  ;;  %6608 = vmatprep.mubr.bf16.mxu1 %v5661_v28 }
 0x3fb   : >> { %6689 = vmatprep.mubr.bf16.mxu0 %v5709_v5  ;;  %8589 = vmatpush3.bf16.msra.mxu1 %v9101_v41  ;;  %v12046_v41 = vpack.c.bf16 %v11704_v27, %v11698_v46 }
 0x3fc   : >> { %8590 = vmatprep.subr.bf16.mxu1 %v9102_v4 }
 0x3ff   : >> { %8591 = vmatpush3.bf16.msra.mxu1 %v9102_v4 }
 0x401   : >> { %6609 = vmatmul.mubr.bf16.gmra.mrb[88].mxu1 %v5637_v62 }
 0x402   : >> { %6690 = vmatmul.mubr.bf16.gmra.mrb[100].mxu0 %v5685_v32  ;;  %6616 = vmatprep.mubr.bf16.mxu1 %v5662_v36 }
 0x403   : >> { %6697 = vmatprep.mubr.bf16.mxu0 %v5710_v23 }
 0x409   : >> { %6617 = vmatmul.mubr.bf16.gmra.mrb[92].mxu1 %v5638_v7 }
 0x40a   : >> { %6698 = vmatmul.mubr.bf16.gmra.mrb[104].mxu0 %v5686_v59  ;;  %8592 = vmatprep.mubr.bf16.mxu1 %v12043_v39 }
 0x411   : >> { %8593 = vmatmul.mubr.bf16.vlgmr.msra.gmra.mrb[96].mxu1 %v12044_v37 }
 0x412   : >> { %8596 = vmatprep.mubr.bf16.mxu1 %v12045_v45 }
 0x419   : >> { %8597 = vmatmul.mubr.bf16.gmra.mrb[100].mxu1 %v12046_v41 }
 0x41a   : >> { %8600 = vmatprep.mubr.bf16.mxu1 %v5733_v33 }
 0x421   : >> { %8601 = vmatmul.mubr.bf16.gmra.mrb[104].mxu1 %v5734_v52 }
 0x484   : >> { %v8314_v56 = vpop.f32.mrb[48].mxu1 }
 0x485   : >> { %v8366_v10 = vpop.f32.mrb[60].mxu0  ;;  %v8315_v6 = vpop.f32.mrb[49].mxu1 }
 0x486   : >> { %v8367_v21 = vpop.f32.mrb[61].mxu0  ;;  %v8316_v63 = vadd.f32 %v8315_v6, %v8314_v56  ;;  %v8317_v19 = vpop.f32.mrb[50].mxu1 }
 0x487   : >> { %v8368_v61 = vadd.f32 %v8367_v21, %v8366_v10  ;;  %v8369_v49 = vpop.f32.mrb[62].mxu0  ;;  %v8318_v29 = vpop.f32.mrb[51].mxu1 }
 0x488   : >> { %v8370_v60 = vpop.f32.mrb[63].mxu0  ;;  %v6417_v46 = vadd.f32 %v8316_v63, %v11847_v44  ;;  %v8319_v27 = vadd.f32 %v8318_v29, %v8317_v19 }
 0x489   : >> { %v8371_v5 = vadd.f32 %v8370_v60, %v8369_v49 }
 0x48a   : >> { %v11850_v4 = vadd.f32 %v8368_v61, %v6417_v46  ;;  %v6420_v28 = vadd.f32 %v8319_v27, %v11847_v44 }
 0x48c   : >> { %v11853_v51 = vadd.f32 %v8371_v5, %v6420_v28  ;;  %v8320_v31 = vpop.f32.mrb[52].mxu1 }
 0x48d   : >> { %v8372_v35 = vpop.f32.mrb[64].mxu0  ;;  %v8321_v20 = vpop.f32.mrb[53].mxu1 }
 0x48e   : >> { %v8373_v12 = vpop.f32.mrb[65].mxu0  ;;  %v8322_v32 = vadd.f32 %v8321_v20, %v8320_v31  ;;  %v8323_v62 = vpop.f32.mrb[54].mxu1 }
 0x48f   : >> { %v8374_v8 = vadd.f32 %v8373_v12, %v8372_v35  ;;  %v8375_v34 = vpop.f32.mrb[66].mxu0  ;;  %v8324_v36 = vpop.f32.mrb[55].mxu1 }
 0x490   : >> { %v8376_v23 = vpop.f32.mrb[67].mxu0  ;;  %v6425_v18 = vadd.f32 %v8322_v32, %v11847_v44  ;;  %v8325_v57 = vadd.f32 %v8324_v36, %v8323_v62 }
 0x491   : >> { %v8377_v42 = vadd.f32 %v8376_v23, %v8375_v34 }
 0x492   : >> { %v11856_v55 = vadd.f32 %v8374_v8, %v6425_v18  ;;  %v6428_v59 = vadd.f32 %v8325_v57, %v11847_v44 }
 0x494   : >> { %v11859_v39 = vadd.f32 %v8377_v42, %v6428_v59  ;;  %v8326_v37 = vpop.f32.mrb[56].mxu1 }
 0x495   : >> { %v8378_v7 = vpop.f32.mrb[68].mxu0  ;;  %v8327_v17 = vpop.f32.mrb[57].mxu1 }
 0x496   : >> { %v8379_v45 = vpop.f32.mrb[69].mxu0  ;;  %v8328_v58 = vadd.f32 %v8327_v17, %v8326_v37  ;;  %v8329_v15 = vpop.f32.mrb[58].mxu1 }
 0x497   : >> { %v8380_v33 = vadd.f32 %v8379_v45, %v8378_v7  ;;  %v8381_v41 = vpop.f32.mrb[70].mxu0  ;;  %v8330_v10 = vpop.f32.mrb[59].mxu1 }
 0x498   : >> { %v8382_v52 = vpop.f32.mrb[71].mxu0  ;;  %v6433_v21 = vadd.f32 %v8328_v58, %v11847_v44  ;;  %v8331_v6 = vadd.f32 %v8330_v10, %v8329_v15 }
 0x499   : >> { %v8383_v56 = vadd.f32 %v8382_v52, %v8381_v41 }
 0x49a   : >> { %v11862_v61 = vadd.f32 %v8380_v33, %v6433_v21  ;;  %v6436_v49 = vadd.f32 %v8331_v6, %v11847_v44 }
 0x49c   : >> { %v11865_v19 = vadd.f32 %v8383_v56, %v6436_v49  ;;  %v8332_v60 = vpop.f32.mrb[60].mxu1 }
 0x49d   : >> { %v8384_v63 = vpop.f32.mrb[72].mxu0  ;;  %v8333_v5 = vpop.f32.mrb[61].mxu1 }
 0x49e   : >> { %v8385_v29 = vpop.f32.mrb[73].mxu0  ;;  %v8334_v28 = vadd.f32 %v8333_v5, %v8332_v60  ;;  %v8335_v35 = vpop.f32.mrb[62].mxu1 }
 0x49f   : >> { %v8386_v46 = vadd.f32 %v8385_v29, %v8384_v63  ;;  %v8387_v27 = vpop.f32.mrb[74].mxu0  ;;  %v8336_v12 = vpop.f32.mrb[63].mxu1 }
 0x4a0   : >> { %v8388_v31 = vpop.f32.mrb[75].mxu0  ;;  %v6441_v8 = vadd.f32 %v8334_v28, %v11847_v44  ;;  %v8337_v34 = vadd.f32 %v8336_v12, %v8335_v35 }
 0x4a1   : >> { %v8389_v20 = vadd.f32 %v8388_v31, %v8387_v27 }
 0x4a2   : >> { %v11868_v32 = vadd.f32 %v8386_v46, %v6441_v8  ;;  %v6444_v62 = vadd.f32 %v8337_v34, %v11847_v44 }
 0x4a4   : >> { %v11871_v36 = vadd.f32 %v8389_v20, %v6444_v62  ;;  %v8338_v42 = vpop.f32.mrb[64].mxu1 }
 0x4a5   : >> { %v8390_v23 = vpop.f32.mrb[76].mxu0  ;;  %v8339_v57 = vpop.f32.mrb[65].mxu1 }
 0x4a6   : >> { %v8391_v18 = vpop.f32.mrb[77].mxu0  ;;  %v8340_v37 = vadd.f32 %v8339_v57, %v8338_v42  ;;  %v8341_v45 = vpop.f32.mrb[66].mxu1 }
 0x4a7   : >> { %v8392_v59 = vadd.f32 %v8391_v18, %v8390_v23  ;;  %v8393_v7 = vpop.f32.mrb[78].mxu0  ;;  %v8342_v33 = vpop.f32.mrb[67].mxu1 }
 0x4a8   : >> { %v8394_v17 = vpop.f32.mrb[79].mxu0  ;;  %v6449_v58 = vadd.f32 %v8340_v37, %v11847_v44  ;;  %v8343_v15 = vadd.f32 %v8342_v33, %v8341_v45 }
 0x4a9   : >> { %v8395_v41 = vadd.f32 %v8394_v17, %v8393_v7 }
 0x4aa   : >> { %v11874_v52 = vadd.f32 %v8392_v59, %v6449_v58  ;;  %v6452_v10 = vadd.f32 %v8343_v15, %v11847_v44 }
 0x4ac   : >> { %v11877_v21 = vadd.f32 %v8395_v41, %v6452_v10  ;;  %v8344_v6 = vpop.f32.mrb[68].mxu1 }
 0x4ad   : >> { %v8396_v56 = vpop.f32.mrb[80].mxu0  ;;  %v8345_v63 = vpop.f32.mrb[69].mxu1 }
 0x4ae   : >> { %v8397_v49 = vpop.f32.mrb[81].mxu0  ;;  %v8346_v5 = vadd.f32 %v8345_v63, %v8344_v6  ;;  %v8347_v46 = vpop.f32.mrb[70].mxu1 }
 0x4af   : >> { %v8398_v60 = vadd.f32 %v8397_v49, %v8396_v56  ;;  %v8399_v29 = vpop.f32.mrb[82].mxu0  ;;  %v8348_v28 = vpop.f32.mrb[71].mxu1 }
 0x4b0   : >> { %v8400_v27 = vpop.f32.mrb[83].mxu0  ;;  %v6457_v31 = vadd.f32 %v8346_v5, %v11847_v44  ;;  %v8349_v12 = vadd.f32 %v8348_v28, %v8347_v46 }
 0x4b1   : >> { %v8401_v35 = vadd.f32 %v8400_v27, %v8399_v29 }
 0x4b2   : >> { %v11880_v20 = vadd.f32 %v8398_v60, %v6457_v31  ;;  %v6460_v8 = vadd.f32 %v8349_v12, %v11847_v44 }
 0x4b4   : >> { %v11883_v62 = vadd.f32 %v8401_v35, %v6460_v8  ;;  %v8418_v23 = vpop.f32.mrb[72].mxu1 }
 0x4b5   : >> { %v8470_v34 = vpop.f32.mrb[84].mxu0  ;;  %v8419_v18 = vpop.f32.mrb[73].mxu1 }
 0x4b6   : >> { %v8471_v42 = vpop.f32.mrb[85].mxu0  ;;  %v8420_v7 = vadd.f32 %v8419_v18, %v8418_v23  ;;  %v8421_v37 = vpop.f32.mrb[74].mxu1 }
 0x4b7   : >> { %v8472_v57 = vadd.f32 %v8471_v42, %v8470_v34  ;;  %v8473_v59 = vpop.f32.mrb[86].mxu0  ;;  %v8422_v17 = vpop.f32.mrb[75].mxu1 }
 0x4b8   : >> { %v8474_v45 = vpop.f32.mrb[87].mxu0  ;;  %v6579_v41 = vadd.f32 %v8420_v7, %v11850_v4  ;;  %v8423_v58 = vadd.f32 %v8422_v17, %v8421_v37 }
 0x4b9   : >> { %v8475_v33 = vadd.f32 %v8474_v45, %v8473_v59 }
 0x4ba   : >> { %v6582_v15 = vadd.f32 %v8423_v58, %v11853_v51  ;;  %v11887_v10 = vadd.f32 %v8472_v57, %v6579_v41 }
 0x4bc   : >> { %v8424_v56 = vpop.f32.mrb[76].mxu1  ;;  %v11889_v49 = vadd.f32 %v8475_v33, %v6582_v15 }
 0x4bd   : >> { %v8476_v44 = vpop.f32.mrb[88].mxu0  ;;  %v8425_v63 = vpop.f32.mrb[77].mxu1 }
 0x4be   : >> { %v8477_v6 = vpop.f32.mrb[89].mxu0  ;;  %v8426_v5 = vadd.f32 %v8425_v63, %v8424_v56  ;;  %v8427_v46 = vpop.f32.mrb[78].mxu1 }
 0x4bf   : >> { %v8478_v60 = vadd.f32 %v8477_v6, %v8476_v44  ;;  %v8479_v29 = vpop.f32.mrb[90].mxu0  ;;  %v8428_v28 = vpop.f32.mrb[79].mxu1 }
 0x4c0   : >> { %v8480_v27 = vpop.f32.mrb[91].mxu0  ;;  %v6587_v4 = vadd.f32 %v8426_v5, %v11856_v55  ;;  %v8429_v31 = vadd.f32 %v8428_v28, %v8427_v46 }
 0x4c1   : >> { %v8481_v35 = vadd.f32 %v8480_v27, %v8479_v29 }
 0x4c2   : >> { %v6590_v51 = vadd.f32 %v8429_v31, %v11859_v39  ;;  %v11893_v12 = vadd.f32 %v8478_v60, %v6587_v4 }
 0x4c4   : >> { %v8430_v34 = vpop.f32.mrb[80].mxu1  ;;  %v11895_v42 = vadd.f32 %v8481_v35, %v6590_v51 }
 0x4c5   : >> { %v8482_v8 = vpop.f32.mrb[92].mxu0  ;;  %v8431_v18 = vpop.f32.mrb[81].mxu1 }
 0x4c6   : >> { %v8483_v23 = vpop.f32.mrb[93].mxu0  ;;  %v8432_v7 = vadd.f32 %v8431_v18, %v8430_v34  ;;  %v8433_v37 = vpop.f32.mrb[82].mxu1 }
 0x4c7   : >> { %v8484_v57 = vadd.f32 %v8483_v23, %v8482_v8  ;;  %v8485_v59 = vpop.f32.mrb[94].mxu0  ;;  %v8434_v17 = vpop.f32.mrb[83].mxu1 }
 0x4c8   : >> { %v8486_v45 = vpop.f32.mrb[95].mxu0  ;;  %v6595_v55 = vadd.f32 %v8432_v7, %v11862_v61  ;;  %v8435_v41 = vadd.f32 %v8434_v17, %v8433_v37 }
 0x4c9   : >> { %v8487_v33 = vadd.f32 %v8486_v45, %v8485_v59 }
 0x4ca   : >> { %v6598_v39 = vadd.f32 %v8435_v41, %v11865_v19  ;;  %v11899_v58 = vadd.f32 %v8484_v57, %v6595_v55 }
 0x4cc   : >> { %v8436_v44 = vpop.f32.mrb[84].mxu1  ;;  %v11901_v6 = vadd.f32 %v8487_v33, %v6598_v39 }
 0x4cd   : >> { %v8488_v15 = vpop.f32.mrb[96].mxu0  ;;  %v8437_v63 = vpop.f32.mrb[85].mxu1 }
 0x4ce   : >> { %v8489_v56 = vpop.f32.mrb[97].mxu0  ;;  %v8438_v5 = vadd.f32 %v8437_v63, %v8436_v44  ;;  %v8439_v46 = vpop.f32.mrb[86].mxu1 }
 0x4cf   : >> { %v8490_v60 = vadd.f32 %v8489_v56, %v8488_v15  ;;  %v8491_v29 = vpop.f32.mrb[98].mxu0  ;;  %v8440_v28 = vpop.f32.mrb[87].mxu1 }
 0x4d0   : >> { %v8492_v27 = vpop.f32.mrb[99].mxu0  ;;  %v6603_v61 = vadd.f32 %v8438_v5, %v11868_v32  ;;  %v8441_v4 = vadd.f32 %v8440_v28, %v8439_v46 }
 0x4d1   : >> { %v8493_v35 = vadd.f32 %v8492_v27, %v8491_v29 }
 0x4d2   : >> { %v6606_v19 = vadd.f32 %v8441_v4, %v11871_v36  ;;  %v6684_v31 = vadd.f32 %v8490_v60, %v6603_v61 }
 0x4d4   : >> { %v8442_v8 = vpop.f32.mrb[88].mxu1  ;;  %v6687_v23 = vadd.f32 %v8493_v35, %v6606_v19 }
 0x4d5   : >> { %v8494_v51 = vpop.f32.mrb[100].mxu0  ;;  %v8443_v18 = vpop.f32.mrb[89].mxu1 }
 0x4d6   : >> { %v8495_v34 = vpop.f32.mrb[101].mxu0  ;;  %v8444_v7 = vadd.f32 %v8443_v18, %v8442_v8  ;;  %v8445_v37 = vpop.f32.mrb[90].mxu1 }
 0x4d7   : >> { %v8496_v57 = vadd.f32 %v8495_v34, %v8494_v51  ;;  %v8497_v59 = vpop.f32.mrb[102].mxu0  ;;  %v8446_v17 = vpop.f32.mrb[91].mxu1 }
 0x4d8   : >> { %v8498_v45 = vpop.f32.mrb[103].mxu0  ;;  %v6611_v55 = vadd.f32 %v8444_v7, %v11874_v52  ;;  %v8447_v41 = vadd.f32 %v8446_v17, %v8445_v37 }
 0x4d9   : >> { %v8499_v33 = vadd.f32 %v8498_v45, %v8497_v59 }
 0x4da   : >> { %v6614_v32 = vadd.f32 %v8447_v41, %v11877_v21  ;;  %v6692_v39 = vadd.f32 %v8496_v57, %v6611_v55 }
 0x4dc   : >> { %v8448_v15 = vpop.f32.mrb[92].mxu1  ;;  %v6695_v56 = vadd.f32 %v8499_v33, %v6614_v32 }
 0x4dd   : >> { %v8500_v36 = vpop.f32.mrb[104].mxu0  ;;  %v8449_v63 = vpop.f32.mrb[93].mxu1 }
 0x4de   : >> { %v8501_v44 = vpop.f32.mrb[105].mxu0  ;;  %v8450_v5 = vadd.f32 %v8449_v63, %v8448_v15  ;;  %v8451_v46 = vpop.f32.mrb[94].mxu1 }
 0x4df   : >> { %v8502_v60 = vadd.f32 %v8501_v44, %v8500_v36  ;;  %v8503_v29 = vpop.f32.mrb[106].mxu0  ;;  %v8452_v28 = vpop.f32.mrb[95].mxu1 }
 0x4e0   : >> { %v8504_v27 = vpop.f32.mrb[107].mxu0  ;;  %v6619_v61 = vadd.f32 %v8450_v5, %v11880_v20  ;;  %v8453_v4 = vadd.f32 %v8452_v28, %v8451_v46 }
 0x4e1   : >> { %v8505_v35 = vadd.f32 %v8504_v27, %v8503_v29 }
 0x4e2   : >> { %v6622_v52 = vadd.f32 %v8453_v4, %v11883_v62  ;;  %v6700_v19 = vadd.f32 %v8502_v60, %v6619_v61 }
 0x4e4   : >> { %v8594_v21 = vpop.f32.mrb[96].mxu1  ;;  %v6703_v51 = vadd.f32 %v8505_v35, %v6622_v52 }
 0x4e5   : >> { %v6749_v8 = vadd.f32 %v8594_v21, %v11893_v12  ;;  %v6740_v34 = vpop.f32.mrb[97].mxu1 }
 0x4e6   : >> { %v6741_v18 = vadd.f32 %v6740_v34, %v11887_v10  ;;  %v8595_v57 = vpop.f32.mrb[98].mxu1  ;;  %v12047_v34 = vld [vmem:[#allocation5_spill] sm:$0xff] }
 0x4e7   : >> { %v6789_v59 = vmul.f32 0.1, %v6749_v8  ;;  %v6752_v7 = vadd.f32 %v8595_v57, %v11895_v42  ;;  %v6743_v37 = vpop.f32.mrb[99].mxu1 }
 0x4e8   : >> { %v6787_v45 = vmul.f32 0.1, %v6741_v18  ;;  %v6744_v17 = vadd.f32 %v6743_v37, %v11889_v49 }
 0x4e9   : >> { %v6801_v20 = vadd.f32 %v9201_v54, %v6789_v59   ;;  %v6790_v33 = vmul.f32 0.1, %v6752_v7 }
 0x4ea   : >> { %v6799_v62 = vadd.f32 %v9209_v26, %v6787_v45   ;;  %v6788_v55 = vmul.f32 0.1, %v6744_v17 }
 0x4eb   : >> { %v6802_v41 = vadd.f32 %v9197_v1, %v6790_v33   ;;  %6813 = vst [vmem:[%s9287_s16 + $0x10] sm:$0xff] (%p11928_p4), %v6801_v20 }
 0x4ec   : >> { %v6800_v12 = vadd.f32 %v9205_v53, %v6788_v55   ;;  %v8598_v32 = vpop.f32.mrb[100].mxu1  ;;  %6811 = vst [vmem:[%s9287_s16] sm:$0xff] (%p11928_p4), %v6799_v62 }
 0x4ed   : >> { %v6765_v10 = vadd.f32 %v8598_v32, %v6684_v31  ;;  %v6756_v36 = vpop.f32.mrb[101].mxu1  ;;  %6814 = vst [vmem:[%s9287_s16 + $0x18] sm:$0xff] (%p11928_p4), %v6802_v41 }
 0x4ee   : >> { %v6757_v15 = vadd.f32 %v6756_v36, %v11899_v58  ;;  %v8599_v42 = vpop.f32.mrb[102].mxu1  ;;  %6812 = vst [vmem:[%s9287_s16 + $0x8] sm:$0xff] (%p11928_p4), %v6800_v12 }
 0x4ef   : >> { %v6793_v44 = vmul.f32 0.1, %v6765_v10  ;;  %v6768_v63 = vadd.f32 %v8599_v42, %v6687_v23  ;;  %v6759_v60 = vpop.f32.mrb[103].mxu1 }
 0x4f0   : >> { %v6791_v49 = vmul.f32 0.1, %v6757_v15  ;;  %v6760_v54 = vadd.f32 %v6759_v60, %v11901_v6 }
 0x4f1   : >> { %v6805_v29 = vadd.f32 %v9185_v16, %v6793_v44   ;;  %v6794_v26 = vmul.f32 0.1, %v6768_v63 }
 0x4f2   : >> { %v6803_v5 = vadd.f32 %v9193_v47, %v6791_v49   ;;  %v6792_v1 = vmul.f32 0.1, %v6760_v54  ;;  %v12059_v54 = vmov %v6801_v20 }
 0x4f3   : >> { %v6806_v46 = vadd.f32 %v9181_v14, %v6794_v26   ;;  %v12048_v14 = vld [vmem:[#allocation6_spill] sm:$0xff]  ;;  %v12061_v26 = vmov %v6799_v62  ;;  %6817 = vst [vmem:[%s9287_s16 + $0x30] sm:$0xff] (%p11928_p4), %v6805_v29 }
 0x4f4   : >> { %v6804_v31 = vadd.f32 %v9189_v11, %v6792_v1   ;;  %v8602_v53 = vpop.f32.mrb[104].mxu1  ;;  %v12058_v1 = vmov %v6802_v41  ;;  %6815 = vst [vmem:[%s9287_s16 + $0x20] sm:$0xff] (%p11928_p4), %v6803_v5 }
 0x4f5   : >> { %v6781_v27 = vadd.f32 %v8602_v53, %v6700_v19  ;;  %v6772_v58 = vpop.f32.mrb[105].mxu1  ;;  %v12060_v53 = vmov %v6800_v12  ;;  %6818 = vst [vmem:[%s9287_s16 + $0x38] sm:$0xff] (%p11928_p4), %v6806_v46 }
 0x4f6   : >> { %v6773_v28 = vadd.f32 %v6772_v58, %v6692_v39  ;;  %v8603_v35 = vpop.f32.mrb[106].mxu1  ;;  %v12056_v11 = vmov %v6804_v31  ;;  %6816 = vst [vmem:[%s9287_s16 + $0x28] sm:$0xff] (%p11928_p4), %v6804_v31 }
 0x4f7   : >> { %v6797_v23 = vmul.f32 0.1, %v6781_v27  ;;  %v6784_v61 = vadd.f32 %v8603_v35, %v6703_v51  ;;  %v6775_v4 = vpop.f32.mrb[107].mxu1 }
 0x4f8   : >> { %v6795_v52 = vmul.f32 0.1, %v6773_v28  ;;  %v6776_v6 = vadd.f32 %v6775_v4, %v6695_v56  ;;  %3906 = sbr.rel (!%p11928_p4) target bundleno = 556 (0x22c), region = 81 }
 0x4f9   : >> { %v6809_v21 = vadd.f32 %v9169_v24, %v6797_v23   ;;  %v6798_v16 = vmul.f32 0.1, %v6784_v61 }
 0x4fa   : >> { %v6807_v8 = vadd.f32 %v9177_v38, %v6795_v52   ;;  %v6796_v47 = vmul.f32 0.1, %v6776_v6 }
 0x4fb   : >> { %v6810_v18 = vadd.f32 %v12047_v34, %v6798_v16   ;;  %v12051_v24 = vmov %v6809_v21  ;;  %v12055_v16 = vmov %v6805_v29  ;;  %6821 = vst [vmem:[%s9287_s16 + $0x50] sm:$0xff] (%p11928_p4), %v6809_v21 }
 0x4fc   : >> { %v6808_v57 = vadd.f32 %v12048_v14, %v6796_v47   ;;  %v12053_v38 = vmov %v6807_v8  ;;  %v12054_v14 = vmov %v6806_v46  ;;  %v12057_v47 = vmov %v6803_v5  ;;  %6819 = vst [vmem:[%s9287_s16 + $0x40] sm:$0xff] (%p11928_p4), %v6807_v8 }
 0x4fd   : >> { %v12050_v35 = vmov %v6810_v18  ;;  %6822 = vst [vmem:[%s9287_s16 + $0x58] sm:$0xff] (%p11928_p4), %v6810_v18 }
 0x4fe   : >> { %v12052_v17 = vmov %v6808_v57  ;;  %6820 = vst [vmem:[%s9287_s16 + $0x48] sm:$0xff] (%p11928_p4), %v6808_v57 }
 0x4ff PF: > { %s15_s18 = sadd.s32 1, %s9161_s18  }
 0x500   : > { %p12_p5 = scmp.ge.s32.totalorder %s15_s18, 4  }
 0x502   :  { %14 = sbr.rel (!%p12_p5) target bundleno = 1 (0x1), region = 92 }

</bundles_post_ra>
